<compile_context>
chip_gen: v7x
topology: tpu7x:2x2x1
jax: 0.10.0
libtpu: 0.0.40
codegen_flags: <defaults>
</compile_context>

<pallas_src>
import functools

import jax
import jax.numpy as jnp
from jax.experimental import pallas as pl
from jax.experimental.pallas import tpu as pltpu

# ---- small synthetic config (module defaults shrunk) ----
IN_CHANNELS = 16     # must be even
EMB_DIM = 16
HIDDEN_DIM = 32
HIDDEN_DEPTH = 2
N_FLOWS = 3
INV_LRELU_ALPHA = 0.9    # InvLeakyRelu alpha
MLP_LRELU_SLOPE = 0.01   # nn.LeakyReLU default inside the coupling subnets
DEFAULT_ROW_TILE = 4096  # rows (B*H*W) per lane tile; rounded to multiple of 128


def _leaky(x, slope):
    return jnp.where(x >= 0, x, slope * x)


def _round_up(x, m):
    return ((x + m - 1) // m) * m


# -----------------------------------------------------------------------------
# Kernel: one grid step == one lane tile of rows; ALL flows run inside.
# Inputs/state are (channels, rows) so rows sit on the 128-wide lane axis.
# -----------------------------------------------------------------------------
def flow_kernel(x_ref, xc_ref, loc_ref, scale_ref, perm_ref,
                wa_ref, wc_ref, bf_ref, wm_ref, bm_ref, wl_ref, bl_ref,
                xout_ref, ld_ref, *, ch, dout, depth, n_flows):
    f32 = jnp.float32
    bf16 = jnp.bfloat16

    h = x_ref[...]                                # (C, T)  f32 hidden state
    xc_bf = xc_ref[...].astype(bf16)              # (Ce, T) conditioning, cast once
    ld = jnp.zeros(ld_ref.shape, f32)             # (1, T)  per-row coupling logdet

    for f in range(n_flows):                      # statically unrolled (nf small)
        # ---- ActNorm: h = scale * (h + loc).  Row-independent logdet in wrapper.
        h = scale_ref[f] * (h + loc_ref[f])
        # ---- InvLeakyRelu forward (reference returns logdet 0.0)
        h = _leaky(h, INV_LRELU_ALPHA)

        a = h[:ch, :]                             # (C/2, T)
        b = h[ch:, :]                             # (C/2, T)

        def fused_subnet(cond, j, f=f):
            # scale & translation subnets fused block-diagonally (width 2*hidden),
            # computed weight-transposed so T stays on lanes.  bf16 operands,
            # f32 accumulation; tanh only on the scale half of the output.
            z = (jnp.dot(wa_ref[f, j], cond.astype(bf16), preferred_element_type=f32)
                 + jnp.dot(wc_ref[f, j], xc_bf, preferred_element_type=f32)
                 + bf_ref[f, j])
            z = _leaky(z, MLP_LRELU_SLOPE)
            for d in range(depth):
                z = (jnp.dot(wm_ref[f, j, d], z.astype(bf16), preferred_element_type=f32)
                     + bm_ref[f, j, d])
                z = _leaky(z, MLP_LRELU_SLOPE)
            o = (jnp.dot(wl_ref[f, j], z.astype(bf16), preferred_element_type=f32)
                 + bl_ref[f, j])                  # (2*C/2, T)
            return jnp.tanh(o[:dout, :]), o[dout:, :]

        # ---- Conditional double affine coupling (no channel concatenates of h).
        s0, t0 = fused_subnet(a, 0)               # step 0: condition on a, transform b
        b = b * jnp.exp(s0) + t0
        s1, t1 = fused_subnet(b, 1)               # step 1 (post half-swap): condition on b
        a = a * jnp.exp(s1) + t1
        ld = ld + jnp.sum(s0, axis=0, keepdims=True) + jnp.sum(s1, axis=0, keepdims=True)

        # ---- Shuffle with the coupling's trailing half-swap folded in:
        #      (cat([b, a], cols) @ P)^T == P^T @ cat([b; a], rows)
        hcat = jnp.concatenate([b, a], axis=0).astype(bf16)
        h = jnp.dot(perm_ref[f], hcat, preferred_element_type=f32)

    xout_ref[...] = h                              # single lane-dense store per tile
    ld_ref[...] = ld


# -----------------------------------------------------------------------------
# Parameters: raw per-subnet weights (module-style), then fused/transposed
# wrapper-side into lane-dense kernel weights (bf16 matmul operands).
# -----------------------------------------------------------------------------
def init_params(key, c=IN_CHANNELS, ce=EMB_DIM, hd=HIDDEN_DIM,
                depth=HIDDEN_DEPTH, nf=N_FLOWS):
    din = c // 2 + ce
    dout = c // 2
    ks = jax.random.split(key, 8)
    loc = 0.1 * jax.random.normal(ks[0], (nf, 1, c), jnp.float32)
    scale = 1.0 + 0.1 * jax.random.normal(ks[1], (nf, 1, c), jnp.float32)

    perm_mats = []
    for f in range(nf):
        idx = jax.random.permutation(jax.random.fold_in(ks[2], f), c)
        # (x @ P)[:, b] == x[:, idx[b]]
        perm_mats.append(jnp.eye(c, dtype=jnp.float32)[idx].T)
    perm = jnp.stack(perm_mats)

    def w(k, shape, fan_in):
        return (1.0 / jnp.sqrt(fan_in)) * jax.random.normal(k, shape, jnp.float32)

    # subnet slots: 0,1 = scale nets (step 0/1); 2,3 = translation nets (step 0/1)
    wf = w(ks[3], (nf, 4, din, hd), din)
    bf = 0.01 * jax.random.normal(ks[4], (nf, 4, 1, hd), jnp.float32)
    wm = w(ks[5], (nf, 4, depth, hd, hd), hd)
    bm = 0.01 * jax.random.normal(ks[6], (nf, 4, depth, 1, hd), jnp.float32)
    wl = w(ks[7], (nf, 4, hd, dout), hd)
    bl = jnp.zeros((nf, 4, 1, dout), jnp.float32)
    return dict(loc=loc, scale=scale, perm=perm,
                wf=wf, bf=bf, wm=wm, bm=bm, wl=wl, bl=bl)


def fuse_params(p):
    """Fold the 4 per-flow subnets into 2 fused (scale|translate) subnets per
    coupling step (vertically stacked first layer split into a / embedding
    parts, block-diagonal mid/last layers), TRANSPOSED for the (C, T) layout,
    with matmul weights cast to bf16.  Mathematically identical forward."""
    wf, bf, wm, bm, wl, bl = p["wf"], p["bf"], p["wm"], p["bm"], p["wl"], p["bl"]
    nf = wf.shape[0]
    depth = wm.shape[2]
    dout = wl.shape[-1]               # = C // 2
    ch = dout
    din = wf.shape[2]
    ce = din - ch                     # embedding dim (fixed: old assert here was wrong)
    assert ce > 0

    def bd(A, B):                     # block-diagonal [[A, 0], [0, B]]
        za = jnp.zeros((A.shape[0], B.shape[1]), A.dtype)
        zb = jnp.zeros((B.shape[0], A.shape[1]), B.dtype)
        return jnp.concatenate([jnp.concatenate([A, za], axis=1),
                                jnp.concatenate([zb, B], axis=1)], axis=0)

    wa_t, wc_t, bf_t, wm_t, bm_t, wl_t, bl_t = [], [], [], [], [], [], []
    for f in range(nf):
        wa_j, wc_j, bf_j, wm_j, bm_j, wl_j, bl_j = [], [], [], [], [], [], []
        for j in range(2):
            ws, wt = wf[f, j], wf[f, 2 + j]                               # (din, hd)
            wa_j.append(jnp.concatenate([ws[:ch].T, wt[:ch].T], axis=0))  # (2hd, ch)
            wc_j.append(jnp.concatenate([ws[ch:].T, wt[ch:].T], axis=0))  # (2hd, ce)
            bf_j.append(jnp.concatenate([bf[f, j], bf[f, 2 + j]], axis=-1).T)   # (2hd, 1)
            wm_j.append(jnp.stack([bd(wm[f, j, d].T, wm[f, 2 + j, d].T)
                                   for d in range(depth)]))               # (depth, 2hd, 2hd)
            bm_j.append(jnp.stack([jnp.concatenate([bm[f, j, d], bm[f, 2 + j, d]], axis=-1).T
                                   for d in range(depth)]))               # (depth, 2hd, 1)
            wl_j.append(bd(wl[f, j].T, wl[f, 2 + j].T))                   # (2dout, 2hd)
            bl_j.append(jnp.concatenate([bl[f, j], bl[f, 2 + j]], axis=-1).T)   # (2dout, 1)
        wa_t.append(jnp.stack(wa_j)); wc_t.append(jnp.stack(wc_j)); bf_t.append(jnp.stack(bf_j))
        wm_t.append(jnp.stack(wm_j)); bm_t.append(jnp.stack(bm_j))
        wl_t.append(jnp.stack(wl_j)); bl_t.append(jnp.stack(bl_j))

    bf16 = jnp.bfloat16
    return dict(
        loc=jnp.transpose(p["loc"], (0, 2, 1)),        # (nf, C, 1)  f32
        scale=jnp.transpose(p["scale"], (0, 2, 1)),    # (nf, C, 1)  f32
        perm=jnp.transpose(p["perm"], (0, 2, 1)).astype(bf16),   # (nf, C, C) = P^T
        wa=jnp.stack(wa_t).astype(bf16),               # (nf, 2, 2hd, C/2)
        wc=jnp.stack(wc_t).astype(bf16),               # (nf, 2, 2hd, Ce)
        bf=jnp.stack(bf_t).astype(jnp.float32),        # (nf, 2, 2hd, 1)
        wm=jnp.stack(wm_t).astype(bf16),               # (nf, 2, depth, 2hd, 2hd)
        bm=jnp.stack(bm_t).astype(jnp.float32),        # (nf, 2, depth, 2hd, 1)
        wl=jnp.stack(wl_t).astype(bf16),               # (nf, 2, 2*(C/2), 2hd)
        bl=jnp.stack(bl_t).astype(jnp.float32),        # (nf, 2, 2*(C/2), 1)
    )


def _const_index_map(ndim):
    def imap(r):
        return (0,) * ndim
    return imap


def _full_spec(arr):
    # Whole array resident in VMEM; constant index map -> fetched once per call.
    return pl.BlockSpec(arr.shape, _const_index_map(arr.ndim))


# -----------------------------------------------------------------------------
# Wrapper
# -----------------------------------------------------------------------------
def conditional_conv_flow_forward(x_nchw, emb_nchw, params, *, row_tile=DEFAULT_ROW_TILE):
    """Forward pass.  x_nchw: (B, C, H, W), emb_nchw: (B, Ce, H, W).
    Returns (x_out (B, C, H, W), logdet (B,))."""
    B, C, H, W = x_nchw.shape
    Bc, Ce, Hc, Wc = emb_nchw.shape
    assert (B, H, W) == (Bc, Hc, Wc)
    assert C % 2 == 0
    ch = C // 2

    fp = fuse_params(params)
    nf = fp["loc"].shape[0]
    depth = fp["wm"].shape[2]
    dout = fp["wl"].shape[2] // 2
    assert fp["wa"].shape[-1] == ch and dout == ch and fp["wc"].shape[-1] == Ce

    N = B * H * W
    # channels-on-sublanes / rows-on-lanes layout: (C, N)
    x_t = jnp.transpose(x_nchw, (1, 0, 2, 3)).reshape(C, N).astype(jnp.float32)
    xc_t = jnp.transpose(emb_nchw, (1, 0, 2, 3)).reshape(Ce, N).astype(jnp.float32)

    # Lane tiling: multiple of 128; aim for >= 2 tiles (v7x has 2 TensorCores,
    # the single "parallel" grid axis is what gets sharded across them).
    tile = max(128, min(_round_up(row_tile, 128), _round_up(pl.cdiv(N, 2), 128)))
    n_pad = _round_up(N, tile)
    if n_pad != N:
        x_t = jnp.pad(x_t, ((0, 0), (0, n_pad - N)))
        xc_t = jnp.pad(xc_t, ((0, 0), (0, n_pad - N)))

    kernel = functools.partial(flow_kernel, ch=ch, dout=dout, depth=depth, n_flows=nf)

    grid_spec = pltpu.PrefetchScalarGridSpec(
        num_scalar_prefetch=0,
        grid=(n_pad // tile,),                       # lane tiles only; flows run in-kernel
        in_specs=[
            pl.BlockSpec((C, tile), lambda r: (0, r)),    # x (C, N)
            pl.BlockSpec((Ce, tile), lambda r: (0, r)),   # embedding (Ce, N)
            _full_spec(fp["loc"]), _full_spec(fp["scale"]), _full_spec(fp["perm"]),
            _full_spec(fp["wa"]), _full_spec(fp["wc"]), _full_spec(fp["bf"]),
            _full_spec(fp["wm"]), _full_spec(fp["bm"]), _full_spec(fp["wl"]),
            _full_spec(fp["bl"]),
        ],
        out_specs=[
            pl.BlockSpec((C, tile), lambda r: (0, r)),    # transformed x (C, N)
            pl.BlockSpec((1, tile), lambda r: (0, r)),    # per-row coupling logdet
        ],
    )

    x_out_t, ld_t = pl.pallas_call(
        kernel,
        out_shape=(jax.ShapeDtypeStruct((C, n_pad), jnp.float32),
                   jax.ShapeDtypeStruct((1, n_pad), jnp.float32)),
        grid_spec=grid_spec,
        compiler_params=pltpu.CompilerParams(
            dimension_semantics=("parallel",),
            vmem_limit_bytes=32 * 1024 * 1024),
    )(x_t, xc_t,
      fp["loc"], fp["scale"], fp["perm"],
      fp["wa"], fp["wc"], fp["bf"], fp["wm"], fp["bm"], fp["wl"], fp["bl"])

    x_out = jnp.transpose(x_out_t[:, :N].reshape(C, B, H, W), (1, 0, 2, 3))
    # data-dependent coupling logdet (per row) summed per batch element ...
    logdet = ld_t[0, :N].reshape(B, H * W).sum(axis=-1)
    # ... plus the row-independent ActNorm logdet, hoisted out of the kernel.
    logdet = logdet + (H * W) * jnp.sum(jnp.log(jnp.abs(params["scale"])))
    return x_out, logdet


# -----------------------------------------------------------------------------
# Pure-JAX reference (unfused, row-major, mirrors the module semantics).
# `mm_dtype` selects the matmul operand precision so the kernel (bf16 operands,
# f32 accumulation) can be checked tightly against a precision-matched copy.
# -----------------------------------------------------------------------------
def _reference_forward(x_nchw, emb_nchw, p, mm_dtype=jnp.float32):
    B, C, H, W = x_nchw.shape
    Ce = emb_nchw.shape[1]
    N = B * H * W
    h = jnp.transpose(x_nchw, (0, 2, 3, 1)).reshape(N, C).astype(jnp.float32)
    xc = jnp.transpose(emb_nchw, (0, 2, 3, 1)).reshape(N, Ce).astype(jnp.float32)
    nf = p["loc"].shape[0]
    depth = p["wm"].shape[2]
    ch = C // 2
    ld = jnp.zeros((N, 1), jnp.float32)

    def mm(A, Bm):
        return jnp.dot(A.astype(mm_dtype), Bm.astype(mm_dtype),
                       preferred_element_type=jnp.float32)

    for f in range(nf):
        h = p["scale"][f] * (h + p["loc"][f])
        ld = ld + jnp.sum(jnp.log(jnp.abs(p["scale"][f])), axis=-1, keepdims=True)
        h = _leaky(h, INV_LRELU_ALPHA)

        def mlp(inp, k, use_tanh, f=f):
            z = _leaky(mm(inp, p["wf"][f, k]) + p["bf"][f, k], MLP_LRELU_SLOPE)
            for d in range(depth):
                z = _leaky(mm(z, p["wm"][f, k, d]) + p["bm"][f, k, d], MLP_LRELU_SLOPE)
            z = mm(z, p["wl"][f, k]) + p["bl"][f, k]
            return jnp.tanh(z) if use_tanh else z

        for j in range(2):
            if j == 1:
                h = jnp.concatenate([h[:, ch:], h[:, :ch]], axis=1)
            xa, xb = h[:, :ch], h[:, ch:]
            cond = jnp.concatenate([xa, xc], axis=1)
            s = mlp(cond, j, True)
            t = mlp(cond, 2 + j, False)
            xb = xb * jnp.exp(s) + t
            h = jnp.concatenate([xa, xb], axis=1)
            ld = ld + jnp.sum(s, axis=-1, keepdims=True)
        h = mm(h, p["perm"][f])
    x_out = jnp.transpose(h.reshape(B, H, W, C), (0, 3, 1, 2))
    logdet = ld[:, 0].reshape(B, H * W).sum(axis=-1)
    return x_out, logdet


if __name__ == "__main__":
    key = jax.random.PRNGKey(0)
    kp, kx, ke, kx2, ke2 = jax.random.split(key, 5)
    params = init_params(kp)

    def coarse_close(a, b, rel, ab):
        return bool(jnp.all(jnp.abs(a - b) <= ab + rel * jnp.abs(b)))

    # Case 1: flat latents (B, C, 1, 1), matching the module's intended use.
    B, H, W = 2, 1, 1
    x = jax.random.normal(kx, (B, IN_CHANNELS, H, W), jnp.float32)
    emb = jax.random.normal(ke, (B, EMB_DIM, H, W), jnp.float32)
    y, logdet = conditional_conv_flow_forward(x, emb, params)
    jax.block_until_ready((y, logdet))
    assert y.shape == x.shape and logdet.shape == (B,)
    assert bool(jnp.all(jnp.isfinite(y))) and bool(jnp.all(jnp.isfinite(logdet)))
    # tight check vs a precision-matched reference (bf16 matmul operands, f32 accum)
    y_bf, ld_bf = _reference_forward(x, emb, params, mm_dtype=jnp.bfloat16)
    assert bool(jnp.allclose(y, y_bf, rtol=1e-2, atol=1e-2)), "x mismatch (flat case)"
    assert bool(jnp.allclose(logdet, ld_bf, rtol=1e-2, atol=1e-2)), "logdet mismatch (flat case)"
    # coarse sanity vs the pure-f32 module forward (difference = bf16 operand rounding)
    y_f32, ld_f32 = _reference_forward(x, emb, params, mm_dtype=jnp.float32)
    assert coarse_close(y, y_f32, 0.3, 0.3), "x far from f32 reference (flat case)"
    assert coarse_close(logdet, ld_f32, 0.3, 0.3 * H * W), "logdet far from f32 reference (flat case)"

    # Case 2: spatial input exercising multiple lane tiles + lane padding.
    B2, H2, W2 = 2, 12, 12               # N = 288 -> two 256-wide tiles (padded to 512)
    x2 = jax.random.normal(kx2, (B2, IN_CHANNELS, H2, W2), jnp.float32)
    emb2 = jax.random.normal(ke2, (B2, EMB_DIM, H2, W2), jnp.float32)
    y2, logdet2 = conditional_conv_flow_forward(x2, emb2, params, row_tile=256)
    jax.block_until_ready((y2, logdet2))
    assert y2.shape == x2.shape and logdet2.shape == (B2,)
    assert bool(jnp.all(jnp.isfinite(y2))) and bool(jnp.all(jnp.isfinite(logdet2)))
    y2_bf, ld2_bf = _reference_forward(x2, emb2, params, mm_dtype=jnp.bfloat16)
    assert bool(jnp.allclose(y2, y2_bf, rtol=1e-2, atol=1e-2)), "x mismatch (spatial case)"
    assert bool(jnp.allclose(logdet2, ld2_bf, rtol=1e-2, atol=1e-2)), "logdet mismatch (spatial case)"
    y2_f32, ld2_f32 = _reference_forward(x2, emb2, params, mm_dtype=jnp.float32)
    assert coarse_close(y2, y2_f32, 0.3, 0.3), "x far from f32 reference (spatial case)"
    assert coarse_close(logdet2, ld2_f32, 0.3, 0.3 * H2 * W2), "logdet far from f32 reference (spatial case)"

    print("KERNEL_OK")
</pallas_src>

<mosaic_0001>
module attributes {stable_mosaic.version = 11 : i64} {
  func.func @flow_kernel(%arg0: i32, %arg1: memref<16x128xf32, #tpu.memory_space<vmem>>, %arg2: memref<16x128xf32, #tpu.memory_space<vmem>>, %arg3: memref<3x16x1xf32, #tpu.memory_space<vmem>>, %arg4: memref<3x16x1xf32, #tpu.memory_space<vmem>>, %arg5: memref<3x16x16xbf16, #tpu.memory_space<vmem>>, %arg6: memref<3x2x64x8xbf16, #tpu.memory_space<vmem>>, %arg7: memref<3x2x64x16xbf16, #tpu.memory_space<vmem>>, %arg8: memref<3x2x64x1xf32, #tpu.memory_space<vmem>>, %arg9: memref<3x2x2x64x64xbf16, #tpu.memory_space<vmem>>, %arg10: memref<3x2x2x64x1xf32, #tpu.memory_space<vmem>>, %arg11: memref<3x2x16x64xbf16, #tpu.memory_space<vmem>>, %arg12: memref<3x2x16x1xf32, #tpu.memory_space<vmem>>, %arg13: memref<16x128xf32, #tpu.memory_space<vmem>>, %arg14: memref<1x128xf32, #tpu.memory_space<vmem>>) attributes {dimension_semantics = [#tpu.dimension_semantics<parallel>], iteration_bounds = array<i64: 1>, scalar_prefetch = 0 : i64, scratch_operands = 0 : i64, tpu.core_type = #tpu.core_type<tc>, window_params = [{transform_indices = @transform_0, window_bounds = array<i64: 16, 128>}, {transform_indices = @transform_1, window_bounds = array<i64: 16, 128>}, {pipeline_mode = #tpu.pipeline_mode<synchronous>, transform_indices = @transform_2, window_bounds = array<i64: 3, 16, 1>}, {pipeline_mode = #tpu.pipeline_mode<synchronous>, transform_indices = @transform_3, window_bounds = array<i64: 3, 16, 1>}, {pipeline_mode = #tpu.pipeline_mode<synchronous>, transform_indices = @transform_4, window_bounds = array<i64: 3, 16, 16>}, {pipeline_mode = #tpu.pipeline_mode<synchronous>, transform_indices = @transform_5, window_bounds = array<i64: 3, 2, 64, 8>}, {pipeline_mode = #tpu.pipeline_mode<synchronous>, transform_indices = @transform_6, window_bounds = array<i64: 3, 2, 64, 16>}, {pipeline_mode = #tpu.pipeline_mode<synchronous>, transform_indices = @transform_7, window_bounds = array<i64: 3, 2, 64, 1>}, {pipeline_mode = #tpu.pipeline_mode<synchronous>, transform_indices = @transform_8, window_bounds = array<i64: 3, 2, 2, 64, 64>}, {pipeline_mode = #tpu.pipeline_mode<synchronous>, transform_indices = @transform_9, window_bounds = array<i64: 3, 2, 2, 64, 1>}, {pipeline_mode = #tpu.pipeline_mode<synchronous>, transform_indices = @transform_10, window_bounds = array<i64: 3, 2, 16, 64>}, {pipeline_mode = #tpu.pipeline_mode<synchronous>, transform_indices = @transform_11, window_bounds = array<i64: 3, 2, 16, 1>}, {transform_indices = @transform_12, window_bounds = array<i64: 16, 128>}, {transform_indices = @transform_13, window_bounds = array<i64: 1, 128>}]} {
    %c0 = arith.constant 0 : index
    %c0_0 = arith.constant 0 : index
    %0 = vector.load %arg1[%c0, %c0_0] : memref<16x128xf32, #tpu.memory_space<vmem>>, vector<16x128xf32>
    %c0_1 = arith.constant 0 : index
    %c0_2 = arith.constant 0 : index
    %1 = vector.load %arg2[%c0_1, %c0_2] : memref<16x128xf32, #tpu.memory_space<vmem>>, vector<16x128xf32>
    %2 = arith.truncf %1 : vector<16x128xf32> to vector<16x128xbf16>
    %cst = arith.constant 0.000000e+00 : f32
    %3 = vector.broadcast %cst : f32 to vector<1x128xf32>
    %c0_3 = arith.constant 0 : index
    %c0_4 = arith.constant 0 : index
    %c0_5 = arith.constant 0 : index
    %4 = vector.load %arg4[%c0_3, %c0_4, %c0_5] : memref<3x16x1xf32, #tpu.memory_space<vmem>>, vector<1x16x1xf32>
    %5 = vector.shape_cast %4 : vector<1x16x1xf32> to vector<16x1xf32>
    %c0_6 = arith.constant 0 : index
    %c0_7 = arith.constant 0 : index
    %c0_8 = arith.constant 0 : index
    %6 = vector.load %arg3[%c0_6, %c0_7, %c0_8] : memref<3x16x1xf32, #tpu.memory_space<vmem>>, vector<1x16x1xf32>
    %7 = vector.shape_cast %6 : vector<1x16x1xf32> to vector<16x1xf32>
    %8 = vector.broadcast %7 : vector<16x1xf32> to vector<16x128xf32>
    %9 = arith.addf %0, %8 : vector<16x128xf32>
    %10 = vector.broadcast %5 : vector<16x1xf32> to vector<16x128xf32>
    %11 = arith.mulf %10, %9 : vector<16x128xf32>
    %cst_9 = arith.constant 0.000000e+00 : f32
    %12 = vector.broadcast %cst_9 : f32 to vector<16x128xf32>
    %13 = arith.cmpf oge, %11, %12 : vector<16x128xf32>
    %cst_10 = arith.constant 0.899999976 : f32
    %14 = vector.broadcast %cst_10 : f32 to vector<16x128xf32>
    %15 = arith.mulf %14, %11 : vector<16x128xf32>
    %16 = arith.select %13, %11, %15 : vector<16x128xi1>, vector<16x128xf32>
    %17 = vector.extract_strided_slice %16 {offsets = [0, 0], sizes = [8, 128], strides = [1, 1]} : vector<16x128xf32> to vector<8x128xf32>
    %18 = vector.extract_strided_slice %16 {offsets = [8, 0], sizes = [8, 128], strides = [1, 1]} : vector<16x128xf32> to vector<8x128xf32>
    %c0_11 = arith.constant 0 : index
    %c0_12 = arith.constant 0 : index
    %c0_13 = arith.constant 0 : index
    %c0_14 = arith.constant 0 : index
    %19 = vector.load %arg6[%c0_11, %c0_12, %c0_13, %c0_14] : memref<3x2x64x8xbf16, #tpu.memory_space<vmem>>, vector<1x1x64x8xbf16>
    %20 = vector.shape_cast %19 : vector<1x1x64x8xbf16> to vector<64x8xbf16>
    %21 = arith.truncf %17 : vector<8x128xf32> to vector<8x128xbf16>
    %cst_15 = arith.constant dense<0.000000e+00> : vector<64x128xf32>
    %22 = tpu.matmul %20, %21, %cst_15 {dimension_numbers = #tpu.dot_dimension_numbers<[1], [0], [0], [1], [0, 0, 1, 1], [], []>} : vector<64x8xbf16>, vector<8x128xbf16>, vector<64x128xf32> -> vector<64x128xf32>
    %c0_16 = arith.constant 0 : index
    %c0_17 = arith.constant 0 : index
    %c0_18 = arith.constant 0 : index
    %c0_19 = arith.constant 0 : index
    %23 = vector.load %arg7[%c0_16, %c0_17, %c0_18, %c0_19] : memref<3x2x64x16xbf16, #tpu.memory_space<vmem>>, vector<1x1x64x16xbf16>
    %24 = vector.shape_cast %23 : vector<1x1x64x16xbf16> to vector<64x16xbf16>
    %cst_20 = arith.constant dense<0.000000e+00> : vector<64x128xf32>
    %25 = tpu.matmul %24, %2, %cst_20 {dimension_numbers = #tpu.dot_dimension_numbers<[1], [0], [0], [1], [0, 0, 1, 1], [], []>} : vector<64x16xbf16>, vector<16x128xbf16>, vector<64x128xf32> -> vector<64x128xf32>
    %26 = arith.addf %22, %25 : vector<64x128xf32>
    %c0_21 = arith.constant 0 : index
    %c0_22 = arith.constant 0 : index
    %c0_23 = arith.constant 0 : index
    %c0_24 = arith.constant 0 : index
    %27 = vector.load %arg8[%c0_21, %c0_22, %c0_23, %c0_24] : memref<3x2x64x1xf32, #tpu.memory_space<vmem>>, vector<1x1x64x1xf32>
    %28 = vector.shape_cast %27 : vector<1x1x64x1xf32> to vector<64x1xf32>
    %29 = vector.broadcast %28 : vector<64x1xf32> to vector<64x128xf32>
    %30 = arith.addf %26, %29 : vector<64x128xf32>
    %cst_25 = arith.constant 0.000000e+00 : f32
    %31 = vector.broadcast %cst_25 : f32 to vector<64x128xf32>
    %32 = arith.cmpf oge, %30, %31 : vector<64x128xf32>
    %cst_26 = arith.constant 0.00999999977 : f32
    %33 = vector.broadcast %cst_26 : f32 to vector<64x128xf32>
    %34 = arith.mulf %33, %30 : vector<64x128xf32>
    %35 = arith.select %32, %30, %34 : vector<64x128xi1>, vector<64x128xf32>
    %c0_27 = arith.constant 0 : index
    %c0_28 = arith.constant 0 : index
    %c0_29 = arith.constant 0 : index
    %c0_30 = arith.constant 0 : index
    %c0_31 = arith.constant 0 : index
    %36 = vector.load %arg9[%c0_27, %c0_28, %c0_29, %c0_30, %c0_31] : memref<3x2x2x64x64xbf16, #tpu.memory_space<vmem>>, vector<1x1x1x64x64xbf16>
    %37 = vector.shape_cast %36 : vector<1x1x1x64x64xbf16> to vector<64x64xbf16>
    %38 = arith.truncf %35 : vector<64x128xf32> to vector<64x128xbf16>
    %cst_32 = arith.constant dense<0.000000e+00> : vector<64x128xf32>
    %39 = tpu.matmul %37, %38, %cst_32 {dimension_numbers = #tpu.dot_dimension_numbers<[1], [0], [0], [1], [0, 0, 1, 1], [], []>} : vector<64x64xbf16>, vector<64x128xbf16>, vector<64x128xf32> -> vector<64x128xf32>
    %c0_33 = arith.constant 0 : index
    %c0_34 = arith.constant 0 : index
    %c0_35 = arith.constant 0 : index
    %c0_36 = arith.constant 0 : index
    %c0_37 = arith.constant 0 : index
    %40 = vector.load %arg10[%c0_33, %c0_34, %c0_35, %c0_36, %c0_37] : memref<3x2x2x64x1xf32, #tpu.memory_space<vmem>>, vector<1x1x1x64x1xf32>
    %41 = vector.shape_cast %40 : vector<1x1x1x64x1xf32> to vector<64x1xf32>
    %42 = vector.broadcast %41 : vector<64x1xf32> to vector<64x128xf32>
    %43 = arith.addf %39, %42 : vector<64x128xf32>
    %cst_38 = arith.constant 0.000000e+00 : f32
    %44 = vector.broadcast %cst_38 : f32 to vector<64x128xf32>
    %45 = arith.cmpf oge, %43, %44 : vector<64x128xf32>
    %cst_39 = arith.constant 0.00999999977 : f32
    %46 = vector.broadcast %cst_39 : f32 to vector<64x128xf32>
    %47 = arith.mulf %46, %43 : vector<64x128xf32>
    %48 = arith.select %45, %43, %47 : vector<64x128xi1>, vector<64x128xf32>
    %c0_40 = arith.constant 0 : index
    %c0_41 = arith.constant 0 : index
    %c1 = arith.constant 1 : index
    %c0_42 = arith.constant 0 : index
    %c0_43 = arith.constant 0 : index
    %49 = vector.load %arg9[%c0_40, %c0_41, %c1, %c0_42, %c0_43] : memref<3x2x2x64x64xbf16, #tpu.memory_space<vmem>>, vector<1x1x1x64x64xbf16>
    %50 = vector.shape_cast %49 : vector<1x1x1x64x64xbf16> to vector<64x64xbf16>
    %51 = arith.truncf %48 : vector<64x128xf32> to vector<64x128xbf16>
    %cst_44 = arith.constant dense<0.000000e+00> : vector<64x128xf32>
    %52 = tpu.matmul %50, %51, %cst_44 {dimension_numbers = #tpu.dot_dimension_numbers<[1], [0], [0], [1], [0, 0, 1, 1], [], []>} : vector<64x64xbf16>, vector<64x128xbf16>, vector<64x128xf32> -> vector<64x128xf32>
    %c0_45 = arith.constant 0 : index
    %c0_46 = arith.constant 0 : index
    %c1_47 = arith.constant 1 : index
    %c0_48 = arith.constant 0 : index
    %c0_49 = arith.constant 0 : index
    %53 = vector.load %arg10[%c0_45, %c0_46, %c1_47, %c0_48, %c0_49] : memref<3x2x2x64x1xf32, #tpu.memory_space<vmem>>, vector<1x1x1x64x1xf32>
    %54 = vector.shape_cast %53 : vector<1x1x1x64x1xf32> to vector<64x1xf32>
    %55 = vector.broadcast %54 : vector<64x1xf32> to vector<64x128xf32>
    %56 = arith.addf %52, %55 : vector<64x128xf32>
    %cst_50 = arith.constant 0.000000e+00 : f32
    %57 = vector.broadcast %cst_50 : f32 to vector<64x128xf32>
    %58 = arith.cmpf oge, %56, %57 : vector<64x128xf32>
    %cst_51 = arith.constant 0.00999999977 : f32
    %59 = vector.broadcast %cst_51 : f32 to vector<64x128xf32>
    %60 = arith.mulf %59, %56 : vector<64x128xf32>
    %61 = arith.select %58, %56, %60 : vector<64x128xi1>, vector<64x128xf32>
    %c0_52 = arith.constant 0 : index
    %c0_53 = arith.constant 0 : index
    %c0_54 = arith.constant 0 : index
    %c0_55 = arith.constant 0 : index
    %62 = vector.load %arg11[%c0_52, %c0_53, %c0_54, %c0_55] : memref<3x2x16x64xbf16, #tpu.memory_space<vmem>>, vector<1x1x16x64xbf16>
    %63 = vector.shape_cast %62 : vector<1x1x16x64xbf16> to vector<16x64xbf16>
    %64 = arith.truncf %61 : vector<64x128xf32> to vector<64x128xbf16>
    %cst_56 = arith.constant dense<0.000000e+00> : vector<16x128xf32>
    %65 = tpu.matmul %63, %64, %cst_56 {dimension_numbers = #tpu.dot_dimension_numbers<[1], [0], [0], [1], [0, 0, 1, 1], [], []>} : vector<16x64xbf16>, vector<64x128xbf16>, vector<16x128xf32> -> vector<16x128xf32>
    %c0_57 = arith.constant 0 : index
    %c0_58 = arith.constant 0 : index
    %c0_59 = arith.constant 0 : index
    %c0_60 = arith.constant 0 : index
    %66 = vector.load %arg12[%c0_57, %c0_58, %c0_59, %c0_60] : memref<3x2x16x1xf32, #tpu.memory_space<vmem>>, vector<1x1x16x1xf32>
    %67 = vector.shape_cast %66 : vector<1x1x16x1xf32> to vector<16x1xf32>
    %68 = vector.broadcast %67 : vector<16x1xf32> to vector<16x128xf32>
    %69 = arith.addf %65, %68 : vector<16x128xf32>
    %70 = vector.extract_strided_slice %69 {offsets = [0, 0], sizes = [8, 128], strides = [1, 1]} : vector<16x128xf32> to vector<8x128xf32>
    %71 = math.tanh %70 : vector<8x128xf32>
    %72 = vector.extract_strided_slice %69 {offsets = [8, 0], sizes = [8, 128], strides = [1, 1]} : vector<16x128xf32> to vector<8x128xf32>
    %73 = math.exp %71 : vector<8x128xf32>
    %74 = arith.mulf %18, %73 : vector<8x128xf32>
    %75 = arith.addf %74, %72 : vector<8x128xf32>
    %c0_61 = arith.constant 0 : index
    %c1_62 = arith.constant 1 : index
    %c0_63 = arith.constant 0 : index
    %c0_64 = arith.constant 0 : index
    %76 = vector.load %arg6[%c0_61, %c1_62, %c0_63, %c0_64] : memref<3x2x64x8xbf16, #tpu.memory_space<vmem>>, vector<1x1x64x8xbf16>
    %77 = vector.shape_cast %76 : vector<1x1x64x8xbf16> to vector<64x8xbf16>
    %78 = arith.truncf %75 : vector<8x128xf32> to vector<8x128xbf16>
    %cst_65 = arith.constant dense<0.000000e+00> : vector<64x128xf32>
    %79 = tpu.matmul %77, %78, %cst_65 {dimension_numbers = #tpu.dot_dimension_numbers<[1], [0], [0], [1], [0, 0, 1, 1], [], []>} : vector<64x8xbf16>, vector<8x128xbf16>, vector<64x128xf32> -> vector<64x128xf32>
    %c0_66 = arith.constant 0 : index
    %c1_67 = arith.constant 1 : index
    %c0_68 = arith.constant 0 : index
    %c0_69 = arith.constant 0 : index
    %80 = vector.load %arg7[%c0_66, %c1_67, %c0_68, %c0_69] : memref<3x2x64x16xbf16, #tpu.memory_space<vmem>>, vector<1x1x64x16xbf16>
    %81 = vector.shape_cast %80 : vector<1x1x64x16xbf16> to vector<64x16xbf16>
    %cst_70 = arith.constant dense<0.000000e+00> : vector<64x128xf32>
    %82 = tpu.matmul %81, %2, %cst_70 {dimension_numbers = #tpu.dot_dimension_numbers<[1], [0], [0], [1], [0, 0, 1, 1], [], []>} : vector<64x16xbf16>, vector<16x128xbf16>, vector<64x128xf32> -> vector<64x128xf32>
    %83 = arith.addf %79, %82 : vector<64x128xf32>
    %c0_71 = arith.constant 0 : index
    %c1_72 = arith.constant 1 : index
    %c0_73 = arith.constant 0 : index
    %c0_74 = arith.constant 0 : index
    %84 = vector.load %arg8[%c0_71, %c1_72, %c0_73, %c0_74] : memref<3x2x64x1xf32, #tpu.memory_space<vmem>>, vector<1x1x64x1xf32>
    %85 = vector.shape_cast %84 : vector<1x1x64x1xf32> to vector<64x1xf32>
    %86 = vector.broadcast %85 : vector<64x1xf32> to vector<64x128xf32>
    %87 = arith.addf %83, %86 : vector<64x128xf32>
    %cst_75 = arith.constant 0.000000e+00 : f32
    %88 = vector.broadcast %cst_75 : f32 to vector<64x128xf32>
    %89 = arith.cmpf oge, %87, %88 : vector<64x128xf32>
    %cst_76 = arith.constant 0.00999999977 : f32
    %90 = vector.broadcast %cst_76 : f32 to vector<64x128xf32>
    %91 = arith.mulf %90, %87 : vector<64x128xf32>
    %92 = arith.select %89, %87, %91 : vector<64x128xi1>, vector<64x128xf32>
    %c0_77 = arith.constant 0 : index
    %c1_78 = arith.constant 1 : index
    %c0_79 = arith.constant 0 : index
    %c0_80 = arith.constant 0 : index
    %c0_81 = arith.constant 0 : index
    %93 = vector.load %arg9[%c0_77, %c1_78, %c0_79, %c0_80, %c0_81] : memref<3x2x2x64x64xbf16, #tpu.memory_space<vmem>>, vector<1x1x1x64x64xbf16>
    %94 = vector.shape_cast %93 : vector<1x1x1x64x64xbf16> to vector<64x64xbf16>
    %95 = arith.truncf %92 : vector<64x128xf32> to vector<64x128xbf16>
    %cst_82 = arith.constant dense<0.000000e+00> : vector<64x128xf32>
    %96 = tpu.matmul %94, %95, %cst_82 {dimension_numbers = #tpu.dot_dimension_numbers<[1], [0], [0], [1], [0, 0, 1, 1], [], []>} : vector<64x64xbf16>, vector<64x128xbf16>, vector<64x128xf32> -> vector<64x128xf32>
    %c0_83 = arith.constant 0 : index
    %c1_84 = arith.constant 1 : index
    %c0_85 = arith.constant 0 : index
    %c0_86 = arith.constant 0 : index
    %c0_87 = arith.constant 0 : index
    %97 = vector.load %arg10[%c0_83, %c1_84, %c0_85, %c0_86, %c0_87] : memref<3x2x2x64x1xf32, #tpu.memory_space<vmem>>, vector<1x1x1x64x1xf32>
    %98 = vector.shape_cast %97 : vector<1x1x1x64x1xf32> to vector<64x1xf32>
    %99 = vector.broadcast %98 : vector<64x1xf32> to vector<64x128xf32>
    %100 = arith.addf %96, %99 : vector<64x128xf32>
    %cst_88 = arith.constant 0.000000e+00 : f32
    %101 = vector.broadcast %cst_88 : f32 to vector<64x128xf32>
    %102 = arith.cmpf oge, %100, %101 : vector<64x128xf32>
    %cst_89 = arith.constant 0.00999999977 : f32
    %103 = vector.broadcast %cst_89 : f32 to vector<64x128xf32>
    %104 = arith.mulf %103, %100 : vector<64x128xf32>
    %105 = arith.select %102, %100, %104 : vector<64x128xi1>, vector<64x128xf32>
    %c0_90 = arith.constant 0 : index
    %c1_91 = arith.constant 1 : index
    %c1_92 = arith.constant 1 : index
    %c0_93 = arith.constant 0 : index
    %c0_94 = arith.constant 0 : index
    %106 = vector.load %arg9[%c0_90, %c1_91, %c1_92, %c0_93, %c0_94] : memref<3x2x2x64x64xbf16, #tpu.memory_space<vmem>>, vector<1x1x1x64x64xbf16>
    %107 = vector.shape_cast %106 : vector<1x1x1x64x64xbf16> to vector<64x64xbf16>
    %108 = arith.truncf %105 : vector<64x128xf32> to vector<64x128xbf16>
    %cst_95 = arith.constant dense<0.000000e+00> : vector<64x128xf32>
    %109 = tpu.matmul %107, %108, %cst_95 {dimension_numbers = #tpu.dot_dimension_numbers<[1], [0], [0], [1], [0, 0, 1, 1], [], []>} : vector<64x64xbf16>, vector<64x128xbf16>, vector<64x128xf32> -> vector<64x128xf32>
    %c0_96 = arith.constant 0 : index
    %c1_97 = arith.constant 1 : index
    %c1_98 = arith.constant 1 : index
    %c0_99 = arith.constant 0 : index
    %c0_100 = arith.constant 0 : index
    %110 = vector.load %arg10[%c0_96, %c1_97, %c1_98, %c0_99, %c0_100] : memref<3x2x2x64x1xf32, #tpu.memory_space<vmem>>, vector<1x1x1x64x1xf32>
    %111 = vector.shape_cast %110 : vector<1x1x1x64x1xf32> to vector<64x1xf32>
    %112 = vector.broadcast %111 : vector<64x1xf32> to vector<64x128xf32>
    %113 = arith.addf %109, %112 : vector<64x128xf32>
    %cst_101 = arith.constant 0.000000e+00 : f32
    %114 = vector.broadcast %cst_101 : f32 to vector<64x128xf32>
    %115 = arith.cmpf oge, %113, %114 : vector<64x128xf32>
    %cst_102 = arith.constant 0.00999999977 : f32
    %116 = vector.broadcast %cst_102 : f32 to vector<64x128xf32>
    %117 = arith.mulf %116, %113 : vector<64x128xf32>
    %118 = arith.select %115, %113, %117 : vector<64x128xi1>, vector<64x128xf32>
    %c0_103 = arith.constant 0 : index
    %c1_104 = arith.constant 1 : index
    %c0_105 = arith.constant 0 : index
    %c0_106 = arith.constant 0 : index
    %119 = vector.load %arg11[%c0_103, %c1_104, %c0_105, %c0_106] : memref<3x2x16x64xbf16, #tpu.memory_space<vmem>>, vector<1x1x16x64xbf16>
    %120 = vector.shape_cast %119 : vector<1x1x16x64xbf16> to vector<16x64xbf16>
    %121 = arith.truncf %118 : vector<64x128xf32> to vector<64x128xbf16>
    %cst_107 = arith.constant dense<0.000000e+00> : vector<16x128xf32>
    %122 = tpu.matmul %120, %121, %cst_107 {dimension_numbers = #tpu.dot_dimension_numbers<[1], [0], [0], [1], [0, 0, 1, 1], [], []>} : vector<16x64xbf16>, vector<64x128xbf16>, vector<16x128xf32> -> vector<16x128xf32>
    %c0_108 = arith.constant 0 : index
    %c1_109 = arith.constant 1 : index
    %c0_110 = arith.constant 0 : index
    %c0_111 = arith.constant 0 : index
    %123 = vector.load %arg12[%c0_108, %c1_109, %c0_110, %c0_111] : memref<3x2x16x1xf32, #tpu.memory_space<vmem>>, vector<1x1x16x1xf32>
    %124 = vector.shape_cast %123 : vector<1x1x16x1xf32> to vector<16x1xf32>
    %125 = vector.broadcast %124 : vector<16x1xf32> to vector<16x128xf32>
    %126 = arith.addf %122, %125 : vector<16x128xf32>
    %127 = vector.extract_strided_slice %126 {offsets = [0, 0], sizes = [8, 128], strides = [1, 1]} : vector<16x128xf32> to vector<8x128xf32>
    %128 = math.tanh %127 : vector<8x128xf32>
    %129 = vector.extract_strided_slice %126 {offsets = [8, 0], sizes = [8, 128], strides = [1, 1]} : vector<16x128xf32> to vector<8x128xf32>
    %130 = math.exp %128 : vector<8x128xf32>
    %131 = arith.mulf %17, %130 : vector<8x128xf32>
    %132 = arith.addf %131, %129 : vector<8x128xf32>
    %cst_112 = arith.constant dense<0.000000e+00> : vector<128xf32>
    %133 = vector.multi_reduction <add>, %71, %cst_112 [0] : vector<8x128xf32> to vector<128xf32>
    %134 = vector.shape_cast %133 : vector<128xf32> to vector<1x128xf32>
    %135 = arith.addf %3, %134 : vector<1x128xf32>
    %cst_113 = arith.constant dense<0.000000e+00> : vector<128xf32>
    %136 = vector.multi_reduction <add>, %128, %cst_113 [0] : vector<8x128xf32> to vector<128xf32>
    %137 = vector.shape_cast %136 : vector<128xf32> to vector<1x128xf32>
    %138 = arith.addf %135, %137 : vector<1x128xf32>
    %139 = tpu.concatenate %75, %132 in 0 : vector<8x128xf32>, vector<8x128xf32> -> vector<16x128xf32>
    %140 = arith.truncf %139 : vector<16x128xf32> to vector<16x128xbf16>
    %c0_114 = arith.constant 0 : index
    %c0_115 = arith.constant 0 : index
    %c0_116 = arith.constant 0 : index
    %141 = vector.load %arg5[%c0_114, %c0_115, %c0_116] : memref<3x16x16xbf16, #tpu.memory_space<vmem>>, vector<1x16x16xbf16>
    %142 = vector.shape_cast %141 : vector<1x16x16xbf16> to vector<16x16xbf16>
    %cst_117 = arith.constant dense<0.000000e+00> : vector<16x128xf32>
    %143 = tpu.matmul %142, %140, %cst_117 {dimension_numbers = #tpu.dot_dimension_numbers<[1], [0], [0], [1], [0, 0, 1, 1], [], []>} : vector<16x16xbf16>, vector<16x128xbf16>, vector<16x128xf32> -> vector<16x128xf32>
    %c1_118 = arith.constant 1 : index
    %c0_119 = arith.constant 0 : index
    %c0_120 = arith.constant 0 : index
    %144 = vector.load %arg4[%c1_118, %c0_119, %c0_120] : memref<3x16x1xf32, #tpu.memory_space<vmem>>, vector<1x16x1xf32>
    %145 = vector.shape_cast %144 : vector<1x16x1xf32> to vector<16x1xf32>
    %c1_121 = arith.constant 1 : index
    %c0_122 = arith.constant 0 : index
    %c0_123 = arith.constant 0 : index
    %146 = vector.load %arg3[%c1_121, %c0_122, %c0_123] : memref<3x16x1xf32, #tpu.memory_space<vmem>>, vector<1x16x1xf32>
    %147 = vector.shape_cast %146 : vector<1x16x1xf32> to vector<16x1xf32>
    %148 = vector.broadcast %147 : vector<16x1xf32> to vector<16x128xf32>
    %149 = arith.addf %143, %148 : vector<16x128xf32>
    %150 = vector.broadcast %145 : vector<16x1xf32> to vector<16x128xf32>
    %151 = arith.mulf %150, %149 : vector<16x128xf32>
    %cst_124 = arith.constant 0.000000e+00 : f32
    %152 = vector.broadcast %cst_124 : f32 to vector<16x128xf32>
    %153 = arith.cmpf oge, %151, %152 : vector<16x128xf32>
    %cst_125 = arith.constant 0.899999976 : f32
    %154 = vector.broadcast %cst_125 : f32 to vector<16x128xf32>
    %155 = arith.mulf %154, %151 : vector<16x128xf32>
    %156 = arith.select %153, %151, %155 : vector<16x128xi1>, vector<16x128xf32>
    %157 = vector.extract_strided_slice %156 {offsets = [0, 0], sizes = [8, 128], strides = [1, 1]} : vector<16x128xf32> to vector<8x128xf32>
    %158 = vector.extract_strided_slice %156 {offsets = [8, 0], sizes = [8, 128], strides = [1, 1]} : vector<16x128xf32> to vector<8x128xf32>
    %c1_126 = arith.constant 1 : index
    %c0_127 = arith.constant 0 : index
    %c0_128 = arith.constant 0 : index
    %c0_129 = arith.constant 0 : index
    %159 = vector.load %arg6[%c1_126, %c0_127, %c0_128, %c0_129] : memref<3x2x64x8xbf16, #tpu.memory_space<vmem>>, vector<1x1x64x8xbf16>
    %160 = vector.shape_cast %159 : vector<1x1x64x8xbf16> to vector<64x8xbf16>
    %161 = arith.truncf %157 : vector<8x128xf32> to vector<8x128xbf16>
    %cst_130 = arith.constant dense<0.000000e+00> : vector<64x128xf32>
    %162 = tpu.matmul %160, %161, %cst_130 {dimension_numbers = #tpu.dot_dimension_numbers<[1], [0], [0], [1], [0, 0, 1, 1], [], []>} : vector<64x8xbf16>, vector<8x128xbf16>, vector<64x128xf32> -> vector<64x128xf32>
    %c1_131 = arith.constant 1 : index
    %c0_132 = arith.constant 0 : index
    %c0_133 = arith.constant 0 : index
    %c0_134 = arith.constant 0 : index
    %163 = vector.load %arg7[%c1_131, %c0_132, %c0_133, %c0_134] : memref<3x2x64x16xbf16, #tpu.memory_space<vmem>>, vector<1x1x64x16xbf16>
    %164 = vector.shape_cast %163 : vector<1x1x64x16xbf16> to vector<64x16xbf16>
    %cst_135 = arith.constant dense<0.000000e+00> : vector<64x128xf32>
    %165 = tpu.matmul %164, %2, %cst_135 {dimension_numbers = #tpu.dot_dimension_numbers<[1], [0], [0], [1], [0, 0, 1, 1], [], []>} : vector<64x16xbf16>, vector<16x128xbf16>, vector<64x128xf32> -> vector<64x128xf32>
    %166 = arith.addf %162, %165 : vector<64x128xf32>
    %c1_136 = arith.constant 1 : index
    %c0_137 = arith.constant 0 : index
    %c0_138 = arith.constant 0 : index
    %c0_139 = arith.constant 0 : index
    %167 = vector.load %arg8[%c1_136, %c0_137, %c0_138, %c0_139] : memref<3x2x64x1xf32, #tpu.memory_space<vmem>>, vector<1x1x64x1xf32>
    %168 = vector.shape_cast %167 : vector<1x1x64x1xf32> to vector<64x1xf32>
    %169 = vector.broadcast %168 : vector<64x1xf32> to vector<64x128xf32>
    %170 = arith.addf %166, %169 : vector<64x128xf32>
    %cst_140 = arith.constant 0.000000e+00 : f32
    %171 = vector.broadcast %cst_140 : f32 to vector<64x128xf32>
    %172 = arith.cmpf oge, %170, %171 : vector<64x128xf32>
    %cst_141 = arith.constant 0.00999999977 : f32
    %173 = vector.broadcast %cst_141 : f32 to vector<64x128xf32>
    %174 = arith.mulf %173, %170 : vector<64x128xf32>
    %175 = arith.select %172, %170, %174 : vector<64x128xi1>, vector<64x128xf32>
    %c1_142 = arith.constant 1 : index
    %c0_143 = arith.constant 0 : index
    %c0_144 = arith.constant 0 : index
    %c0_145 = arith.constant 0 : index
    %c0_146 = arith.constant 0 : index
    %176 = vector.load %arg9[%c1_142, %c0_143, %c0_144, %c0_145, %c0_146] : memref<3x2x2x64x64xbf16, #tpu.memory_space<vmem>>, vector<1x1x1x64x64xbf16>
    %177 = vector.shape_cast %176 : vector<1x1x1x64x64xbf16> to vector<64x64xbf16>
    %178 = arith.truncf %175 : vector<64x128xf32> to vector<64x128xbf16>
    %cst_147 = arith.constant dense<0.000000e+00> : vector<64x128xf32>
    %179 = tpu.matmul %177, %178, %cst_147 {dimension_numbers = #tpu.dot_dimension_numbers<[1], [0], [0], [1], [0, 0, 1, 1], [], []>} : vector<64x64xbf16>, vector<64x128xbf16>, vector<64x128xf32> -> vector<64x128xf32>
    %c1_148 = arith.constant 1 : index
    %c0_149 = arith.constant 0 : index
    %c0_150 = arith.constant 0 : index
    %c0_151 = arith.constant 0 : index
    %c0_152 = arith.constant 0 : index
    %180 = vector.load %arg10[%c1_148, %c0_149, %c0_150, %c0_151, %c0_152] : memref<3x2x2x64x1xf32, #tpu.memory_space<vmem>>, vector<1x1x1x64x1xf32>
    %181 = vector.shape_cast %180 : vector<1x1x1x64x1xf32> to vector<64x1xf32>
    %182 = vector.broadcast %181 : vector<64x1xf32> to vector<64x128xf32>
    %183 = arith.addf %179, %182 : vector<64x128xf32>
    %cst_153 = arith.constant 0.000000e+00 : f32
    %184 = vector.broadcast %cst_153 : f32 to vector<64x128xf32>
    %185 = arith.cmpf oge, %183, %184 : vector<64x128xf32>
    %cst_154 = arith.constant 0.00999999977 : f32
    %186 = vector.broadcast %cst_154 : f32 to vector<64x128xf32>
    %187 = arith.mulf %186, %183 : vector<64x128xf32>
    %188 = arith.select %185, %183, %187 : vector<64x128xi1>, vector<64x128xf32>
    %c1_155 = arith.constant 1 : index
    %c0_156 = arith.constant 0 : index
    %c1_157 = arith.constant 1 : index
    %c0_158 = arith.constant 0 : index
    %c0_159 = arith.constant 0 : index
    %189 = vector.load %arg9[%c1_155, %c0_156, %c1_157, %c0_158, %c0_159] : memref<3x2x2x64x64xbf16, #tpu.memory_space<vmem>>, vector<1x1x1x64x64xbf16>
    %190 = vector.shape_cast %189 : vector<1x1x1x64x64xbf16> to vector<64x64xbf16>
    %191 = arith.truncf %188 : vector<64x128xf32> to vector<64x128xbf16>
    %cst_160 = arith.constant dense<0.000000e+00> : vector<64x128xf32>
    %192 = tpu.matmul %190, %191, %cst_160 {dimension_numbers = #tpu.dot_dimension_numbers<[1], [0], [0], [1], [0, 0, 1, 1], [], []>} : vector<64x64xbf16>, vector<64x128xbf16>, vector<64x128xf32> -> vector<64x128xf32>
    %c1_161 = arith.constant 1 : index
    %c0_162 = arith.constant 0 : index
    %c1_163 = arith.constant 1 : index
    %c0_164 = arith.constant 0 : index
    %c0_165 = arith.constant 0 : index
    %193 = vector.load %arg10[%c1_161, %c0_162, %c1_163, %c0_164, %c0_165] : memref<3x2x2x64x1xf32, #tpu.memory_space<vmem>>, vector<1x1x1x64x1xf32>
    %194 = vector.shape_cast %193 : vector<1x1x1x64x1xf32> to vector<64x1xf32>
    %195 = vector.broadcast %194 : vector<64x1xf32> to vector<64x128xf32>
    %196 = arith.addf %192, %195 : vector<64x128xf32>
    %cst_166 = arith.constant 0.000000e+00 : f32
    %197 = vector.broadcast %cst_166 : f32 to vector<64x128xf32>
    %198 = arith.cmpf oge, %196, %197 : vector<64x128xf32>
    %cst_167 = arith.constant 0.00999999977 : f32
    %199 = vector.broadcast %cst_167 : f32 to vector<64x128xf32>
    %200 = arith.mulf %199, %196 : vector<64x128xf32>
    %201 = arith.select %198, %196, %200 : vector<64x128xi1>, vector<64x128xf32>
    %c1_168 = arith.constant 1 : index
    %c0_169 = arith.constant 0 : index
    %c0_170 = arith.constant 0 : index
    %c0_171 = arith.constant 0 : index
    %202 = vector.load %arg11[%c1_168, %c0_169, %c0_170, %c0_171] : memref<3x2x16x64xbf16, #tpu.memory_space<vmem>>, vector<1x1x16x64xbf16>
    %203 = vector.shape_cast %202 : vector<1x1x16x64xbf16> to vector<16x64xbf16>
    %204 = arith.truncf %201 : vector<64x128xf32> to vector<64x128xbf16>
    %cst_172 = arith.constant dense<0.000000e+00> : vector<16x128xf32>
    %205 = tpu.matmul %203, %204, %cst_172 {dimension_numbers = #tpu.dot_dimension_numbers<[1], [0], [0], [1], [0, 0, 1, 1], [], []>} : vector<16x64xbf16>, vector<64x128xbf16>, vector<16x128xf32> -> vector<16x128xf32>
    %c1_173 = arith.constant 1 : index
    %c0_174 = arith.constant 0 : index
    %c0_175 = arith.constant 0 : index
    %c0_176 = arith.constant 0 : index
    %206 = vector.load %arg12[%c1_173, %c0_174, %c0_175, %c0_176] : memref<3x2x16x1xf32, #tpu.memory_space<vmem>>, vector<1x1x16x1xf32>
    %207 = vector.shape_cast %206 : vector<1x1x16x1xf32> to vector<16x1xf32>
    %208 = vector.broadcast %207 : vector<16x1xf32> to vector<16x128xf32>
    %209 = arith.addf %205, %208 : vector<16x128xf32>
    %210 = vector.extract_strided_slice %209 {offsets = [0, 0], sizes = [8, 128], strides = [1, 1]} : vector<16x128xf32> to vector<8x128xf32>
    %211 = math.tanh %210 : vector<8x128xf32>
    %212 = vector.extract_strided_slice %209 {offsets = [8, 0], sizes = [8, 128], strides = [1, 1]} : vector<16x128xf32> to vector<8x128xf32>
    %213 = math.exp %211 : vector<8x128xf32>
    %214 = arith.mulf %158, %213 : vector<8x128xf32>
    %215 = arith.addf %214, %212 : vector<8x128xf32>
    %c1_177 = arith.constant 1 : index
    %c1_178 = arith.constant 1 : index
    %c0_179 = arith.constant 0 : index
    %c0_180 = arith.constant 0 : index
    %216 = vector.load %arg6[%c1_177, %c1_178, %c0_179, %c0_180] : memref<3x2x64x8xbf16, #tpu.memory_space<vmem>>, vector<1x1x64x8xbf16>
    %217 = vector.shape_cast %216 : vector<1x1x64x8xbf16> to vector<64x8xbf16>
    %218 = arith.truncf %215 : vector<8x128xf32> to vector<8x128xbf16>
    %cst_181 = arith.constant dense<0.000000e+00> : vector<64x128xf32>
    %219 = tpu.matmul %217, %218, %cst_181 {dimension_numbers = #tpu.dot_dimension_numbers<[1], [0], [0], [1], [0, 0, 1, 1], [], []>} : vector<64x8xbf16>, vector<8x128xbf16>, vector<64x128xf32> -> vector<64x128xf32>
    %c1_182 = arith.constant 1 : index
    %c1_183 = arith.constant 1 : index
    %c0_184 = arith.constant 0 : index
    %c0_185 = arith.constant 0 : index
    %220 = vector.load %arg7[%c1_182, %c1_183, %c0_184, %c0_185] : memref<3x2x64x16xbf16, #tpu.memory_space<vmem>>, vector<1x1x64x16xbf16>
    %221 = vector.shape_cast %220 : vector<1x1x64x16xbf16> to vector<64x16xbf16>
    %cst_186 = arith.constant dense<0.000000e+00> : vector<64x128xf32>
    %222 = tpu.matmul %221, %2, %cst_186 {dimension_numbers = #tpu.dot_dimension_numbers<[1], [0], [0], [1], [0, 0, 1, 1], [], []>} : vector<64x16xbf16>, vector<16x128xbf16>, vector<64x128xf32> -> vector<64x128xf32>
    %223 = arith.addf %219, %222 : vector<64x128xf32>
    %c1_187 = arith.constant 1 : index
    %c1_188 = arith.constant 1 : index
    %c0_189 = arith.constant 0 : index
    %c0_190 = arith.constant 0 : index
    %224 = vector.load %arg8[%c1_187, %c1_188, %c0_189, %c0_190] : memref<3x2x64x1xf32, #tpu.memory_space<vmem>>, vector<1x1x64x1xf32>
    %225 = vector.shape_cast %224 : vector<1x1x64x1xf32> to vector<64x1xf32>
    %226 = vector.broadcast %225 : vector<64x1xf32> to vector<64x128xf32>
    %227 = arith.addf %223, %226 : vector<64x128xf32>
    %cst_191 = arith.constant 0.000000e+00 : f32
    %228 = vector.broadcast %cst_191 : f32 to vector<64x128xf32>
    %229 = arith.cmpf oge, %227, %228 : vector<64x128xf32>
    %cst_192 = arith.constant 0.00999999977 : f32
    %230 = vector.broadcast %cst_192 : f32 to vector<64x128xf32>
    %231 = arith.mulf %230, %227 : vector<64x128xf32>
    %232 = arith.select %229, %227, %231 : vector<64x128xi1>, vector<64x128xf32>
    %c1_193 = arith.constant 1 : index
    %c1_194 = arith.constant 1 : index
    %c0_195 = arith.constant 0 : index
    %c0_196 = arith.constant 0 : index
    %c0_197 = arith.constant 0 : index
    %233 = vector.load %arg9[%c1_193, %c1_194, %c0_195, %c0_196, %c0_197] : memref<3x2x2x64x64xbf16, #tpu.memory_space<vmem>>, vector<1x1x1x64x64xbf16>
    %234 = vector.shape_cast %233 : vector<1x1x1x64x64xbf16> to vector<64x64xbf16>
    %235 = arith.truncf %232 : vector<64x128xf32> to vector<64x128xbf16>
    %cst_198 = arith.constant dense<0.000000e+00> : vector<64x128xf32>
    %236 = tpu.matmul %234, %235, %cst_198 {dimension_numbers = #tpu.dot_dimension_numbers<[1], [0], [0], [1], [0, 0, 1, 1], [], []>} : vector<64x64xbf16>, vector<64x128xbf16>, vector<64x128xf32> -> vector<64x128xf32>
    %c1_199 = arith.constant 1 : index
    %c1_200 = arith.constant 1 : index
    %c0_201 = arith.constant 0 : index
    %c0_202 = arith.constant 0 : index
    %c0_203 = arith.constant 0 : index
    %237 = vector.load %arg10[%c1_199, %c1_200, %c0_201, %c0_202, %c0_203] : memref<3x2x2x64x1xf32, #tpu.memory_space<vmem>>, vector<1x1x1x64x1xf32>
    %238 = vector.shape_cast %237 : vector<1x1x1x64x1xf32> to vector<64x1xf32>
    %239 = vector.broadcast %238 : vector<64x1xf32> to vector<64x128xf32>
    %240 = arith.addf %236, %239 : vector<64x128xf32>
    %cst_204 = arith.constant 0.000000e+00 : f32
    %241 = vector.broadcast %cst_204 : f32 to vector<64x128xf32>
    %242 = arith.cmpf oge, %240, %241 : vector<64x128xf32>
    %cst_205 = arith.constant 0.00999999977 : f32
    %243 = vector.broadcast %cst_205 : f32 to vector<64x128xf32>
    %244 = arith.mulf %243, %240 : vector<64x128xf32>
    %245 = arith.select %242, %240, %244 : vector<64x128xi1>, vector<64x128xf32>
    %c1_206 = arith.constant 1 : index
    %c1_207 = arith.constant 1 : index
    %c1_208 = arith.constant 1 : index
    %c0_209 = arith.constant 0 : index
    %c0_210 = arith.constant 0 : index
    %246 = vector.load %arg9[%c1_206, %c1_207, %c1_208, %c0_209, %c0_210] : memref<3x2x2x64x64xbf16, #tpu.memory_space<vmem>>, vector<1x1x1x64x64xbf16>
    %247 = vector.shape_cast %246 : vector<1x1x1x64x64xbf16> to vector<64x64xbf16>
    %248 = arith.truncf %245 : vector<64x128xf32> to vector<64x128xbf16>
    %cst_211 = arith.constant dense<0.000000e+00> : vector<64x128xf32>
    %249 = tpu.matmul %247, %248, %cst_211 {dimension_numbers = #tpu.dot_dimension_numbers<[1], [0], [0], [1], [0, 0, 1, 1], [], []>} : vector<64x64xbf16>, vector<64x128xbf16>, vector<64x128xf32> -> vector<64x128xf32>
    %c1_212 = arith.constant 1 : index
    %c1_213 = arith.constant 1 : index
    %c1_214 = arith.constant 1 : index
    %c0_215 = arith.constant 0 : index
    %c0_216 = arith.constant 0 : index
    %250 = vector.load %arg10[%c1_212, %c1_213, %c1_214, %c0_215, %c0_216] : memref<3x2x2x64x1xf32, #tpu.memory_space<vmem>>, vector<1x1x1x64x1xf32>
    %251 = vector.shape_cast %250 : vector<1x1x1x64x1xf32> to vector<64x1xf32>
    %252 = vector.broadcast %251 : vector<64x1xf32> to vector<64x128xf32>
    %253 = arith.addf %249, %252 : vector<64x128xf32>
    %cst_217 = arith.constant 0.000000e+00 : f32
    %254 = vector.broadcast %cst_217 : f32 to vector<64x128xf32>
    %255 = arith.cmpf oge, %253, %254 : vector<64x128xf32>
    %cst_218 = arith.constant 0.00999999977 : f32
    %256 = vector.broadcast %cst_218 : f32 to vector<64x128xf32>
    %257 = arith.mulf %256, %253 : vector<64x128xf32>
    %258 = arith.select %255, %253, %257 : vector<64x128xi1>, vector<64x128xf32>
    %c1_219 = arith.constant 1 : index
    %c1_220 = arith.constant 1 : index
    %c0_221 = arith.constant 0 : index
    %c0_222 = arith.constant 0 : index
    %259 = vector.load %arg11[%c1_219, %c1_220, %c0_221, %c0_222] : memref<3x2x16x64xbf16, #tpu.memory_space<vmem>>, vector<1x1x16x64xbf16>
    %260 = vector.shape_cast %259 : vector<1x1x16x64xbf16> to vector<16x64xbf16>
    %261 = arith.truncf %258 : vector<64x128xf32> to vector<64x128xbf16>
    %cst_223 = arith.constant dense<0.000000e+00> : vector<16x128xf32>
    %262 = tpu.matmul %260, %261, %cst_223 {dimension_numbers = #tpu.dot_dimension_numbers<[1], [0], [0], [1], [0, 0, 1, 1], [], []>} : vector<16x64xbf16>, vector<64x128xbf16>, vector<16x128xf32> -> vector<16x128xf32>
    %c1_224 = arith.constant 1 : index
    %c1_225 = arith.constant 1 : index
    %c0_226 = arith.constant 0 : index
    %c0_227 = arith.constant 0 : index
    %263 = vector.load %arg12[%c1_224, %c1_225, %c0_226, %c0_227] : memref<3x2x16x1xf32, #tpu.memory_space<vmem>>, vector<1x1x16x1xf32>
    %264 = vector.shape_cast %263 : vector<1x1x16x1xf32> to vector<16x1xf32>
    %265 = vector.broadcast %264 : vector<16x1xf32> to vector<16x128xf32>
    %266 = arith.addf %262, %265 : vector<16x128xf32>
    %267 = vector.extract_strided_slice %266 {offsets = [0, 0], sizes = [8, 128], strides = [1, 1]} : vector<16x128xf32> to vector<8x128xf32>
    %268 = math.tanh %267 : vector<8x128xf32>
    %269 = vector.extract_strided_slice %266 {offsets = [8, 0], sizes = [8, 128], strides = [1, 1]} : vector<16x128xf32> to vector<8x128xf32>
    %270 = math.exp %268 : vector<8x128xf32>
    %271 = arith.mulf %157, %270 : vector<8x128xf32>
    %272 = arith.addf %271, %269 : vector<8x128xf32>
    %cst_228 = arith.constant dense<0.000000e+00> : vector<128xf32>
    %273 = vector.multi_reduction <add>, %211, %cst_228 [0] : vector<8x128xf32> to vector<128xf32>
    %274 = vector.shape_cast %273 : vector<128xf32> to vector<1x128xf32>
    %275 = arith.addf %138, %274 : vector<1x128xf32>
    %cst_229 = arith.constant dense<0.000000e+00> : vector<128xf32>
    %276 = vector.multi_reduction <add>, %268, %cst_229 [0] : vector<8x128xf32> to vector<128xf32>
    %277 = vector.shape_cast %276 : vector<128xf32> to vector<1x128xf32>
    %278 = arith.addf %275, %277 : vector<1x128xf32>
    %279 = tpu.concatenate %215, %272 in 0 : vector<8x128xf32>, vector<8x128xf32> -> vector<16x128xf32>
    %280 = arith.truncf %279 : vector<16x128xf32> to vector<16x128xbf16>
    %c1_230 = arith.constant 1 : index
    %c0_231 = arith.constant 0 : index
    %c0_232 = arith.constant 0 : index
    %281 = vector.load %arg5[%c1_230, %c0_231, %c0_232] : memref<3x16x16xbf16, #tpu.memory_space<vmem>>, vector<1x16x16xbf16>
    %282 = vector.shape_cast %281 : vector<1x16x16xbf16> to vector<16x16xbf16>
    %cst_233 = arith.constant dense<0.000000e+00> : vector<16x128xf32>
    %283 = tpu.matmul %282, %280, %cst_233 {dimension_numbers = #tpu.dot_dimension_numbers<[1], [0], [0], [1], [0, 0, 1, 1], [], []>} : vector<16x16xbf16>, vector<16x128xbf16>, vector<16x128xf32> -> vector<16x128xf32>
    %c2 = arith.constant 2 : index
    %c0_234 = arith.constant 0 : index
    %c0_235 = arith.constant 0 : index
    %284 = vector.load %arg4[%c2, %c0_234, %c0_235] : memref<3x16x1xf32, #tpu.memory_space<vmem>>, vector<1x16x1xf32>
    %285 = vector.shape_cast %284 : vector<1x16x1xf32> to vector<16x1xf32>
    %c2_236 = arith.constant 2 : index
    %c0_237 = arith.constant 0 : index
    %c0_238 = arith.constant 0 : index
    %286 = vector.load %arg3[%c2_236, %c0_237, %c0_238] : memref<3x16x1xf32, #tpu.memory_space<vmem>>, vector<1x16x1xf32>
    %287 = vector.shape_cast %286 : vector<1x16x1xf32> to vector<16x1xf32>
    %288 = vector.broadcast %287 : vector<16x1xf32> to vector<16x128xf32>
    %289 = arith.addf %283, %288 : vector<16x128xf32>
    %290 = vector.broadcast %285 : vector<16x1xf32> to vector<16x128xf32>
    %291 = arith.mulf %290, %289 : vector<16x128xf32>
    %cst_239 = arith.constant 0.000000e+00 : f32
    %292 = vector.broadcast %cst_239 : f32 to vector<16x128xf32>
    %293 = arith.cmpf oge, %291, %292 : vector<16x128xf32>
    %cst_240 = arith.constant 0.899999976 : f32
    %294 = vector.broadcast %cst_240 : f32 to vector<16x128xf32>
    %295 = arith.mulf %294, %291 : vector<16x128xf32>
    %296 = arith.select %293, %291, %295 : vector<16x128xi1>, vector<16x128xf32>
    %297 = vector.extract_strided_slice %296 {offsets = [0, 0], sizes = [8, 128], strides = [1, 1]} : vector<16x128xf32> to vector<8x128xf32>
    %298 = vector.extract_strided_slice %296 {offsets = [8, 0], sizes = [8, 128], strides = [1, 1]} : vector<16x128xf32> to vector<8x128xf32>
    %c2_241 = arith.constant 2 : index
    %c0_242 = arith.constant 0 : index
    %c0_243 = arith.constant 0 : index
    %c0_244 = arith.constant 0 : index
    %299 = vector.load %arg6[%c2_241, %c0_242, %c0_243, %c0_244] : memref<3x2x64x8xbf16, #tpu.memory_space<vmem>>, vector<1x1x64x8xbf16>
    %300 = vector.shape_cast %299 : vector<1x1x64x8xbf16> to vector<64x8xbf16>
    %301 = arith.truncf %297 : vector<8x128xf32> to vector<8x128xbf16>
    %cst_245 = arith.constant dense<0.000000e+00> : vector<64x128xf32>
    %302 = tpu.matmul %300, %301, %cst_245 {dimension_numbers = #tpu.dot_dimension_numbers<[1], [0], [0], [1], [0, 0, 1, 1], [], []>} : vector<64x8xbf16>, vector<8x128xbf16>, vector<64x128xf32> -> vector<64x128xf32>
    %c2_246 = arith.constant 2 : index
    %c0_247 = arith.constant 0 : index
    %c0_248 = arith.constant 0 : index
    %c0_249 = arith.constant 0 : index
    %303 = vector.load %arg7[%c2_246, %c0_247, %c0_248, %c0_249] : memref<3x2x64x16xbf16, #tpu.memory_space<vmem>>, vector<1x1x64x16xbf16>
    %304 = vector.shape_cast %303 : vector<1x1x64x16xbf16> to vector<64x16xbf16>
    %cst_250 = arith.constant dense<0.000000e+00> : vector<64x128xf32>
    %305 = tpu.matmul %304, %2, %cst_250 {dimension_numbers = #tpu.dot_dimension_numbers<[1], [0], [0], [1], [0, 0, 1, 1], [], []>} : vector<64x16xbf16>, vector<16x128xbf16>, vector<64x128xf32> -> vector<64x128xf32>
    %306 = arith.addf %302, %305 : vector<64x128xf32>
    %c2_251 = arith.constant 2 : index
    %c0_252 = arith.constant 0 : index
    %c0_253 = arith.constant 0 : index
    %c0_254 = arith.constant 0 : index
    %307 = vector.load %arg8[%c2_251, %c0_252, %c0_253, %c0_254] : memref<3x2x64x1xf32, #tpu.memory_space<vmem>>, vector<1x1x64x1xf32>
    %308 = vector.shape_cast %307 : vector<1x1x64x1xf32> to vector<64x1xf32>
    %309 = vector.broadcast %308 : vector<64x1xf32> to vector<64x128xf32>
    %310 = arith.addf %306, %309 : vector<64x128xf32>
    %cst_255 = arith.constant 0.000000e+00 : f32
    %311 = vector.broadcast %cst_255 : f32 to vector<64x128xf32>
    %312 = arith.cmpf oge, %310, %311 : vector<64x128xf32>
    %cst_256 = arith.constant 0.00999999977 : f32
    %313 = vector.broadcast %cst_256 : f32 to vector<64x128xf32>
    %314 = arith.mulf %313, %310 : vector<64x128xf32>
    %315 = arith.select %312, %310, %314 : vector<64x128xi1>, vector<64x128xf32>
    %c2_257 = arith.constant 2 : index
    %c0_258 = arith.constant 0 : index
    %c0_259 = arith.constant 0 : index
    %c0_260 = arith.constant 0 : index
    %c0_261 = arith.constant 0 : index
    %316 = vector.load %arg9[%c2_257, %c0_258, %c0_259, %c0_260, %c0_261] : memref<3x2x2x64x64xbf16, #tpu.memory_space<vmem>>, vector<1x1x1x64x64xbf16>
    %317 = vector.shape_cast %316 : vector<1x1x1x64x64xbf16> to vector<64x64xbf16>
    %318 = arith.truncf %315 : vector<64x128xf32> to vector<64x128xbf16>
    %cst_262 = arith.constant dense<0.000000e+00> : vector<64x128xf32>
    %319 = tpu.matmul %317, %318, %cst_262 {dimension_numbers = #tpu.dot_dimension_numbers<[1], [0], [0], [1], [0, 0, 1, 1], [], []>} : vector<64x64xbf16>, vector<64x128xbf16>, vector<64x128xf32> -> vector<64x128xf32>
    %c2_263 = arith.constant 2 : index
    %c0_264 = arith.constant 0 : index
    %c0_265 = arith.constant 0 : index
    %c0_266 = arith.constant 0 : index
    %c0_267 = arith.constant 0 : index
    %320 = vector.load %arg10[%c2_263, %c0_264, %c0_265, %c0_266, %c0_267] : memref<3x2x2x64x1xf32, #tpu.memory_space<vmem>>, vector<1x1x1x64x1xf32>
    %321 = vector.shape_cast %320 : vector<1x1x1x64x1xf32> to vector<64x1xf32>
    %322 = vector.broadcast %321 : vector<64x1xf32> to vector<64x128xf32>
    %323 = arith.addf %319, %322 : vector<64x128xf32>
    %cst_268 = arith.constant 0.000000e+00 : f32
    %324 = vector.broadcast %cst_268 : f32 to vector<64x128xf32>
    %325 = arith.cmpf oge, %323, %324 : vector<64x128xf32>
    %cst_269 = arith.constant 0.00999999977 : f32
    %326 = vector.broadcast %cst_269 : f32 to vector<64x128xf32>
    %327 = arith.mulf %326, %323 : vector<64x128xf32>
    %328 = arith.select %325, %323, %327 : vector<64x128xi1>, vector<64x128xf32>
    %c2_270 = arith.constant 2 : index
    %c0_271 = arith.constant 0 : index
    %c1_272 = arith.constant 1 : index
    %c0_273 = arith.constant 0 : index
    %c0_274 = arith.constant 0 : index
    %329 = vector.load %arg9[%c2_270, %c0_271, %c1_272, %c0_273, %c0_274] : memref<3x2x2x64x64xbf16, #tpu.memory_space<vmem>>, vector<1x1x1x64x64xbf16>
    %330 = vector.shape_cast %329 : vector<1x1x1x64x64xbf16> to vector<64x64xbf16>
    %331 = arith.truncf %328 : vector<64x128xf32> to vector<64x128xbf16>
    %cst_275 = arith.constant dense<0.000000e+00> : vector<64x128xf32>
    %332 = tpu.matmul %330, %331, %cst_275 {dimension_numbers = #tpu.dot_dimension_numbers<[1], [0], [0], [1], [0, 0, 1, 1], [], []>} : vector<64x64xbf16>, vector<64x128xbf16>, vector<64x128xf32> -> vector<64x128xf32>
    %c2_276 = arith.constant 2 : index
    %c0_277 = arith.constant 0 : index
    %c1_278 = arith.constant 1 : index
    %c0_279 = arith.constant 0 : index
    %c0_280 = arith.constant 0 : index
    %333 = vector.load %arg10[%c2_276, %c0_277, %c1_278, %c0_279, %c0_280] : memref<3x2x2x64x1xf32, #tpu.memory_space<vmem>>, vector<1x1x1x64x1xf32>
    %334 = vector.shape_cast %333 : vector<1x1x1x64x1xf32> to vector<64x1xf32>
    %335 = vector.broadcast %334 : vector<64x1xf32> to vector<64x128xf32>
    %336 = arith.addf %332, %335 : vector<64x128xf32>
    %cst_281 = arith.constant 0.000000e+00 : f32
    %337 = vector.broadcast %cst_281 : f32 to vector<64x128xf32>
    %338 = arith.cmpf oge, %336, %337 : vector<64x128xf32>
    %cst_282 = arith.constant 0.00999999977 : f32
    %339 = vector.broadcast %cst_282 : f32 to vector<64x128xf32>
    %340 = arith.mulf %339, %336 : vector<64x128xf32>
    %341 = arith.select %338, %336, %340 : vector<64x128xi1>, vector<64x128xf32>
    %c2_283 = arith.constant 2 : index
    %c0_284 = arith.constant 0 : index
    %c0_285 = arith.constant 0 : index
    %c0_286 = arith.constant 0 : index
    %342 = vector.load %arg11[%c2_283, %c0_284, %c0_285, %c0_286] : memref<3x2x16x64xbf16, #tpu.memory_space<vmem>>, vector<1x1x16x64xbf16>
    %343 = vector.shape_cast %342 : vector<1x1x16x64xbf16> to vector<16x64xbf16>
    %344 = arith.truncf %341 : vector<64x128xf32> to vector<64x128xbf16>
    %cst_287 = arith.constant dense<0.000000e+00> : vector<16x128xf32>
    %345 = tpu.matmul %343, %344, %cst_287 {dimension_numbers = #tpu.dot_dimension_numbers<[1], [0], [0], [1], [0, 0, 1, 1], [], []>} : vector<16x64xbf16>, vector<64x128xbf16>, vector<16x128xf32> -> vector<16x128xf32>
    %c2_288 = arith.constant 2 : index
    %c0_289 = arith.constant 0 : index
    %c0_290 = arith.constant 0 : index
    %c0_291 = arith.constant 0 : index
    %346 = vector.load %arg12[%c2_288, %c0_289, %c0_290, %c0_291] : memref<3x2x16x1xf32, #tpu.memory_space<vmem>>, vector<1x1x16x1xf32>
    %347 = vector.shape_cast %346 : vector<1x1x16x1xf32> to vector<16x1xf32>
    %348 = vector.broadcast %347 : vector<16x1xf32> to vector<16x128xf32>
    %349 = arith.addf %345, %348 : vector<16x128xf32>
    %350 = vector.extract_strided_slice %349 {offsets = [0, 0], sizes = [8, 128], strides = [1, 1]} : vector<16x128xf32> to vector<8x128xf32>
    %351 = math.tanh %350 : vector<8x128xf32>
    %352 = vector.extract_strided_slice %349 {offsets = [8, 0], sizes = [8, 128], strides = [1, 1]} : vector<16x128xf32> to vector<8x128xf32>
    %353 = math.exp %351 : vector<8x128xf32>
    %354 = arith.mulf %298, %353 : vector<8x128xf32>
    %355 = arith.addf %354, %352 : vector<8x128xf32>
    %c2_292 = arith.constant 2 : index
    %c1_293 = arith.constant 1 : index
    %c0_294 = arith.constant 0 : index
    %c0_295 = arith.constant 0 : index
    %356 = vector.load %arg6[%c2_292, %c1_293, %c0_294, %c0_295] : memref<3x2x64x8xbf16, #tpu.memory_space<vmem>>, vector<1x1x64x8xbf16>
    %357 = vector.shape_cast %356 : vector<1x1x64x8xbf16> to vector<64x8xbf16>
    %358 = arith.truncf %355 : vector<8x128xf32> to vector<8x128xbf16>
    %cst_296 = arith.constant dense<0.000000e+00> : vector<64x128xf32>
    %359 = tpu.matmul %357, %358, %cst_296 {dimension_numbers = #tpu.dot_dimension_numbers<[1], [0], [0], [1], [0, 0, 1, 1], [], []>} : vector<64x8xbf16>, vector<8x128xbf16>, vector<64x128xf32> -> vector<64x128xf32>
    %c2_297 = arith.constant 2 : index
    %c1_298 = arith.constant 1 : index
    %c0_299 = arith.constant 0 : index
    %c0_300 = arith.constant 0 : index
    %360 = vector.load %arg7[%c2_297, %c1_298, %c0_299, %c0_300] : memref<3x2x64x16xbf16, #tpu.memory_space<vmem>>, vector<1x1x64x16xbf16>
    %361 = vector.shape_cast %360 : vector<1x1x64x16xbf16> to vector<64x16xbf16>
    %cst_301 = arith.constant dense<0.000000e+00> : vector<64x128xf32>
    %362 = tpu.matmul %361, %2, %cst_301 {dimension_numbers = #tpu.dot_dimension_numbers<[1], [0], [0], [1], [0, 0, 1, 1], [], []>} : vector<64x16xbf16>, vector<16x128xbf16>, vector<64x128xf32> -> vector<64x128xf32>
    %363 = arith.addf %359, %362 : vector<64x128xf32>
    %c2_302 = arith.constant 2 : index
    %c1_303 = arith.constant 1 : index
    %c0_304 = arith.constant 0 : index
    %c0_305 = arith.constant 0 : index
    %364 = vector.load %arg8[%c2_302, %c1_303, %c0_304, %c0_305] : memref<3x2x64x1xf32, #tpu.memory_space<vmem>>, vector<1x1x64x1xf32>
    %365 = vector.shape_cast %364 : vector<1x1x64x1xf32> to vector<64x1xf32>
    %366 = vector.broadcast %365 : vector<64x1xf32> to vector<64x128xf32>
    %367 = arith.addf %363, %366 : vector<64x128xf32>
    %cst_306 = arith.constant 0.000000e+00 : f32
    %368 = vector.broadcast %cst_306 : f32 to vector<64x128xf32>
    %369 = arith.cmpf oge, %367, %368 : vector<64x128xf32>
    %cst_307 = arith.constant 0.00999999977 : f32
    %370 = vector.broadcast %cst_307 : f32 to vector<64x128xf32>
    %371 = arith.mulf %370, %367 : vector<64x128xf32>
    %372 = arith.select %369, %367, %371 : vector<64x128xi1>, vector<64x128xf32>
    %c2_308 = arith.constant 2 : index
    %c1_309 = arith.constant 1 : index
    %c0_310 = arith.constant 0 : index
    %c0_311 = arith.constant 0 : index
    %c0_312 = arith.constant 0 : index
    %373 = vector.load %arg9[%c2_308, %c1_309, %c0_310, %c0_311, %c0_312] : memref<3x2x2x64x64xbf16, #tpu.memory_space<vmem>>, vector<1x1x1x64x64xbf16>
    %374 = vector.shape_cast %373 : vector<1x1x1x64x64xbf16> to vector<64x64xbf16>
    %375 = arith.truncf %372 : vector<64x128xf32> to vector<64x128xbf16>
    %cst_313 = arith.constant dense<0.000000e+00> : vector<64x128xf32>
    %376 = tpu.matmul %374, %375, %cst_313 {dimension_numbers = #tpu.dot_dimension_numbers<[1], [0], [0], [1], [0, 0, 1, 1], [], []>} : vector<64x64xbf16>, vector<64x128xbf16>, vector<64x128xf32> -> vector<64x128xf32>
    %c2_314 = arith.constant 2 : index
    %c1_315 = arith.constant 1 : index
    %c0_316 = arith.constant 0 : index
    %c0_317 = arith.constant 0 : index
    %c0_318 = arith.constant 0 : index
    %377 = vector.load %arg10[%c2_314, %c1_315, %c0_316, %c0_317, %c0_318] : memref<3x2x2x64x1xf32, #tpu.memory_space<vmem>>, vector<1x1x1x64x1xf32>
    %378 = vector.shape_cast %377 : vector<1x1x1x64x1xf32> to vector<64x1xf32>
    %379 = vector.broadcast %378 : vector<64x1xf32> to vector<64x128xf32>
    %380 = arith.addf %376, %379 : vector<64x128xf32>
    %cst_319 = arith.constant 0.000000e+00 : f32
    %381 = vector.broadcast %cst_319 : f32 to vector<64x128xf32>
    %382 = arith.cmpf oge, %380, %381 : vector<64x128xf32>
    %cst_320 = arith.constant 0.00999999977 : f32
    %383 = vector.broadcast %cst_320 : f32 to vector<64x128xf32>
    %384 = arith.mulf %383, %380 : vector<64x128xf32>
    %385 = arith.select %382, %380, %384 : vector<64x128xi1>, vector<64x128xf32>
    %c2_321 = arith.constant 2 : index
    %c1_322 = arith.constant 1 : index
    %c1_323 = arith.constant 1 : index
    %c0_324 = arith.constant 0 : index
    %c0_325 = arith.constant 0 : index
    %386 = vector.load %arg9[%c2_321, %c1_322, %c1_323, %c0_324, %c0_325] : memref<3x2x2x64x64xbf16, #tpu.memory_space<vmem>>, vector<1x1x1x64x64xbf16>
    %387 = vector.shape_cast %386 : vector<1x1x1x64x64xbf16> to vector<64x64xbf16>
    %388 = arith.truncf %385 : vector<64x128xf32> to vector<64x128xbf16>
    %cst_326 = arith.constant dense<0.000000e+00> : vector<64x128xf32>
    %389 = tpu.matmul %387, %388, %cst_326 {dimension_numbers = #tpu.dot_dimension_numbers<[1], [0], [0], [1], [0, 0, 1, 1], [], []>} : vector<64x64xbf16>, vector<64x128xbf16>, vector<64x128xf32> -> vector<64x128xf32>
    %c2_327 = arith.constant 2 : index
    %c1_328 = arith.constant 1 : index
    %c1_329 = arith.constant 1 : index
    %c0_330 = arith.constant 0 : index
    %c0_331 = arith.constant 0 : index
    %390 = vector.load %arg10[%c2_327, %c1_328, %c1_329, %c0_330, %c0_331] : memref<3x2x2x64x1xf32, #tpu.memory_space<vmem>>, vector<1x1x1x64x1xf32>
    %391 = vector.shape_cast %390 : vector<1x1x1x64x1xf32> to vector<64x1xf32>
    %392 = vector.broadcast %391 : vector<64x1xf32> to vector<64x128xf32>
    %393 = arith.addf %389, %392 : vector<64x128xf32>
    %cst_332 = arith.constant 0.000000e+00 : f32
    %394 = vector.broadcast %cst_332 : f32 to vector<64x128xf32>
    %395 = arith.cmpf oge, %393, %394 : vector<64x128xf32>
    %cst_333 = arith.constant 0.00999999977 : f32
    %396 = vector.broadcast %cst_333 : f32 to vector<64x128xf32>
    %397 = arith.mulf %396, %393 : vector<64x128xf32>
    %398 = arith.select %395, %393, %397 : vector<64x128xi1>, vector<64x128xf32>
    %c2_334 = arith.constant 2 : index
    %c1_335 = arith.constant 1 : index
    %c0_336 = arith.constant 0 : index
    %c0_337 = arith.constant 0 : index
    %399 = vector.load %arg11[%c2_334, %c1_335, %c0_336, %c0_337] : memref<3x2x16x64xbf16, #tpu.memory_space<vmem>>, vector<1x1x16x64xbf16>
    %400 = vector.shape_cast %399 : vector<1x1x16x64xbf16> to vector<16x64xbf16>
    %401 = arith.truncf %398 : vector<64x128xf32> to vector<64x128xbf16>
    %cst_338 = arith.constant dense<0.000000e+00> : vector<16x128xf32>
    %402 = tpu.matmul %400, %401, %cst_338 {dimension_numbers = #tpu.dot_dimension_numbers<[1], [0], [0], [1], [0, 0, 1, 1], [], []>} : vector<16x64xbf16>, vector<64x128xbf16>, vector<16x128xf32> -> vector<16x128xf32>
    %c2_339 = arith.constant 2 : index
    %c1_340 = arith.constant 1 : index
    %c0_341 = arith.constant 0 : index
    %c0_342 = arith.constant 0 : index
    %403 = vector.load %arg12[%c2_339, %c1_340, %c0_341, %c0_342] : memref<3x2x16x1xf32, #tpu.memory_space<vmem>>, vector<1x1x16x1xf32>
    %404 = vector.shape_cast %403 : vector<1x1x16x1xf32> to vector<16x1xf32>
    %405 = vector.broadcast %404 : vector<16x1xf32> to vector<16x128xf32>
    %406 = arith.addf %402, %405 : vector<16x128xf32>
    %407 = vector.extract_strided_slice %406 {offsets = [0, 0], sizes = [8, 128], strides = [1, 1]} : vector<16x128xf32> to vector<8x128xf32>
    %408 = math.tanh %407 : vector<8x128xf32>
    %409 = vector.extract_strided_slice %406 {offsets = [8, 0], sizes = [8, 128], strides = [1, 1]} : vector<16x128xf32> to vector<8x128xf32>
    %410 = math.exp %408 : vector<8x128xf32>
    %411 = arith.mulf %297, %410 : vector<8x128xf32>
    %412 = arith.addf %411, %409 : vector<8x128xf32>
    %cst_343 = arith.constant dense<0.000000e+00> : vector<128xf32>
    %413 = vector.multi_reduction <add>, %351, %cst_343 [0] : vector<8x128xf32> to vector<128xf32>
    %414 = vector.shape_cast %413 : vector<128xf32> to vector<1x128xf32>
    %415 = arith.addf %278, %414 : vector<1x128xf32>
    %cst_344 = arith.constant dense<0.000000e+00> : vector<128xf32>
    %416 = vector.multi_reduction <add>, %408, %cst_344 [0] : vector<8x128xf32> to vector<128xf32>
    %417 = vector.shape_cast %416 : vector<128xf32> to vector<1x128xf32>
    %418 = arith.addf %415, %417 : vector<1x128xf32>
    %419 = tpu.concatenate %355, %412 in 0 : vector<8x128xf32>, vector<8x128xf32> -> vector<16x128xf32>
    %420 = arith.truncf %419 : vector<16x128xf32> to vector<16x128xbf16>
    %c2_345 = arith.constant 2 : index
    %c0_346 = arith.constant 0 : index
    %c0_347 = arith.constant 0 : index
    %421 = vector.load %arg5[%c2_345, %c0_346, %c0_347] : memref<3x16x16xbf16, #tpu.memory_space<vmem>>, vector<1x16x16xbf16>
    %422 = vector.shape_cast %421 : vector<1x16x16xbf16> to vector<16x16xbf16>
    %cst_348 = arith.constant dense<0.000000e+00> : vector<16x128xf32>
    %423 = tpu.matmul %422, %420, %cst_348 {dimension_numbers = #tpu.dot_dimension_numbers<[1], [0], [0], [1], [0, 0, 1, 1], [], []>} : vector<16x16xbf16>, vector<16x128xbf16>, vector<16x128xf32> -> vector<16x128xf32>
    %c0_349 = arith.constant 0 : index
    %c0_350 = arith.constant 0 : index
    %424 = vector.load %arg13[%c0_349, %c0_350] : memref<16x128xf32, #tpu.memory_space<vmem>>, vector<16x128xf32>
    tpu.vector_store %arg13[%c0_349, %c0_350], %423 {strides = array<i32>} : memref<16x128xf32, #tpu.memory_space<vmem>>, vector<16x128xf32>,
    %c0_351 = arith.constant 0 : index
    %c0_352 = arith.constant 0 : index
    %425 = vector.load %arg14[%c0_351, %c0_352] : memref<1x128xf32, #tpu.memory_space<vmem>>, vector<1x128xf32>
    tpu.vector_store %arg14[%c0_351, %c0_352], %418 {strides = array<i32>} : memref<1x128xf32, #tpu.memory_space<vmem>>, vector<1x128xf32>,
    return
  }
  func.func @transform_0(%arg0: i32) -> (i32, i32) {
    %c0_i32 = arith.constant 0 : i32
    %c0_i32_0 = arith.constant 0 : i32
    return %c0_i32, %arg0 : i32, i32
  }
  func.func @transform_1(%arg0: i32) -> (i32, i32) {
    %c0_i32 = arith.constant 0 : i32
    %c0_i32_0 = arith.constant 0 : i32
    return %c0_i32, %arg0 : i32, i32
  }
  func.func @transform_2(%arg0: i32) -> (i32, i32, i32) {
    %c0_i32 = arith.constant 0 : i32
    %c0_i32_0 = arith.constant 0 : i32
    %c0_i32_1 = arith.constant 0 : i32
    %c0_i32_2 = arith.constant 0 : i32
    return %c0_i32, %c0_i32_0, %c0_i32_1 : i32, i32, i32
  }
  func.func @transform_3(%arg0: i32) -> (i32, i32, i32) {
    %c0_i32 = arith.constant 0 : i32
    %c0_i32_0 = arith.constant 0 : i32
    %c0_i32_1 = arith.constant 0 : i32
    %c0_i32_2 = arith.constant 0 : i32
    return %c0_i32, %c0_i32_0, %c0_i32_1 : i32, i32, i32
  }
  func.func @transform_4(%arg0: i32) -> (i32, i32, i32) {
    %c0_i32 = arith.constant 0 : i32
    %c0_i32_0 = arith.constant 0 : i32
    %c0_i32_1 = arith.constant 0 : i32
    %c0_i32_2 = arith.constant 0 : i32
    return %c0_i32, %c0_i32_0, %c0_i32_1 : i32, i32, i32
  }
  func.func @transform_5(%arg0: i32) -> (i32, i32, i32, i32) {
    %c0_i32 = arith.constant 0 : i32
    %c0_i32_0 = arith.constant 0 : i32
    %c0_i32_1 = arith.constant 0 : i32
    %c0_i32_2 = arith.constant 0 : i32
    %c0_i32_3 = arith.constant 0 : i32
    return %c0_i32, %c0_i32_0, %c0_i32_1, %c0_i32_2 : i32, i32, i32, i32
  }
  func.func @transform_6(%arg0: i32) -> (i32, i32, i32, i32) {
    %c0_i32 = arith.constant 0 : i32
    %c0_i32_0 = arith.constant 0 : i32
    %c0_i32_1 = arith.constant 0 : i32
    %c0_i32_2 = arith.constant 0 : i32
    %c0_i32_3 = arith.constant 0 : i32
    return %c0_i32, %c0_i32_0, %c0_i32_1, %c0_i32_2 : i32, i32, i32, i32
  }
  func.func @transform_7(%arg0: i32) -> (i32, i32, i32, i32) {
    %c0_i32 = arith.constant 0 : i32
    %c0_i32_0 = arith.constant 0 : i32
    %c0_i32_1 = arith.constant 0 : i32
    %c0_i32_2 = arith.constant 0 : i32
    %c0_i32_3 = arith.constant 0 : i32
    return %c0_i32, %c0_i32_0, %c0_i32_1, %c0_i32_2 : i32, i32, i32, i32
  }
  func.func @transform_8(%arg0: i32) -> (i32, i32, i32, i32, i32) {
    %c0_i32 = arith.constant 0 : i32
    %c0_i32_0 = arith.constant 0 : i32
    %c0_i32_1 = arith.constant 0 : i32
    %c0_i32_2 = arith.constant 0 : i32
    %c0_i32_3 = arith.constant 0 : i32
    %c0_i32_4 = arith.constant 0 : i32
    return %c0_i32, %c0_i32_0, %c0_i32_1, %c0_i32_2, %c0_i32_3 : i32, i32, i32, i32, i32
  }
  func.func @transform_9(%arg0: i32) -> (i32, i32, i32, i32, i32) {
    %c0_i32 = arith.constant 0 : i32
    %c0_i32_0 = arith.constant 0 : i32
    %c0_i32_1 = arith.constant 0 : i32
    %c0_i32_2 = arith.constant 0 : i32
    %c0_i32_3 = arith.constant 0 : i32
    %c0_i32_4 = arith.constant 0 : i32
    return %c0_i32, %c0_i32_0, %c0_i32_1, %c0_i32_2, %c0_i32_3 : i32, i32, i32, i32, i32
  }
  func.func @transform_10(%arg0: i32) -> (i32, i32, i32, i32) {
    %c0_i32 = arith.constant 0 : i32
    %c0_i32_0 = arith.constant 0 : i32
    %c0_i32_1 = arith.constant 0 : i32
    %c0_i32_2 = arith.constant 0 : i32
    %c0_i32_3 = arith.constant 0 : i32
    return %c0_i32, %c0_i32_0, %c0_i32_1, %c0_i32_2 : i32, i32, i32, i32
  }
  func.func @transform_11(%arg0: i32) -> (i32, i32, i32, i32) {
    %c0_i32 = arith.constant 0 : i32
    %c0_i32_0 = arith.constant 0 : i32
    %c0_i32_1 = arith.constant 0 : i32
    %c0_i32_2 = arith.constant 0 : i32
    %c0_i32_3 = arith.constant 0 : i32
    return %c0_i32, %c0_i32_0, %c0_i32_1, %c0_i32_2 : i32, i32, i32, i32
  }
  func.func @transform_12(%arg0: i32) -> (i32, i32) {
    %c0_i32 = arith.constant 0 : i32
    %c0_i32_0 = arith.constant 0 : i32
    return %c0_i32, %arg0 : i32, i32
  }
  func.func @transform_13(%arg0: i32) -> (i32, i32) {
    %c0_i32 = arith.constant 0 : i32
    %c0_i32_0 = arith.constant 0 : i32
    return %c0_i32, %arg0 : i32, i32
  }
}

</mosaic_0001>

<bundles_post_ra>
// kernel: tpu_custom_call.1
= control target key start
LH: loop header
LB: loop body
LE: loop exit
PB: predicated region body
PF: predicated region fallthrough
CT: control target
= control target key end

     0   :  { %19 = vsyncpa [#allocation3], 0  ;;  %v6177_v2 = vmov 0   ;;  %vm122_vm0 = vcmask 130048   ;;  %vm220_vm1 = vcmask 64512   ;;  %s7542_s0 = inlined_call_operand.vmem [shape: f32[16,128], index: 0, kind: input, shape index: {}]   ;;  %s7543_s1 = inlined_call_operand.vmem [shape: f32[16,128], index: 1, kind: input, shape index: {}]   ;;  %s7544_s2 = inlined_call_operand.vmem [shape: f32[3,16,1], index: 2, kind: input, shape index: {}]   ;;  %s7545_s3 = inlined_call_operand.vmem [shape: f32[3,16,1], index: 3, kind: input, shape index: {}]   ;;  %s7546_s4 = inlined_call_operand.vmem [shape: bf16[3,16,16], index: 4, kind: input, shape index: {}]   ;;  %s7547_s5 = inlined_call_operand.vmem [shape: bf16[3,2,64,8], index: 5, kind: input, shape index: {}]   ;;  %s7548_s6 = inlined_call_operand.vmem [shape: bf16[3,2,64,16], index: 6, kind: input, shape index: {}]   ;;  %s7549_s7 = inlined_call_operand.vmem [shape: f32[3,2,64,1], index: 7, kind: input, shape index: {}]   ;;  %s7550_s8 = inlined_call_operand.vmem [shape: bf16[3,2,2,64,64], index: 8, kind: input, shape index: {}]   ;;  %s7551_s9 = inlined_call_operand.vmem [shape: f32[3,2,2,64,1], index: 9, kind: input, shape index: {}]   ;;  %s7552_s10 = inlined_call_operand.vmem [shape: bf16[3,2,16,64], index: 10, kind: input, shape index: {}]   ;;  %s7553_s11 = inlined_call_operand.vmem [shape: f32[3,2,16,1], index: 11, kind: input, shape index: {}]   ;;  %s7554_s12 = inlined_call_operand.hbm [shape: f32[16,128], index: 12, kind: output, shape index: {0}]   ;;  %s7555_s13 = inlined_call_operand.hbm [shape: f32[1,128], index: 13, kind: output, shape index: {1}]  }
   0x1   :  { %v302_v0 = vld [vmem:[%s7549_s7] sm:$0xff]  ;;  %5999 = vset.pattern.permute.xlu1 %v6177_v2  ;;  %5998 = vset.pattern.permute.xlu0 %v6177_v2  ;;  %v303_v3 = vld [vmem:[%s7549_s7 + $0x8] sm:$0xff]  ;;  %v305_v5 = vld [vmem:[%s7549_s7 + $0x18] sm:$0xff] }
   0x2   :  { %v53_v1 = vld [vmem:[%s7544_s2] sm:$0xff]  ;;  %312 = vperm.xlu1 %5999, %v302_v0   ;;  %v304_v6 = vld [vmem:[%s7549_s7 + $0x10] sm:$0xff]  ;;  %v307_v7 = vld [vmem:[%s7549_s7 + $0x28] sm:$0xff] }
   0x3   :  { %57 = vperm.xlu0 %5998, %v53_v1   ;;  %v51_v4 = vld [vmem:[%s7545_s3] sm:$0xff]  ;;  %v309_v9 = vld [vmem:[%s7549_s7 + $0x38] sm:$0xff]  ;;  %v308_v10 = vld [vmem:[%s7549_s7 + $0x30] sm:$0xff] }
   0x4   :  { %v306_v8 = vld [vmem:[%s7549_s7 + $0x20] sm:$0xff]  ;;  %v395_v11 = vld [vmem:[%s7551_s9 + $0x8] sm:$0xff]  ;;  %v397_v14 = vld [vmem:[%s7551_s9 + $0x18] sm:$0xff] }
   0x5   :  { %v394_v12 = vld [vmem:[%s7551_s9] sm:$0xff]  ;;  %v49_v15 = vld [vmem:[%s7543_s1 + $0x8] sm:$0xff]  ;;  %v396_v18 = vld [vmem:[%s7551_s9 + $0x10] sm:$0xff] }
   0x6   :  { %317 = vperm.xlu1 %5999, %v303_v3   ;;  %v48_v13 = vld [vmem:[%s7543_s1] sm:$0xff]  ;;  %v6001_v19 = vld [vmem:[%s7548_s6 + $0x8] sm:$0xff]   ;;  %v6002_v20 = vld [vmem:[%s7548_s6 + $0x10] sm:$0xff]  }
   0x7   :  { %69 = vperm.xlu0 %5998, %v51_v4   ;;  %v6299_v16 = vpack.c.bf16 %v49_v15, %v48_v13  ;;  %v6000_v17 = vld [vmem:[%s7548_s6] sm:$0xff]   ;;  %v399_v21 = vld [vmem:[%s7551_s9 + $0x28] sm:$0xff]  ;;  %v401_v23 = vld [vmem:[%s7551_s9 + $0x38] sm:$0xff] }
   0x8   :  { %5537 = vmatprep.mubr.msk.bf16.mxu0 %vm122_vm0, %v6000_v17  ;;  %v398_v22 = vld [vmem:[%s7551_s9 + $0x20] sm:$0xff]  ;;  %v400_v24 = vld [vmem:[%s7551_s9 + $0x30] sm:$0xff]  ;;  %v6003_v25 = vld [vmem:[%s7548_s6 + $0x18] sm:$0xff]  }
   0x9   :  { %5535 = vmatprep.subr.bf16.mxu0 %v6299_v16  ;;  %v6004_v26 = vld [vmem:[%s7547_s5] sm:$0xff]   ;;  %v4838_v27 = vld [vmem:[%s7551_s9 + $0x48] sm:$0xff]  ;;  %v4840_v29 = vld [vmem:[%s7551_s9 + $0x58] sm:$0xff] }
   0xa   :  { %327 = vperm.xlu1 %5999, %v305_v5   ;;  %5536 = vmatpush3.bf16.msra.mxu0 %v6299_v16  ;;  %v4837_v28 = vld [vmem:[%s7551_s9 + $0x40] sm:$0xff]  ;;  %v4839_v30 = vld [vmem:[%s7551_s9 + $0x50] sm:$0xff]  ;;  %v4842_v31 = vld [vmem:[%s7551_s9 + $0x68] sm:$0xff] }
   0xb   :  { %322 = vperm.xlu0 %5998, %v304_v6   ;;  %v4841_v32 = vld [vmem:[%s7551_s9 + $0x60] sm:$0xff]  ;;  %v4844_v33 = vld [vmem:[%s7551_s9 + $0x78] sm:$0xff]  ;;  %v4843_v34 = vld [vmem:[%s7551_s9 + $0x70] sm:$0xff] }
   0xc   :  { %v54_v35 = vld [vmem:[%s7544_s2 + $0x8] sm:$0xff]  ;;  %v753_v36 = vld [vmem:[%s7553_s11] sm:$0xff]  ;;  %v4890_v41 = vld [vmem:[%s7549_s7 + $0x58] sm:$0xff] }
   0xd   :  { %5538 = vmatmul.mubr.msk.bf16.vlgmr.msra.gmra.mrb[0].mxu0 %vm122_vm0, %v6001_v19  ;;  %v754_v37 = vld [vmem:[%s7553_s11 + $0x8] sm:$0xff]  ;;  %v4887_v40 = vld [vmem:[%s7549_s7 + $0x40] sm:$0xff]  ;;  %v4889_v42 = vld [vmem:[%s7549_s7 + $0x50] sm:$0xff] }
   0xe   :  { %337 = vperm.xlu1 %5999, %v307_v7   ;;  %5541 = vmatprep.mubr.msk.bf16.mxu0 %vm122_vm0, %v6002_v20  ;;  %v52_v38 = vld [vmem:[%s7545_s3 + $0x8] sm:$0xff]  ;;  %v4891_v44 = vld [vmem:[%s7549_s7 + $0x60] sm:$0xff]  ;;  %v4894_v45 = vld [vmem:[%s7549_s7 + $0x78] sm:$0xff] }
   0xf   :  { %332 = vperm.xlu0 %5998, %v306_v8   ;;  %v4888_v39 = vld [vmem:[%s7549_s7 + $0x48] sm:$0xff]  ;;  %v4893_v46 = vld [vmem:[%s7549_s7 + $0x70] sm:$0xff]  ;;  %v4903_v48 = vld [vmem:[%s7551_s9 + $0x80] sm:$0xff] }
  0x10   :  { %v4892_v43 = vld [vmem:[%s7549_s7 + $0x68] sm:$0xff]  ;;  %v4906_v49 = vld [vmem:[%s7551_s9 + $0x98] sm:$0xff]  ;;  %v4905_v50 = vld [vmem:[%s7551_s9 + $0x90] sm:$0xff] }
  0x11   :  { %v4904_v47 = vld [vmem:[%s7551_s9 + $0x88] sm:$0xff]  ;;  %v4907_v52 = vld [vmem:[%s7551_s9 + $0xa0] sm:$0xff]  ;;  %v4910_v53 = vld [vmem:[%s7551_s9 + $0xb8] sm:$0xff] }
  0x12   :  { %347 = vperm.xlu1 %5999, %v309_v9   ;;  %v4908_v51 = vld [vmem:[%s7551_s9 + $0xa8] sm:$0xff]  ;;  %v4909_v54 = vld [vmem:[%s7551_s9 + $0xb0] sm:$0xff]  ;;  %v4927_v56 = vld [vmem:[%s7551_s9 + $0xc0] sm:$0xff] }
  0x13   :  { %342 = vperm.xlu0 %5998, %v308_v10   ;;  %v4928_v55 = vld [vmem:[%s7551_s9 + $0xc8] sm:$0xff]  ;;  %v4930_v57 = vld [vmem:[%s7551_s9 + $0xd8] sm:$0xff]  ;;  %v4929_v58 = vld [vmem:[%s7551_s9 + $0xd0] sm:$0xff] }
  0x14   :  { %v4932_v59 = vld [vmem:[%s7551_s9 + $0xe8] sm:$0xff]  ;;  %v4931_v60 = vld [vmem:[%s7551_s9 + $0xe0] sm:$0xff]  ;;  %v4934_v61 = vld [vmem:[%s7551_s9 + $0xf8] sm:$0xff] }
  0x15   :  { %5542 = vmatmul.mubr.msk.bf16.gmra.mrb[4].mxu0 %vm122_vm0, %v6003_v25  ;;  %v4933_v62 = vld [vmem:[%s7551_s9 + $0xf0] sm:$0xff]  ;;  %v4946_v63 = vld [vmem:[%s7553_s11 + $0x18] sm:$0xff] }
  0x16   :  { %409 = vperm.xlu1 %5999, %v395_v11   ;;  %5547 = vmatprep.mubr.msk.bf16.mxu0 %vm220_vm1, %v6004_v26  ;;  %v4945_v0 = vld [vmem:[%s7553_s11 + $0x10] sm:$0xff] }
  0x17   :  { %404 = vperm.xlu0 %5998, %v394_v12   ;;  %v4949_v1 = vld [vmem:[%s7545_s3 + $0x10] sm:$0xff] }
  0x18   :  { %v4951_v2 = vld [vmem:[%s7544_s2 + $0x10] sm:$0xff] }
  0x1a   :  { %419 = vperm.xlu1 %5999, %v397_v14  }
  0x1b   :  { %414 = vperm.xlu0 %5998, %v396_v18  }
  0x1e   :  { %429 = vperm.xlu1 %5999, %v399_v21  }
  0x1f   :  { %424 = vperm.xlu0 %5998, %v398_v22  }
  0x22   :  { %439 = vperm.xlu1 %5999, %v401_v23  }
  0x23   :  { %434 = vperm.xlu0 %5998, %v400_v24  }
  0x26   :  { %593 = vperm.xlu1 %5999, %v4838_v27  }
  0x27   :  { %588 = vperm.xlu0 %5998, %v4837_v28  }
  0x2a   :  { %603 = vperm.xlu1 %5999, %v4840_v29  }
  0x2b   :  { %598 = vperm.xlu0 %5998, %v4839_v30  }
  0x2e   :  { %613 = vperm.xlu1 %5999, %v4842_v31  }
  0x2f   :  { %608 = vperm.xlu0 %5998, %v4841_v32  }
  0x32   :  { %623 = vperm.xlu1 %5999, %v4844_v33  }
  0x33   :  { %618 = vperm.xlu0 %5998, %v4843_v34  }
  0x36   :  { %62 = vperm.xlu1 %5999, %v54_v35  }
  0x37   :  { %757 = vperm.xlu0 %5998, %v753_v36  }
  0x3a   :  { %762 = vperm.xlu1 %5999, %v754_v37  }
  0x3b   :  { %74 = vperm.xlu0 %5998, %v52_v38  }
  0x3e   :  { %1051 = vperm.xlu1 %5999, %v4888_v39  }
  0x3f   :  { %1046 = vperm.xlu0 %5998, %v4887_v40  }
  0x42   :  { %1061 = vperm.xlu1 %5999, %v4890_v41  }
  0x43   :  { %1056 = vperm.xlu0 %5998, %v4889_v42  }
  0x46   :  { %1071 = vperm.xlu1 %5999, %v4892_v43  }
  0x47   :  { %1066 = vperm.xlu0 %5998, %v4891_v44  }
  0x4a   :  { %1081 = vperm.xlu1 %5999, %v4894_v45  }
  0x4b   :  { %1076 = vperm.xlu0 %5998, %v4893_v46  }
  0x4e   :  { %1145 = vperm.xlu1 %5999, %v4904_v47  }
  0x4f   :  { %1140 = vperm.xlu0 %5998, %v4903_v48  }
  0x52   :  { %1155 = vperm.xlu1 %5999, %v4906_v49  }
  0x53   :  { %1150 = vperm.xlu0 %5998, %v4905_v50  }
  0x56   :  { %1165 = vperm.xlu1 %5999, %v4908_v51  }
  0x57   :  { %1160 = vperm.xlu0 %5998, %v4907_v52  }
  0x5a   :  { %1175 = vperm.xlu1 %5999, %v4910_v53  }
  0x5b   :  { %1170 = vperm.xlu0 %5998, %v4909_v54  }
  0x5e   :  { %1328 = vperm.xlu1 %5999, %v4928_v55  }
  0x5f   :  { %1323 = vperm.xlu0 %5998, %v4927_v56  }
  0x62   :  { %1338 = vperm.xlu1 %5999, %v4930_v57  }
  0x63   :  { %1333 = vperm.xlu0 %5998, %v4929_v58  }
  0x66   :  { %1348 = vperm.xlu1 %5999, %v4932_v59  }
  0x67   :  { %1343 = vperm.xlu0 %5998, %v4931_v60  }
  0x6a   :  { %1358 = vperm.xlu1 %5999, %v4934_v61  }
  0x6b   :  { %1353 = vperm.xlu0 %5998, %v4933_v62  }
  0x6e   :  { %1499 = vperm.xlu1 %5999, %v4946_v63  }
  0x6f   :  { %1494 = vperm.xlu0 %5998, %v4945_v0  }
  0x72   :  { %1640 = vperm.xlu1 %5999, %v4949_v1  }
  0x73   :  { %1581 = vperm.xlu0 %5998, %v4951_v2  }
  0x74   :  { %20 = vsyncpa [#allocation5], 0  ;;  %v4988_v3 = vld [vmem:[%s7549_s7 + $0x88] sm:$0xff]  ;;  %v4987_v4 = vld [vmem:[%s7549_s7 + $0x80] sm:$0xff]  ;;  %vm233_vm3 = vcmask 1043456   ;;  %vm462_vm4 = vcmask 523264  }
  0x75   :  { %v4990_v5 = vld [vmem:[%s7549_s7 + $0x98] sm:$0xff]  ;;  %v4989_v6 = vld [vmem:[%s7549_s7 + $0x90] sm:$0xff]  ;;  %v4992_v7 = vld [vmem:[%s7549_s7 + $0xa8] sm:$0xff]  ;;  %s6180_s18 = smov [#allocation4]  }
  0x76   :  { %1888 = vperm.xlu1 %5999, %v4988_v3   ;;  %v4991_v8 = vld [vmem:[%s7549_s7 + $0xa0] sm:$0xff]  ;;  %v4994_v9 = vld [vmem:[%s7549_s7 + $0xb8] sm:$0xff]  ;;  %v4993_v10 = vld [vmem:[%s7549_s7 + $0xb0] sm:$0xff] }
  0x77   :  { %1883 = vperm.xlu0 %5998, %v4987_v4   ;;  %v46_v12 = vld [vmem:[%s7542_s0] sm:$0xff]  ;;  %v5004_v14 = vld [vmem:[%s7551_s9 + $0x108] sm:$0xff]  ;;  %v5006_v20 = vld [vmem:[%s7551_s9 + $0x118] sm:$0xff] }
  0x78   :  { %v5003_v15 = vld [vmem:[%s7551_s9 + $0x100] sm:$0xff]  ;;  %v5005_v21 = vld [vmem:[%s7551_s9 + $0x110] sm:$0xff]  ;;  %v5008_v26 = vld [vmem:[%s7551_s9 + $0x128] sm:$0xff] }
  0x79   :  { %v5007_v27 = vld [vmem:[%s7551_s9 + $0x120] sm:$0xff]  ;;  %v6005_v30 = vld [vmem:[%s7547_s5 + $0x8] sm:$0xff]   ;;  %v5010_v32 = vld [vmem:[%s7551_s9 + $0x138] sm:$0xff] }
  0x7a   :  { %1898 = vperm.xlu1 %5999, %v4990_v5   ;;  %v6006_v33 = vld [vmem:[%s7547_s5 + $0x10] sm:$0xff]   ;;  %v5028_v35 = vld [vmem:[%s7551_s9 + $0x148] sm:$0xff]  ;;  %v5027_v37 = vld [vmem:[%s7551_s9 + $0x140] sm:$0xff] }
  0x7b   :  { %1893 = vperm.xlu0 %5998, %v4989_v6   ;;  %v5009_v34 = vld [vmem:[%s7551_s9 + $0x130] sm:$0xff]  ;;  %v6007_v39 = vld [vmem:[%s7547_s5 + $0x18] sm:$0xff]   ;;  %v5032_v44 = vld [vmem:[%s7551_s9 + $0x168] sm:$0xff] }
  0x7c   :  { %v5030_v40 = vld [vmem:[%s7551_s9 + $0x158] sm:$0xff]  ;;  %v5029_v41 = vld [vmem:[%s7551_s9 + $0x150] sm:$0xff]  ;;  %v5031_v45 = vld [vmem:[%s7551_s9 + $0x160] sm:$0xff] }
  0x7d   :  { %v5034_v46 = vld [vmem:[%s7551_s9 + $0x178] sm:$0xff]  ;;  %v5033_v48 = vld [vmem:[%s7551_s9 + $0x170] sm:$0xff]  ;;  %v5045_v51 = vld [vmem:[%s7553_s11 + $0x20] sm:$0xff] }
  0x7e   :  { %1908 = vperm.xlu1 %5999, %v4992_v7   ;;  %v4952_v50 = vld [vmem:[%s7544_s2 + $0x18] sm:$0xff]  ;;  %v5046_v54 = vld [vmem:[%s7553_s11 + $0x28] sm:$0xff]  ;;  %v5081_v58 = vld [vmem:[%s7549_s7 + $0xc0] sm:$0xff] }
  0x7f   :  { %1903 = vperm.xlu0 %5998, %v4991_v8   ;;  %v4950_v55 = vld [vmem:[%s7545_s3 + $0x18] sm:$0xff]  ;;  %v5082_v56 = vld [vmem:[%s7549_s7 + $0xc8] sm:$0xff]  ;;  %v5083_v61 = vld [vmem:[%s7549_s7 + $0xd0] sm:$0xff] }
  0x80   :  { %v5084_v60 = vld [vmem:[%s7549_s7 + $0xd8] sm:$0xff]  ;;  %v5086_v0 = vld [vmem:[%s7549_s7 + $0xe8] sm:$0xff]  ;;  %v5085_v1 = vld [vmem:[%s7549_s7 + $0xe0] sm:$0xff] }
  0x81   :  { %v6485_v13 = vpop.permute.xlu1 %312  ;;  %v5088_v2 = vld [vmem:[%s7549_s7 + $0xf8] sm:$0xff]  ;;  %v5087_v4 = vld [vmem:[%s7549_s7 + $0xf0] sm:$0xff]  ;;  %v5098_v6 = vld [vmem:[%s7551_s9 + $0x188] sm:$0xff] }
  0x82   :  { %v58_v11 = vpop.permute.xlu0 %57  ;;  %1918 = vperm.xlu1 %5999, %v4994_v9   ;;  %v5097_v7 = vld [vmem:[%s7551_s9 + $0x180] sm:$0xff] }
  0x83   :  { %1913 = vperm.xlu0 %5998, %v4993_v10   ;;  %v65_v17 = vadd.f32 %v58_v11, %v46_v12  ;;  %v5100_v10 = vld [vmem:[%s7551_s9 + $0x198] sm:$0xff]  ;;  %v5099_v11 = vld [vmem:[%s7551_s9 + $0x190] sm:$0xff]  ;;  %v5102_v12 = vld [vmem:[%s7551_s9 + $0x1a8] sm:$0xff] }
  0x85   :  { %v6499_v22 = vpop.permute.xlu1 %317 }
  0x86   :  { %v70_v18 = vpop.permute.xlu0 %69  ;;  %1982 = vperm.xlu1 %5999, %v5004_v14  }
  0x87   :  { %v77_v19 = vmul.f32 %v70_v18, %v65_v17  ;;  %1977 = vperm.xlu0 %5998, %v5003_v15   ;;  %v5101_v15 = vld [vmem:[%s7551_s9 + $0x1a0] sm:$0xff]  ;;  %v5104_v18 = vld [vmem:[%s7551_s9 + $0x1b8] sm:$0xff] }
  0x89   :  { %vm79_vm2 = vcmp.ge.f32.partialorder %v77_v19, 0.0  ;;  %v81_v23 = vmul.f32 0.9, %v77_v19  ;;  %v6513_v29 = vpop.permute.xlu1 %327 }
  0x8a   :  { %1992 = vperm.xlu1 %5999, %v5006_v20   ;;  %v6518_v31 = vpop.permute.xlu0 %322 }
  0x8b   :  { %v6501_v24 = vsel %vm79_vm2, %v77_v19, %v81_v23  ;;  %1987 = vperm.xlu0 %5998, %v5005_v21   ;;  %v5103_v19 = vld [vmem:[%s7551_s9 + $0x1b0] sm:$0xff]  ;;  %v5122_v23 = vld [vmem:[%s7551_s9 + $0x1c8] sm:$0xff] }
  0x8c   :  { %7557 = vst [vmem:[#allocation8_spill] sm:$0xff] %v6501_v24  ;;  %v93_v25 = vpack.c.bf16 %v6501_v24, %v6501_v24 }
  0x8d   :  { %v6534_v36 = vpop.permute.xlu1 %337 }
  0x8e   :  { %5985 = vmatprep.subr.msk.bf16.mxu0 %vm233_vm3, %v93_v25  ;;  %v235_v28 = vsel %vm233_vm3, %v93_v25, 0  ;;  %2002 = vperm.xlu1 %5999, %v5008_v26   ;;  %v6539_v38 = vpop.permute.xlu0 %332  ;;  %v5121_v25 = vld [vmem:[%s7551_s9 + $0x1c0] sm:$0xff]  ;;  %v5124_v26 = vld [vmem:[%s7551_s9 + $0x1d8] sm:$0xff] }
  0x8f   :  { %1997 = vperm.xlu0 %5998, %v5007_v27   ;;  %5546 = vmatpush3.bf16.msra.mxu0 %v235_v28  ;;  %v5123_v28 = vld [vmem:[%s7551_s9 + $0x1d0] sm:$0xff] }
  0x91   :  { %v6550_v42 = vpop.permute.xlu1 %347 }
  0x92   :  { %5548 = vmatmul.mubr.msk.bf16.vlgmr.msra.gmra.mrb[0].mxu0 %vm220_vm1, %v6005_v30  ;;  %2012 = vperm.xlu1 %5999, %v5010_v32   ;;  %v6553_v43 = vpop.permute.xlu0 %342  ;;  %v5126_v32 = vld [vmem:[%s7551_s9 + $0x1e8] sm:$0xff] }
  0x93   :  { %2007 = vperm.xlu0 %5998, %v5009_v34   ;;  %5551 = vmatprep.mubr.msk.bf16.mxu0 %vm220_vm1, %v6006_v33  ;;  %v5125_v33 = vld [vmem:[%s7551_s9 + $0x1e0] sm:$0xff] }
  0x95   :  { %v6564_v47 = vpop.permute.xlu1 %409 }
  0x96   :  { %2165 = vperm.xlu1 %5999, %v5028_v35   ;;  %v6569_v49 = vpop.permute.xlu0 %404 }
  0x97   :  { %2160 = vperm.xlu0 %5998, %v5027_v37   ;;  %v5128_v37 = vld [vmem:[%s7551_s9 + $0x1f8] sm:$0xff] }
  0x99   :  { %v6577_v52 = vpop.permute.xlu1 %419 }
  0x9a   :  { %5552 = vmatmul.mubr.msk.bf16.gmra.mrb[4].mxu0 %vm220_vm1, %v6007_v39  ;;  %2175 = vperm.xlu1 %5999, %v5030_v40   ;;  %v6579_v53 = vpop.permute.xlu0 %414  ;;  %v5127_v39 = vld [vmem:[%s7551_s9 + $0x1f0] sm:$0xff]  ;;  %v5140_v40 = vld [vmem:[%s7553_s11 + $0x38] sm:$0xff] }
  0x9b   :  { %2170 = vperm.xlu0 %5998, %v5029_v41  }
  0x9d   :  { %v6590_v57 = vpop.permute.xlu1 %429 }
  0x9e   :  { %2185 = vperm.xlu1 %5999, %v5032_v44   ;;  %v6595_v59 = vpop.permute.xlu0 %424  ;;  %v5139_v44 = vld [vmem:[%s7553_s11 + $0x30] sm:$0xff] }
  0x9f   :  { %2180 = vperm.xlu0 %5998, %v5031_v45  }
  0xa1   :  { %v6603_v62 = vpop.permute.xlu1 %439 }
  0xa2   :  { %2195 = vperm.xlu1 %5999, %v5034_v46   ;;  %v6605_v63 = vpop.permute.xlu0 %434  ;;  %v5145_v46 = vld [vmem:[%s7545_s3 + $0x20] sm:$0xff] }
  0xa3   :  { %2190 = vperm.xlu0 %5998, %v5033_v48   ;;  %v5147_v48 = vld [vmem:[%s7544_s2 + $0x20] sm:$0xff] }
  0xa5   :  { %v6616_v3 = vpop.permute.xlu1 %593 }
  0xa6   :  { %1586 = vperm.xlu1 %5999, %v4952_v50   ;;  %v6621_v5 = vpop.permute.xlu0 %588 }
  0xa7   :  { %2331 = vperm.xlu0 %5998, %v5045_v51  }
  0xa9   :  { %v6629_v8 = vpop.permute.xlu1 %603 }
  0xaa   :  { %2336 = vperm.xlu1 %5999, %v5046_v54   ;;  %v6631_v9 = vpop.permute.xlu0 %598  ;;  %v5184_v54 = vld [vmem:[%s7549_s7 + $0x108] sm:$0xff] }
  0xab   :  { %1645 = vperm.xlu0 %5998, %v4950_v55   ;;  %v5183_v55 = vld [vmem:[%s7549_s7 + $0x100] sm:$0xff] }
  0xad   :  { %v6642_v14 = vpop.permute.xlu1 %613 }
  0xae   :  { %2625 = vperm.xlu1 %5999, %v5082_v56   ;;  %v6647_v17 = vpop.permute.xlu0 %608  ;;  %v5186_v56 = vld [vmem:[%s7549_s7 + $0x118] sm:$0xff] }
  0xaf   :  { %2620 = vperm.xlu0 %5998, %v5081_v58  }
  0xb1   :  { %v6655_v20 = vpop.permute.xlu1 %623 }
  0xb2   :  { %2635 = vperm.xlu1 %5999, %v5084_v60   ;;  %v6657_v21 = vpop.permute.xlu0 %618  ;;  %v5185_v60 = vld [vmem:[%s7549_s7 + $0x110] sm:$0xff] }
  0xb3   :  { %2630 = vperm.xlu0 %5998, %v5083_v61  }
  0xb5   :  { %v6668_v27 = vpop.permute.xlu1 %62 }
  0xb6   :  { %2645 = vperm.xlu1 %5999, %v5086_v0   ;;  %v6673_v30 = vpop.permute.xlu0 %757  ;;  %v5188_v0 = vld [vmem:[%s7549_s7 + $0x128] sm:$0xff] }
  0xb7   :  { %2640 = vperm.xlu0 %5998, %v5085_v1   ;;  %v5187_v1 = vld [vmem:[%s7549_s7 + $0x120] sm:$0xff] }
  0xb9   :  { %v6681_v34 = vpop.permute.xlu1 %762 }
  0xba   :  { %2655 = vperm.xlu1 %5999, %v5088_v2   ;;  %v6683_v35 = vpop.permute.xlu0 %74 }
  0xbb   :  { %2650 = vperm.xlu0 %5998, %v5087_v4  }
  0xbd   :  { %v6694_v41 = vpop.permute.xlu1 %1051 }
  0xbe   :  { %2719 = vperm.xlu1 %5999, %v5098_v6   ;;  %v6699_v45 = vpop.permute.xlu0 %1046  ;;  %v5190_v6 = vld [vmem:[%s7549_s7 + $0x138] sm:$0xff] }
  0xbf   :  { %2714 = vperm.xlu0 %5998, %v5097_v7   ;;  %v5189_v7 = vld [vmem:[%s7549_s7 + $0x130] sm:$0xff] }
  0xc1   :  { %v6707_v50 = vpop.permute.xlu1 %1061 }
  0xc2   :  { %2729 = vperm.xlu1 %5999, %v5100_v10   ;;  %v6709_v51 = vpop.permute.xlu0 %1056  ;;  %v5200_v10 = vld [vmem:[%s7551_s9 + $0x208] sm:$0xff] }
  0xc3   :  { %2724 = vperm.xlu0 %5998, %v5099_v11  }
  0xc5   :  { %v6720_v58 = vpop.permute.xlu1 %1071 }
  0xc6   :  { %2739 = vperm.xlu1 %5999, %v5102_v12   ;;  %v6725_v61 = vpop.permute.xlu0 %1066  ;;  %v5199_v12 = vld [vmem:[%s7551_s9 + $0x200] sm:$0xff] }
  0xc7   :  { %2734 = vperm.xlu0 %5998, %v5101_v15  }
  0xc9   :  { %v6733_v2 = vpop.permute.xlu1 %1081 }
  0xca   :  { %2749 = vperm.xlu1 %5999, %v5104_v18   ;;  %v6735_v4 = vpop.permute.xlu0 %1076  ;;  %v5202_v18 = vld [vmem:[%s7551_s9 + $0x218] sm:$0xff] }
  0xcb   :  { %2744 = vperm.xlu0 %5998, %v5103_v19   ;;  %v5201_v19 = vld [vmem:[%s7551_s9 + $0x210] sm:$0xff] }
  0xcd   :  { %v6746_v11 = vpop.permute.xlu1 %1145 }
  0xce   :  { %2902 = vperm.xlu1 %5999, %v5122_v23   ;;  %v6751_v15 = vpop.permute.xlu0 %1140 }
  0xcf   :  { %2897 = vperm.xlu0 %5998, %v5121_v25  }
  0xd1   :  { %v6759_v23 = vpop.permute.xlu1 %1155 }
  0xd2   :  { %2912 = vperm.xlu1 %5999, %v5124_v26   ;;  %v6761_v25 = vpop.permute.xlu0 %1150  ;;  %v5204_v26 = vld [vmem:[%s7551_s9 + $0x228] sm:$0xff] }
  0xd3   :  { %2907 = vperm.xlu0 %5998, %v5123_v28   ;;  %v5203_v28 = vld [vmem:[%s7551_s9 + $0x220] sm:$0xff] }
  0xd6   :  { %2922 = vperm.xlu1 %5999, %v5126_v32   ;;  %v6008_v32 = vld [vmem:[%s7550_s8] sm:$0xff]  }
  0xd7   :  { %2917 = vperm.xlu0 %5998, %v5125_v33   ;;  %v5206_v33 = vld [vmem:[%s7551_s9 + $0x238] sm:$0xff]  ;;  %5563 = vmatprep.mubr.msk.bf16.mxu1 %vm462_vm4, %v6008_v32 }
  0xda   :  { %2932 = vperm.xlu1 %5999, %v5128_v37   ;;  %v6776_v37 = vpop.permute.xlu1 %1165 }
  0xdb   :  { %2927 = vperm.xlu0 %5998, %v5127_v39   ;;  %v5205_v39 = vld [vmem:[%s7551_s9 + $0x230] sm:$0xff] }
  0xde   :  { %3073 = vperm.xlu1 %5999, %v5140_v40   ;;  %v6781_v40 = vpop.permute.xlu0 %1160 }
  0xdf   :  { %3068 = vperm.xlu0 %5998, %v5139_v44   ;;  %v5224_v44 = vld [vmem:[%s7551_s9 + $0x248] sm:$0xff] }
  0xe2   :  { %3215 = vperm.xlu1 %5999, %v5145_v46   ;;  %v5223_v46 = vld [vmem:[%s7551_s9 + $0x240] sm:$0xff] }
  0xe3   :  { %3156 = vperm.xlu0 %5998, %v5147_v48   ;;  %v6789_v48 = vpop.permute.xlu1 %1175 }
  0xe6   :  { %3463 = vperm.xlu1 %5999, %v5184_v54   ;;  %v6791_v54 = vpop.permute.xlu0 %1170 }
  0xe7   :  { %3458 = vperm.xlu0 %5998, %v5183_v55   ;;  %v5226_v55 = vld [vmem:[%s7551_s9 + $0x258] sm:$0xff] }
  0xea   :  { %3473 = vperm.xlu1 %5999, %v5186_v56   ;;  %v5225_v56 = vld [vmem:[%s7551_s9 + $0x250] sm:$0xff] }
  0xeb   :  { %3468 = vperm.xlu0 %5998, %v5185_v60   ;;  %v5228_v60 = vld [vmem:[%s7551_s9 + $0x268] sm:$0xff] }
  0xee   :  { %3483 = vperm.xlu1 %5999, %v5188_v0   ;;  %v6802_v0 = vpop.permute.xlu1 %1328 }
  0xef   :  { %3478 = vperm.xlu0 %5998, %v5187_v1   ;;  %7558 = vst [vmem:[#allocation9_spill] sm:$0xff] %v6802_v0  ;;  %v5227_v1 = vld [vmem:[%s7551_s9 + $0x260] sm:$0xff] }
  0xf2   :  { %3493 = vperm.xlu1 %5999, %v5190_v6   ;;  %v6807_v6 = vpop.permute.xlu0 %1323 }
  0xf3   :  { %3488 = vperm.xlu0 %5998, %v5189_v7   ;;  %7559 = vst [vmem:[#allocation10_spill] sm:$0xff] %v6807_v6  ;;  %v5230_v7 = vld [vmem:[%s7551_s9 + $0x278] sm:$0xff] }
  0xf6   :  { %3557 = vperm.xlu1 %5999, %v5200_v10   ;;  %v5229_v10 = vld [vmem:[%s7551_s9 + $0x270] sm:$0xff] }
  0xf7   :  { %3552 = vperm.xlu0 %5998, %v5199_v12   ;;  %v6815_v12 = vpop.permute.xlu1 %1338 }
  0xf8   :  { %7560 = vst [vmem:[#allocation11_spill] sm:$0xff] %v6815_v12 }
  0xfa   :  { %3567 = vperm.xlu1 %5999, %v5202_v18   ;;  %v6817_v18 = vpop.permute.xlu0 %1333 }
  0xfb   :  { %3562 = vperm.xlu0 %5998, %v5201_v19   ;;  %7561 = vst [vmem:[#allocation12_spill] sm:$0xff] %v6817_v18  ;;  %v5148_v19 = vld [vmem:[%s7544_s2 + $0x28] sm:$0xff]  ;;  %v6828_v32 = vpop.permute.xlu1 %1348 }
  0xfc   :  { %7562 = vst [vmem:[#allocation13_spill] sm:$0xff] %v6828_v32 }
  0xfe   :  { %3577 = vperm.xlu1 %5999, %v5204_v26   ;;  %v5241_v26 = vld [vmem:[%s7553_s11 + $0x40] sm:$0xff] }
  0xff   :  { %3572 = vperm.xlu0 %5998, %v5203_v28   ;;  %v5242_v28 = vld [vmem:[%s7553_s11 + $0x48] sm:$0xff] }
 0x102   :  { %3587 = vperm.xlu1 %5999, %v5206_v33   ;;  %v5146_v33 = vld [vmem:[%s7545_s3 + $0x28] sm:$0xff] }
 0x103   :  { %3582 = vperm.xlu0 %5998, %v5205_v39   ;;  %v6833_v39 = vpop.permute.xlu0 %1343 }
 0x104   :  { %7563 = vst [vmem:[#allocation14_spill] sm:$0xff] %v6833_v39 }
 0x106   :  { %3740 = vperm.xlu1 %5999, %v5224_v44   ;;  %v5278_v44 = vld [vmem:[%s7549_s7 + $0x148] sm:$0xff] }
 0x107   :  { %3735 = vperm.xlu0 %5998, %v5223_v46   ;;  %v5277_v46 = vld [vmem:[%s7549_s7 + $0x140] sm:$0xff] }
 0x10a   :  { %3750 = vperm.xlu1 %5999, %v5226_v55   ;;  %v6841_v55 = vpop.permute.xlu1 %1358 }
 0x10b   :  { %3745 = vperm.xlu0 %5998, %v5225_v56   ;;  %7564 = vst [vmem:[#allocation15_spill] sm:$0xff] %v6841_v55  ;;  %v6843_v56 = vpop.permute.xlu0 %1353 }
 0x10c   :  { %7565 = vst [vmem:[#allocation16_spill] sm:$0xff] %v6843_v56 }
 0x10e   :  { %3760 = vperm.xlu1 %5999, %v5228_v60   ;;  %v5280_v60 = vld [vmem:[%s7549_s7 + $0x158] sm:$0xff] }
 0x10f   :  { %3755 = vperm.xlu0 %5998, %v5227_v1   ;;  %v5279_v1 = vld [vmem:[%s7549_s7 + $0x150] sm:$0xff] }
 0x112   :  { %3770 = vperm.xlu1 %5999, %v5230_v7   ;;  %v5282_v7 = vld [vmem:[%s7549_s7 + $0x168] sm:$0xff] }
 0x113   :  { %3765 = vperm.xlu0 %5998, %v5229_v10   ;;  %v6854_v10 = vpop.permute.xlu1 %1499 }
 0x114   :  { %7566 = vst [vmem:[#allocation17_spill] sm:$0xff] %v6854_v10 }
 0x116   :  { %3161 = vperm.xlu1 %5999, %v5148_v19   ;;  %v5281_v19 = vld [vmem:[%s7549_s7 + $0x160] sm:$0xff] }
 0x117   :  { %3906 = vperm.xlu0 %5998, %v5241_v26   ;;  %v6859_v26 = vpop.permute.xlu0 %1494 }
 0x118   :  { %7567 = vst [vmem:[#allocation18_spill] sm:$0xff] %v6859_v26 }
 0x11a   :  { %3911 = vperm.xlu1 %5999, %v5242_v28   ;;  %v5284_v28 = vld [vmem:[%s7549_s7 + $0x178] sm:$0xff] }
 0x11b   :  { %3220 = vperm.xlu0 %5998, %v5146_v33   ;;  %v5283_v33 = vld [vmem:[%s7549_s7 + $0x170] sm:$0xff] }
 0x11e   :  { %4200 = vperm.xlu1 %5999, %v5278_v44   ;;  %v6867_v44 = vpop.permute.xlu1 %1640 }
 0x11f   :  { %4195 = vperm.xlu0 %5998, %v5277_v46   ;;  %7568 = vst [vmem:[#allocation19_spill] sm:$0xff] %v6867_v44  ;;  %v6869_v46 = vpop.permute.xlu0 %1581  ;;  %v5298_v44 = vld [vmem:[%s7551_s9 + $0x2a8] sm:$0xff] }
 0x120   :  { %7569 = vst [vmem:[#allocation20_spill] sm:$0xff] %v6869_v46 }
 0x122   :  { %4210 = vperm.xlu1 %5999, %v5280_v60   ;;  %v5294_v60 = vld [vmem:[%s7551_s9 + $0x288] sm:$0xff] }
 0x123   :  { %4205 = vperm.xlu0 %5998, %v5279_v1   ;;  %v5293_v1 = vld [vmem:[%s7551_s9 + $0x280] sm:$0xff] }
 0x126   :  { %4220 = vperm.xlu1 %5999, %v5282_v7   ;;  %v5296_v7 = vld [vmem:[%s7551_s9 + $0x298] sm:$0xff] }
 0x127   :  { %4215 = vperm.xlu0 %5998, %v5281_v19   ;;  %v6880_v19 = vpop.permute.xlu1 %1888 }
 0x128   :  { %7570 = vst [vmem:[#allocation21_spill] sm:$0xff] %v6880_v19 }
 0x12a   :  { %4230 = vperm.xlu1 %5999, %v5284_v28   ;;  %v5295_v28 = vld [vmem:[%s7551_s9 + $0x290] sm:$0xff] }
 0x12b   :  { %4225 = vperm.xlu0 %5998, %v5283_v33   ;;  %v6885_v33 = vpop.permute.xlu0 %1883 }
 0x12c   :  { %7571 = vst [vmem:[#allocation22_spill] sm:$0xff] %v6885_v33  ;;  %v5300_v33 = vld [vmem:[%s7551_s9 + $0x2b8] sm:$0xff] }
 0x12e   :  { %4294 = vperm.xlu1 %5999, %v5294_v60   ;;  %v5297_v60 = vld [vmem:[%s7551_s9 + $0x2a0] sm:$0xff] }
 0x12f   :  { %4289 = vperm.xlu0 %5998, %v5293_v1   ;;  %v6893_v1 = vpop.permute.xlu1 %1898  ;;  %v6895_v19 = vpop.permute.xlu0 %1893 }
 0x130   :  { %7572 = vst [vmem:[#allocation23_spill] sm:$0xff] %v6893_v1  ;;  %7573 = vst [vmem:[#allocation24_spill] sm:$0xff] %v6895_v19  ;;  %v5320_v1 = vld [vmem:[%s7551_s9 + $0x2d8] sm:$0xff] }
 0x132   :  { %4304 = vperm.xlu1 %5999, %v5296_v7   ;;  %v5299_v7 = vld [vmem:[%s7551_s9 + $0x2b0] sm:$0xff] }
 0x133   :  { %4299 = vperm.xlu0 %5998, %v5295_v28   ;;  %v5318_v28 = vld [vmem:[%s7551_s9 + $0x2c8] sm:$0xff]  ;;  %v6906_v46 = vpop.permute.xlu1 %1908 }
 0x134   :  { %7574 = vst [vmem:[#allocation25_spill] sm:$0xff] %v6906_v46 }
 0x136   :  { %4314 = vperm.xlu1 %5999, %v5298_v44   ;;  %v5317_v44 = vld [vmem:[%s7551_s9 + $0x2c0] sm:$0xff] }
 0x137   :  { %4309 = vperm.xlu0 %5998, %v5297_v60   ;;  %v6911_v60 = vpop.permute.xlu0 %1903 }
 0x138   :  { %7575 = vst [vmem:[#allocation26_spill] sm:$0xff] %v6911_v60  ;;  %v5322_v60 = vld [vmem:[%s7551_s9 + $0x2e8] sm:$0xff] }
 0x13a   :  { %4324 = vperm.xlu1 %5999, %v5300_v33   ;;  %v5319_v33 = vld [vmem:[%s7551_s9 + $0x2d0] sm:$0xff] }
 0x13b   :  { %4319 = vperm.xlu0 %5998, %v5299_v7   ;;  %v6919_v7 = vpop.permute.xlu1 %1918  ;;  %v6921_v46 = vpop.permute.xlu0 %1913 }
 0x13c   :  { %7576 = vst [vmem:[#allocation27_spill] sm:$0xff] %v6919_v7  ;;  %7577 = vst [vmem:[#allocation28_spill] sm:$0xff] %v6921_v46  ;;  %v5336_v7 = vld [vmem:[%s7553_s11 + $0x58] sm:$0xff] }
 0x13e   :  { %4477 = vperm.xlu1 %5999, %v5318_v28   ;;  %v5321_v28 = vld [vmem:[%s7551_s9 + $0x2e0] sm:$0xff] }
 0x13f   :  { %4472 = vperm.xlu0 %5998, %v5317_v44   ;;  %v5324_v44 = vld [vmem:[%s7551_s9 + $0x2f8] sm:$0xff]  ;;  %v6932_v19 = vpop.permute.xlu1 %1982 }
 0x140   :  { %7578 = vst [vmem:[#allocation29_spill] sm:$0xff] %v6932_v19 }
 0x142   :  { %4487 = vperm.xlu1 %5999, %v5320_v1   ;;  %v5323_v1 = vld [vmem:[%s7551_s9 + $0x2f0] sm:$0xff]  ;;  %s4793_s9 = sshll.u32 %s6180_s18, 4  ;;  %s4794_s9 = int_to_ptr.vmem [resolvable:$true] %s4793_s9 }
 0x143   :  { %4482 = vperm.xlu0 %5998, %v5319_v33   ;;  %v6937_v33 = vpop.permute.xlu0 %1977  ;;  %p6134_p1 = scmp.lt.s32.totalorder %s4794_s9, %s4794_s9 }
 0x144   :  { %7579 = vst [vmem:[#allocation30_spill] sm:$0xff] %v6937_v33 }
 0x146   :  { %4497 = vperm.xlu1 %5999, %v5322_v60   ;;  %v5335_v60 = vld [vmem:[%s7553_s11 + $0x50] sm:$0xff]  ;;  %s6133_s11 = scalar_lea.vmem %s4794_s9, 32 }
 0x147   :  { %4492 = vperm.xlu0 %5998, %v5321_v28   ;;  %v6945_v28 = vpop.permute.xlu1 %1992  ;;  %v6947_v19 = vpop.permute.xlu0 %1987 }
 0x148   :  { %7580 = vst [vmem:[#allocation31_spill] sm:$0xff] %v6945_v28  ;;  %7581 = vst [vmem:[#allocation32_spill] sm:$0xff] %v6947_v19 }
 0x14a   :  { %4507 = vperm.xlu1 %5999, %v5324_v44  }
 0x14b   :  { %4502 = vperm.xlu0 %5998, %v5323_v1  }
 0x14e   :  { %4648 = vperm.xlu1 %5999, %v5336_v7  }
 0x14f   :  { %4643 = vperm.xlu0 %5998, %v5335_v60  }
 0x165   :  { %v5549_v46 = vpop.f32.mrb[0].mxu0 }
 0x166   :  { %v352_v24 = vadd.f32 %v5549_v46, %v6518_v31  ;;  %v271_v33 = vpop.f32.mrb[1].mxu0 }
 0x167   :  { %v350_v44 = vadd.f32 %v6485_v13, %v271_v33  ;;  %v5550_v1 = vpop.f32.mrb[2].mxu0 }
 0x168   :  { %v368_v10 = vmul.f32 0.01, %v352_v24  ;;  %v353_v26 = vadd.f32 %v5550_v1, %v6513_v29  ;;  %v274_v32 = vpop.f32.mrb[3].mxu0  ;;  %vm360_vm5 = vcmp.ge.f32.partialorder %v352_v24, 0.0 }
 0x169   :  { %v366_v55 = vmul.f32 0.01, %v350_v44  ;;  %v351_v39 = vadd.f32 %v6499_v22, %v274_v32  ;;  %vm358_vm7 = vcmp.ge.f32.partialorder %v350_v44, 0.0 }
 0x16a   :  { %vm361_vm6 = vcmp.ge.f32.partialorder %v353_v26, 0.0  ;;  %v369_v7 = vmul.f32 0.01, %v353_v26  ;;  %v376_v60 = vsel %vm360_vm5, %v352_v24, %v368_v10 }
 0x16b   :  { %v367_v28 = vmul.f32 0.01, %v351_v39  ;;  %vm359_vm8 = vcmp.ge.f32.partialorder %v351_v39, 0.0  ;;  %v374_v46 = vsel %vm358_vm7, %v350_v44, %v366_v55 }
 0x16c   :  { %v377_v19 = vsel %vm361_vm6, %v353_v26, %v369_v7 }
 0x16d   :  { %v5553_v31 = vpop.f32.mrb[4].mxu0  ;;  %v375_v56 = vsel %vm359_vm8, %v351_v39, %v367_v28  ;;  %v391_v13 = vpack.c.bf16 %v377_v19, %v376_v60 }
 0x16e   :  { %v356_v33 = vadd.f32 %v5553_v31, %v6553_v43  ;;  %v287_v0 = vpop.f32.mrb[5].mxu0  ;;  %v390_v29 = vpack.c.bf16 %v375_v56, %v374_v46 }
 0x16f   :  { %v354_v1 = vadd.f32 %v6539_v38, %v287_v0  ;;  %v5554_v12 = vpop.f32.mrb[6].mxu0 }
 0x170   :  { %v372_v6 = vmul.f32 0.01, %v356_v33  ;;  %v357_v22 = vadd.f32 %v5554_v12, %v6550_v42  ;;  %v290_v32 = vpop.f32.mrb[7].mxu0  ;;  %5555 = vmatprep.subr.bf16.mxu1 %v390_v29  ;;  %vm364_vm9 = vcmp.ge.f32.partialorder %v356_v33, 0.0  ;;  %v6010_v12 = vld [vmem:[%s7550_s8 + $0x10] sm:$0xff]  }
 0x171   :  { %v370_v18 = vmul.f32 0.01, %v354_v1  ;;  %v355_v24 = vadd.f32 %v6534_v36, %v290_v32  ;;  %5556 = vmatpush3.bf16.msra.mxu1 %v390_v29  ;;  %vm362_vm10 = vcmp.ge.f32.partialorder %v354_v1, 0.0  ;;  %v6009_v36 = vld [vmem:[%s7550_s8 + $0x8] sm:$0xff]  }
 0x172   :  { %vm365_vm11 = vcmp.ge.f32.partialorder %v357_v22, 0.0  ;;  %v373_v39 = vmul.f32 0.01, %v357_v22  ;;  %5557 = vmatprep.subr.bf16.mxu1 %v391_v13  ;;  %v380_v55 = vsel %vm364_vm9, %v356_v33, %v372_v6  ;;  %v6011_v6 = vld [vmem:[%s7550_s8 + $0x18] sm:$0xff]   ;;  %vm6179_vm9 = vmmov 0  }
 0x173   :  { %vm363_vm12 = vcmp.ge.f32.partialorder %v355_v24, 0.0  ;;  %v371_v43 = vmul.f32 0.01, %v355_v24  ;;  %v378_v38 = vsel %vm362_vm10, %v354_v1, %v370_v18  ;;  %v6012_v18 = vld [vmem:[%s7550_s8 + $0x20] sm:$0xff]  }
 0x174   :  { %v381_v56 = vsel %vm365_vm11, %v357_v22, %v373_v39 }
 0x175   :  { %5558 = vmatpush3.bf16.msra.mxu1 %v391_v13  ;;  %v379_v0 = vsel %vm363_vm12, %v355_v24, %v371_v43  ;;  %v393_v10 = vpack.c.bf16 %v381_v56, %v380_v55 }
 0x176   :  { %v392_v42 = vpack.c.bf16 %v379_v0, %v378_v38 }
 0x178   :  { %5559 = vmatprep.subr.bf16.mxu1 %v392_v42 }
 0x179   :  { %5560 = vmatpush3.bf16.msra.mxu1 %v392_v42 }
 0x17a   :  { %5561 = vmatprep.subr.bf16.mxu1 %v393_v10 }
 0x17d   :  { %5562 = vmatpush3.bf16.msra.mxu1 %v393_v10 }
 0x180   :  { %5564 = vmatmul.mubr.msk.bf16.vlgmr.msra.gmra.mrb[0].mxu1 %vm462_vm4, %v6009_v36 }
 0x181   :  { %5567 = vmatprep.mubr.msk.bf16.mxu1 %vm462_vm4, %v6010_v12 }
 0x188   :  { %5568 = vmatmul.mubr.msk.bf16.gmra.mrb[4].mxu1 %vm462_vm4, %v6011_v6 }
 0x189   :  { %5579 = vmatprep.mubr.msk.bf16.mxu1 %vm462_vm4, %v6012_v18 }
 0x253   :  { %v5565_v26 = vpop.f32.mrb[0].mxu1 }
 0x254   :  { %v518_v19 = vadd.f32 %v5565_v26, %v6579_v53  ;;  %v509_v28 = vpop.f32.mrb[1].mxu1 }
 0x255   :  { %v510_v44 = vadd.f32 %v509_v28, %v6569_v49  ;;  %v5566_v7 = vpop.f32.mrb[2].mxu1  ;;  %v6014_v28 = vld [vmem:[%s7550_s8 + $0x30] sm:$0xff]  }
 0x256   :  { %v550_v60 = vmul.f32 0.01, %v518_v19  ;;  %v521_v31 = vadd.f32 %v5566_v7, %v6577_v52  ;;  %v512_v46 = vpop.f32.mrb[3].mxu1  ;;  %vm542_vm13 = vcmp.ge.f32.partialorder %v518_v19, 0.0  ;;  %v6178_v7 = vmov 0.0  }
 0x257   :  { %v548_v13 = vmul.f32 0.01, %v510_v44  ;;  %v513_v33 = vadd.f32 %v512_v46, %v6564_v47  ;;  %vm540_vm14 = vcmp.ge.f32.partialorder %v510_v44, 0.0  ;;  %5587 = vmatprep.subr.bf16.mxu0 %v6178_v7  ;;  %5595 = vmatprep.mubr.msk.bf16.mxu0 %vm6179_vm9, %v6178_v7 }
 0x258   :  { %vm543_vm15 = vcmp.ge.f32.partialorder %v521_v31, 0.0  ;;  %v551_v29 = vmul.f32 0.01, %v521_v31  ;;  %v558_v22 = vsel %vm542_vm13, %v518_v19, %v550_v60 }
 0x259   :  { %vm541_vm2 = vcmp.ge.f32.partialorder %v513_v33, 0.0  ;;  %v549_v1 = vmul.f32 0.01, %v513_v33  ;;  %v556_v24 = vsel %vm540_vm14, %v510_v44, %v548_v13  ;;  %v6015_v44 = vld [vmem:[%s7550_s8 + $0x38] sm:$0xff]  }
 0x25a   :  { %v559_v32 = vsel %vm543_vm15, %v521_v31, %v551_v29 }
 0x25b   :  { %v5569_v53 = vpop.f32.mrb[4].mxu1  ;;  %v557_v39 = vsel %vm541_vm2, %v513_v33, %v549_v1  ;;  %v574_v49 = vpack.c.bf16 %v559_v32, %v558_v22 }
 0x25c   :  { %v534_v43 = vadd.f32 %v5569_v53, %v6605_v63  ;;  %v525_v55 = vpop.f32.mrb[5].mxu1  ;;  %v573_v52 = vpack.c.bf16 %v557_v39, %v556_v24 }
 0x25d   :  { %v526_v56 = vadd.f32 %v525_v55, %v6595_v59  ;;  %v5570_v38 = vpop.f32.mrb[6].mxu1 }
 0x25e   :  { %v554_v0 = vmul.f32 0.01, %v534_v43  ;;  %v537_v47 = vadd.f32 %v5570_v38, %v6603_v62  ;;  %v528_v10 = vpop.f32.mrb[7].mxu1  ;;  %5571 = vmatprep.subr.bf16.mxu1 %v573_v52  ;;  %vm546_vm5 = vcmp.ge.f32.partialorder %v534_v43, 0.0 }
 0x25f   :  { %v552_v42 = vmul.f32 0.01, %v526_v56  ;;  %v529_v36 = vadd.f32 %v528_v10, %v6590_v57  ;;  %5572 = vmatpush3.bf16.msra.mxu1 %v573_v52  ;;  %vm544_vm6 = vcmp.ge.f32.partialorder %v526_v56, 0.0  ;;  %v6013_v57 = vld [vmem:[%s7550_s8 + $0x28] sm:$0xff]  }
 0x260   :  { %vm547_vm7 = vcmp.ge.f32.partialorder %v537_v47, 0.0  ;;  %v555_v12 = vmul.f32 0.01, %v537_v47  ;;  %5573 = vmatprep.subr.bf16.mxu1 %v574_v49  ;;  %v562_v6 = vsel %vm546_vm5, %v534_v43, %v554_v0 }
 0x261   :  { %vm545_vm8 = vcmp.ge.f32.partialorder %v529_v36, 0.0  ;;  %v553_v63 = vmul.f32 0.01, %v529_v36  ;;  %v560_v59 = vsel %vm544_vm6, %v526_v56, %v552_v42 }
 0x262   :  { %v563_v18 = vsel %vm547_vm7, %v537_v47, %v555_v12 }
 0x263   :  { %5574 = vmatpush3.bf16.msra.mxu1 %v574_v49  ;;  %v561_v26 = vsel %vm545_vm8, %v529_v36, %v553_v63  ;;  %v576_v19 = vpack.c.bf16 %v563_v18, %v562_v6 }
 0x264   :  { %v575_v62 = vpack.c.bf16 %v561_v26, %v560_v59 }
 0x266   :  { %5575 = vmatprep.subr.bf16.mxu1 %v575_v62 }
 0x267   :  { %5576 = vmatpush3.bf16.msra.mxu1 %v575_v62  ;;  %v6018_v62 = vld [vmem:[%s7548_s6 + $0x28] sm:$0xff]  }
 0x268   :  { %5577 = vmatprep.subr.bf16.mxu1 %v576_v19 }
 0x26b   :  { %5578 = vmatpush3.bf16.msra.mxu1 %v576_v19  ;;  %v6017_v19 = vld [vmem:[%s7548_s6 + $0x20] sm:$0xff]  }
 0x26e   :  { %5580 = vmatmul.mubr.msk.bf16.vlgmr.msra.gmra.mrb[8].mxu1 %vm462_vm4, %v6013_v57  ;;  %v6019_v57 = vld [vmem:[%s7548_s6 + $0x30] sm:$0xff]  }
 0x26f   :  { %5583 = vmatprep.mubr.msk.bf16.mxu1 %vm462_vm4, %v6014_v28  ;;  %v6020_v28 = vld [vmem:[%s7548_s6 + $0x38] sm:$0xff]  }
 0x276   :  { %5584 = vmatmul.mubr.msk.bf16.gmra.mrb[12].mxu1 %vm462_vm4, %v6015_v44  ;;  %v6021_v44 = vld [vmem:[%s7547_s5 + $0x20] sm:$0xff]  }
 0x341   :  { %v5581_v60 = vpop.f32.mrb[8].mxu1 }
 0x342   :  { %v701_v31 = vadd.f32 %v5581_v60, %v6631_v9  ;;  %v692_v46 = vpop.f32.mrb[9].mxu1 }
 0x343   :  { %v693_v13 = vadd.f32 %v692_v46, %v6621_v5  ;;  %v5582_v33 = vpop.f32.mrb[10].mxu1 }
 0x344   :  { %v733_v29 = vmul.f32 0.01, %v701_v31  ;;  %v704_v1 = vadd.f32 %v5582_v33, %v6629_v8  ;;  %v695_v22 = vpop.f32.mrb[11].mxu1  ;;  %vm725_vm10 = vcmp.ge.f32.partialorder %v701_v31, 0.0 }
 0x345   :  { %v731_v32 = vmul.f32 0.01, %v693_v13  ;;  %v696_v53 = vadd.f32 %v695_v22, %v6616_v3  ;;  %vm723_vm11 = vcmp.ge.f32.partialorder %v693_v13, 0.0 }
 0x346   :  { %vm726_vm12 = vcmp.ge.f32.partialorder %v704_v1, 0.0  ;;  %v734_v24 = vmul.f32 0.01, %v704_v1  ;;  %v741_v49 = vsel %vm725_vm10, %v701_v31, %v733_v29  ;;  %v47_v29 = vld [vmem:[%s7542_s0 + $0x8] sm:$0xff] }
 0x347   :  { %vm724_vm13 = vcmp.ge.f32.partialorder %v696_v53, 0.0  ;;  %v732_v39 = vmul.f32 0.01, %v696_v53  ;;  %v739_v9 = vsel %vm723_vm11, %v693_v13, %v731_v32  ;;  %v66_v22 = vadd.f32 %v6668_v27, %v47_v29  ;;  %v6027_v29 = vld [vmem:[%s7550_s8 + $0x50] sm:$0xff]  }
 0x348   :  { %v742_v43 = vsel %vm726_vm12, %v704_v1, %v734_v24 }
 0x349   :  { %v750_v55 = vpack.c.bf16 %v742_v43, %v741_v49  ;;  %v740_v52 = vsel %vm724_vm13, %v696_v53, %v732_v39  ;;  %v5585_v5 = vpop.f32.mrb[12].mxu1  ;;  %v78_v53 = vmul.f32 %v6683_v35, %v66_v22  ;;  %v6022_v35 = vld [vmem:[%s7547_s5 + $0x28] sm:$0xff]   ;;  %v6028_v22 = vld [vmem:[%s7550_s8 + $0x58] sm:$0xff]  }
 0x34a   :  { %v749_v56 = vpack.c.bf16 %v740_v52, %v739_v9  ;;  %v717_v38 = vadd.f32 %v5585_v5, %v6657_v21  ;;  %v708_v8 = vpop.f32.mrb[13].mxu1  ;;  %v6023_v52 = vld [vmem:[%s7547_s5 + $0x30] sm:$0xff]   ;;  %v6025_v5 = vld [vmem:[%s7550_s8 + $0x40] sm:$0xff]  }
 0x34b   :  { %v709_v0 = vadd.f32 %v708_v8, %v6647_v17  ;;  %v5586_v47 = vpop.f32.mrb[14].mxu1  ;;  %v82_v24 = vmul.f32 0.9, %v78_v53  ;;  %vm80_vm6 = vcmp.ge.f32.partialorder %v78_v53, 0.0  ;;  %5627 = vmatprep.mubr.msk.bf16.mxu1 %vm462_vm4, %v6025_v5 }
 0x34c   :  { %v737_v10 = vmul.f32 0.01, %v717_v38  ;;  %v720_v3 = vadd.f32 %v5586_v47, %v6655_v20  ;;  %v711_v42 = vpop.f32.mrb[15].mxu1  ;;  %5588 = vmatpush3.bf16.msra.mxu0 %v749_v56  ;;  %vm729_vm14 = vcmp.ge.f32.partialorder %v717_v38, 0.0 }
 0x34d   :  { %v735_v36 = vmul.f32 0.01, %v709_v0  ;;  %v712_v12 = vadd.f32 %v711_v42, %v6642_v14  ;;  %5589 = vmatprep.subr.bf16.mxu0 %v6178_v7  ;;  %vm727_vm15 = vcmp.ge.f32.partialorder %v709_v0, 0.0  ;;  %v6016_v14 = vld [vmem:[%s7552_s10] sm:$0xff]   ;;  %v84_v39 = vsel %vm80_vm6, %v78_v53, %v82_v24 }
 0x34e   :  { %vm730_vm2 = vcmp.ge.f32.partialorder %v720_v3, 0.0  ;;  %v738_v63 = vmul.f32 0.01, %v720_v3  ;;  %v745_v6 = vsel %vm729_vm14, %v717_v38, %v737_v10 }
 0x34f   :  { %vm728_vm5 = vcmp.ge.f32.partialorder %v712_v12, 0.0  ;;  %v736_v21 = vmul.f32 0.01, %v712_v12  ;;  %v743_v17 = vsel %vm727_vm15, %v709_v0, %v735_v36 }
 0x350   :  { %v746_v18 = vsel %vm730_vm2, %v720_v3, %v738_v63  ;;  %5590 = vmatpush3.bf16.msra.mxu0 %v750_v55 }
 0x351   :  { %v752_v59 = vpack.c.bf16 %v746_v18, %v745_v6  ;;  %v744_v26 = vsel %vm728_vm5, %v712_v12, %v736_v21  ;;  %5591 = vmatprep.subr.bf16.mxu0 %v6178_v7 }
 0x352   :  { %v751_v20 = vpack.c.bf16 %v744_v26, %v743_v17 }
 0x354   :  { %5592 = vmatpush3.bf16.msra.mxu0 %v751_v20 }
 0x355   :  { %5593 = vmatprep.subr.bf16.mxu0 %v6178_v7 }
 0x358   :  { %5594 = vmatpush3.bf16.msra.mxu0 %v752_v59 }
 0x359   :  { %5599 = vmatprep.subr.bf16.mxu0 %v6299_v16 }
 0x35b   :  { %5596 = vmatmul.mubr.msk.bf16.vlgmr.msra.gmra.mrb[8].mxu0 %vm462_vm4, %v6016_v14 }
 0x35c   :  { %5600 = vmatpush3.bf16.msra.mxu0 %v6299_v16  ;;  %5601 = vmatprep.mubr.msk.bf16.mxu0 %vm122_vm0, %v6017_v19 }
 0x363   :  { %5602 = vmatmul.mubr.msk.bf16.vlgmr.msra.gmra.mrb[12].mxu0 %vm122_vm0, %v6018_v62 }
 0x364   :  { %5605 = vmatprep.mubr.msk.bf16.mxu0 %vm122_vm0, %v6019_v57 }
 0x36b   :  { %5606 = vmatmul.mubr.msk.bf16.gmra.mrb[16].mxu0 %vm122_vm0, %v6020_v28 }
 0x36c   :  { %5611 = vmatprep.mubr.msk.bf16.mxu0 %vm220_vm1, %v6021_v44 }
 0x42e   :  { %v807_v60 = vpop.f32.mrb[8].mxu0 }
 0x42f   :  { %v808_v31 = vadd.f32 %v807_v60, %v6673_v30  ;;  %v5597_v46 = vpop.f32.mrb[9].mxu0 }
 0x430   :  { %v810_v13 = vpop.f32.mrb[10].mxu0 }
 0x431   :  { %6105 = vtanh.f32 %v808_v31  ;;  %v5598_v33 = vpop.f32.mrb[11].mxu0  ;;  %v811_v49 = vadd.f32 %v810_v13, %v6681_v34  ;;  %v6024_v34 = vld [vmem:[%s7547_s5 + $0x38] sm:$0xff]  }
 0x43b   :  { %v7037_v1 = vpop.eup %6105 }
 0x43c   :  { %v815_v32 = vmul.f32 1.442695, %v7037_v1 }
 0x43e   :  { %6107 = vpow2.f32 %v815_v32  ;;  %v6029_v32 = vld [vmem:[%s7550_s8 + $0x60] sm:$0xff]  }
 0x448   :  { %v6108_v30 = vpop.eup %6107 }
 0x449   :  { %v817_v43 = vmul.f32 %v6108_v30, %v84_v39 }
 0x44b   :  { %v7043_v9 = vadd.f32 %v817_v43, %v811_v49 }
 0x44d   :  { %v828_v55 = vpack.c.bf16 %v7043_v9, %v7043_v9 }
 0x44f   :  { %5986 = vmatprep.subr.msk.bf16.mxu0 %vm233_vm3, %v828_v55  ;;  %v968_v27 = vsel %vm233_vm3, %v828_v55, 0 }
 0x450   :  { %5610 = vmatpush3.bf16.msra.mxu0 %v968_v27 }
 0x451   :  { %5651 = vmatprep.subr.bf16.mxu0 %v6178_v7 }
 0x453   :  { %5612 = vmatmul.mubr.msk.bf16.vlgmr.msra.gmra.mrb[12].mxu0 %vm220_vm1, %v6022_v35 }
 0x454   :  { %5615 = vmatprep.mubr.msk.bf16.mxu0 %vm220_vm1, %v6023_v52 }
 0x45b   :  { %5616 = vmatmul.mubr.msk.bf16.gmra.mrb[16].mxu0 %vm220_vm1, %v6024_v34 }
 0x45c   :  { %5659 = vmatprep.mubr.msk.bf16.mxu0 %vm6179_vm9, %v6178_v7 }
 0x526   :  { %v5613_v56 = vpop.f32.mrb[12].mxu0 }
 0x527   :  { %v1086_v38 = vadd.f32 %v5613_v56, %v6709_v51  ;;  %v1004_v8 = vpop.f32.mrb[13].mxu0 }
 0x528   :  { %v1084_v0 = vadd.f32 %v6699_v45, %v1004_v8  ;;  %v5614_v47 = vpop.f32.mrb[14].mxu0 }
 0x529   :  { %v1102_v10 = vmul.f32 0.01, %v1086_v38  ;;  %v1087_v3 = vadd.f32 %v5614_v47, %v6707_v50  ;;  %v1007_v42 = vpop.f32.mrb[15].mxu0  ;;  %vm1094_vm7 = vcmp.ge.f32.partialorder %v1086_v38, 0.0 }
 0x52a   :  { %v1100_v36 = vmul.f32 0.01, %v1084_v0  ;;  %v1085_v12 = vadd.f32 %v6694_v41, %v1007_v42  ;;  %vm1092_vm8 = vcmp.ge.f32.partialorder %v1084_v0, 0.0 }
 0x52b   :  { %vm1095_vm10 = vcmp.ge.f32.partialorder %v1087_v3, 0.0  ;;  %v1103_v63 = vmul.f32 0.01, %v1087_v3  ;;  %v1110_v6 = vsel %vm1094_vm7, %v1086_v38, %v1102_v10 }
 0x52c   :  { %vm1093_vm11 = vcmp.ge.f32.partialorder %v1085_v12, 0.0  ;;  %v1101_v21 = vmul.f32 0.01, %v1085_v12  ;;  %v1108_v17 = vsel %vm1092_vm8, %v1084_v0, %v1100_v36 }
 0x52d   :  { %v1111_v18 = vsel %vm1095_vm10, %v1087_v3, %v1103_v63 }
 0x52e   :  { %v5617_v51 = vpop.f32.mrb[16].mxu0  ;;  %v1109_v59 = vsel %vm1093_vm11, %v1085_v12, %v1101_v21  ;;  %v1126_v45 = vpack.c.bf16 %v1111_v18, %v1110_v6 }
 0x52f   :  { %v1090_v26 = vadd.f32 %v5617_v51, %v6735_v4  ;;  %v1020_v20 = vpop.f32.mrb[17].mxu0  ;;  %v1125_v50 = vpack.c.bf16 %v1109_v59, %v1108_v17 }
 0x530   :  { %v1088_v14 = vadd.f32 %v6725_v61, %v1020_v20  ;;  %v5618_v19 = vpop.f32.mrb[18].mxu0 }
 0x531   :  { %v1106_v62 = vmul.f32 0.01, %v1090_v26  ;;  %v1091_v41 = vadd.f32 %v5618_v19, %v6733_v2  ;;  %v1023_v57 = vpop.f32.mrb[19].mxu0  ;;  %5619 = vmatprep.subr.bf16.mxu1 %v1125_v50  ;;  %vm1098_vm12 = vcmp.ge.f32.partialorder %v1090_v26, 0.0 }
 0x532   :  { %v1104_v28 = vmul.f32 0.01, %v1088_v14  ;;  %v1089_v44 = vadd.f32 %v6720_v58, %v1023_v57  ;;  %5620 = vmatpush3.bf16.msra.mxu1 %v1125_v50  ;;  %vm1096_vm13 = vcmp.ge.f32.partialorder %v1088_v14, 0.0  ;;  %v6026_v58 = vld [vmem:[%s7550_s8 + $0x48] sm:$0xff]   ;;  %v7582_v50 = vld [vmem:[#allocation12_spill] sm:$0xff] }
 0x533   :  { %vm1099_vm14 = vcmp.ge.f32.partialorder %v1091_v41, 0.0  ;;  %v1107_v60 = vmul.f32 0.01, %v1091_v41  ;;  %5621 = vmatprep.subr.bf16.mxu1 %v1126_v45  ;;  %v1114_v31 = vsel %vm1098_vm12, %v1090_v26, %v1106_v62  ;;  %v6032_v26 = vld [vmem:[%s7550_s8 + $0x78] sm:$0xff]   ;;  %v7583_v62 = vld [vmem:[#allocation10_spill] sm:$0xff] }
 0x534   :  { %vm1097_vm15 = vcmp.ge.f32.partialorder %v1089_v44, 0.0  ;;  %v1105_v4 = vmul.f32 0.01, %v1089_v44  ;;  %v1112_v61 = vsel %vm1096_vm13, %v1088_v14, %v1104_v28 }
 0x535   :  { %v1115_v46 = vsel %vm1099_vm14, %v1091_v41, %v1107_v60 }
 0x536   :  { %5622 = vmatpush3.bf16.msra.mxu1 %v1126_v45  ;;  %v1113_v13 = vsel %vm1097_vm15, %v1089_v44, %v1105_v4  ;;  %v1128_v33 = vpack.c.bf16 %v1115_v46, %v1114_v31  ;;  %v6031_v45 = vld [vmem:[%s7550_s8 + $0x70] sm:$0xff]   ;;  %v7585_v46 = vld [vmem:[#allocation9_spill] sm:$0xff] }
 0x537   :  { %v1127_v2 = vpack.c.bf16 %v1113_v13, %v1112_v61  ;;  %v7584_v44 = vld [vmem:[#allocation11_spill] sm:$0xff] }
 0x539   :  { %5623 = vmatprep.subr.bf16.mxu1 %v1127_v2 }
 0x53a   :  { %5624 = vmatpush3.bf16.msra.mxu1 %v1127_v2 }
 0x53b   :  { %5625 = vmatprep.subr.bf16.mxu1 %v1128_v33 }
 0x53e   :  { %5626 = vmatpush3.bf16.msra.mxu1 %v1128_v33 }
 0x541   :  { %5628 = vmatmul.mubr.msk.bf16.vlgmr.msra.gmra.mrb[16].mxu1 %vm462_vm4, %v6026_v58 }
 0x542   :  { %5631 = vmatprep.mubr.msk.bf16.mxu1 %vm462_vm4, %v6027_v29 }
 0x549   :  { %5632 = vmatmul.mubr.msk.bf16.gmra.mrb[20].mxu1 %vm462_vm4, %v6028_v22 }
 0x54a   :  { %5643 = vmatprep.mubr.msk.bf16.mxu1 %vm462_vm4, %v6029_v32 }
 0x614   :  { %v5629_v53 = vpop.f32.mrb[16].mxu1 }
 0x615   :  { %v1253_v24 = vadd.f32 %v5629_v53, %v6761_v25  ;;  %v1244_v30 = vpop.f32.mrb[17].mxu1 }
 0x616   :  { %v1245_v39 = vadd.f32 %v1244_v30, %v6751_v15  ;;  %v5630_v49 = vpop.f32.mrb[18].mxu1  ;;  %v7586_v30 = vld [vmem:[#allocation16_spill] sm:$0xff] }
 0x617   :  { %v1285_v43 = vmul.f32 0.01, %v1253_v24  ;;  %v1256_v55 = vadd.f32 %v5630_v49, %v6759_v23  ;;  %v1247_v27 = vpop.f32.mrb[19].mxu1  ;;  %vm1277_vm2 = vcmp.ge.f32.partialorder %v1253_v24, 0.0 }
 0x618   :  { %v1283_v35 = vmul.f32 0.01, %v1245_v39  ;;  %v1248_v52 = vadd.f32 %v1247_v27, %v6746_v11  ;;  %vm1275_vm5 = vcmp.ge.f32.partialorder %v1245_v39, 0.0 }
 0x619   :  { %vm1278_vm6 = vcmp.ge.f32.partialorder %v1256_v55, 0.0  ;;  %v1286_v34 = vmul.f32 0.01, %v1256_v55  ;;  %v1293_v56 = vsel %vm1277_vm2, %v1253_v24, %v1285_v43  ;;  %v7587_v43 = vld [vmem:[#allocation14_spill] sm:$0xff] }
 0x61a   :  { %vm1276_vm7 = vcmp.ge.f32.partialorder %v1248_v52, 0.0  ;;  %v1284_v5 = vmul.f32 0.01, %v1248_v52  ;;  %v1291_v8 = vsel %vm1275_vm5, %v1245_v39, %v1283_v35 }
 0x61b   :  { %v1294_v38 = vsel %vm1278_vm6, %v1256_v55, %v1286_v34 }
 0x61c   :  { %v5633_v25 = vpop.f32.mrb[20].mxu1  ;;  %v1292_v0 = vsel %vm1276_vm7, %v1248_v52, %v1284_v5  ;;  %v1309_v15 = vpack.c.bf16 %v1294_v38, %v1293_v56  ;;  %v7588_v52 = vld [vmem:[#allocation15_spill] sm:$0xff]  ;;  %v7589_v38 = vld [vmem:[#allocation13_spill] sm:$0xff] }
 0x61d   :  { %v1269_v47 = vadd.f32 %v5633_v25, %v6791_v54  ;;  %v1260_v10 = vpop.f32.mrb[21].mxu1  ;;  %v1308_v23 = vpack.c.bf16 %v1292_v0, %v1291_v8 }
 0x61e   :  { %v1261_v3 = vadd.f32 %v1260_v10, %v6781_v40  ;;  %v5634_v42 = vpop.f32.mrb[22].mxu1 }
 0x61f   :  { %v1289_v36 = vmul.f32 0.01, %v1269_v47  ;;  %v1272_v11 = vadd.f32 %v5634_v42, %v6789_v48  ;;  %v1263_v12 = vpop.f32.mrb[23].mxu1  ;;  %5635 = vmatprep.subr.bf16.mxu1 %v1308_v23  ;;  %vm1281_vm8 = vcmp.ge.f32.partialorder %v1269_v47, 0.0 }
 0x620   :  { %v1287_v63 = vmul.f32 0.01, %v1261_v3  ;;  %v1264_v21 = vadd.f32 %v1263_v12, %v6776_v37  ;;  %5636 = vmatpush3.bf16.msra.mxu1 %v1308_v23  ;;  %vm1279_vm10 = vcmp.ge.f32.partialorder %v1261_v3, 0.0  ;;  %v6030_v37 = vld [vmem:[%s7550_s8 + $0x68] sm:$0xff]  }
 0x621   :  { %vm1282_vm11 = vcmp.ge.f32.partialorder %v1272_v11, 0.0  ;;  %v1290_v6 = vmul.f32 0.01, %v1272_v11  ;;  %5637 = vmatprep.subr.bf16.mxu1 %v1309_v15  ;;  %v1297_v18 = vsel %vm1281_vm8, %v1269_v47, %v1289_v36  ;;  %v6033_v36 = vld [vmem:[%s7552_s10 + $0x8] sm:$0xff]  }
 0x622   :  { %vm1280_vm12 = vcmp.ge.f32.partialorder %v1264_v21, 0.0  ;;  %v1288_v54 = vmul.f32 0.01, %v1264_v21  ;;  %v1295_v40 = vsel %vm1279_vm10, %v1261_v3, %v1287_v63  ;;  %v6036_v12 = vld [vmem:[%s7548_s6 + $0x48] sm:$0xff]  }
 0x623   :  { %v1298_v51 = vsel %vm1282_vm11, %v1272_v11, %v1290_v6  ;;  %v6035_v11 = vld [vmem:[%s7548_s6 + $0x40] sm:$0xff]  }
 0x624   :  { %5638 = vmatpush3.bf16.msra.mxu1 %v1309_v15  ;;  %v1296_v17 = vsel %vm1280_vm12, %v1264_v21, %v1288_v54  ;;  %v1311_v59 = vpack.c.bf16 %v1298_v51, %v1297_v18  ;;  %v7590_v21 = vld [vmem:[#allocation18_spill] sm:$0xff] }
 0x625   :  { %v1310_v48 = vpack.c.bf16 %v1296_v17, %v1295_v40  ;;  %v1556_v40 = vrot.slane %v7037_v1, 4 }
 0x627   :  { %5639 = vmatprep.subr.bf16.mxu1 %v1310_v48  ;;  %v1557_v17 = vadd.f32 %v7037_v1, %v1556_v40 }
 0x628   :  { %5640 = vmatpush3.bf16.msra.mxu1 %v1310_v48 }
 0x629   :  { %5641 = vmatprep.subr.bf16.mxu1 %v1311_v59 }
 0x62c   :  { %5642 = vmatpush3.bf16.msra.mxu1 %v1311_v59  ;;  %v1558_v59 = vrot.slane %v1557_v17, 2 }
 0x62d   :  { %5663 = vmatprep.subr.bf16.mxu1 %v6178_v7 }
 0x62f   :  { %5644 = vmatmul.mubr.msk.bf16.vlgmr.msra.gmra.mrb[24].mxu1 %vm462_vm4, %v6030_v37 }
 0x630   :  { %5647 = vmatprep.mubr.msk.bf16.mxu1 %vm462_vm4, %v6031_v45 }
 0x637   :  { %5648 = vmatmul.mubr.msk.bf16.gmra.mrb[28].mxu1 %vm462_vm4, %v6032_v26  ;;  %v1559_v26 = vadd.f32 %v1558_v59, %v1557_v17  ;;  %v7599_v59 = vld [vmem:[#allocation28_spill] sm:$0xff] }
 0x638   :  { %5665 = vmatprep.mubr.msk.bf16.mxu1 %vm6179_vm9, %v6178_v7 }
 0x702   :  { %v5645_v20 = vpop.f32.mrb[24].mxu1 }
 0x703   :  { %v1436_v14 = vadd.f32 %v5645_v20, %v7582_v50  ;;  %v1427_v19 = vpop.f32.mrb[25].mxu1 }
 0x704   :  { %v1428_v41 = vadd.f32 %v1427_v19, %v7583_v62  ;;  %v5646_v57 = vpop.f32.mrb[26].mxu1 }
 0x705   :  { %v1468_v28 = vmul.f32 0.01, %v1436_v14  ;;  %v1439_v60 = vadd.f32 %v5646_v57, %v7584_v44  ;;  %v1430_v4 = vpop.f32.mrb[27].mxu1  ;;  %vm1460_vm13 = vcmp.ge.f32.partialorder %v1436_v14, 0.0 }
 0x706   :  { %v1466_v31 = vmul.f32 0.01, %v1428_v41  ;;  %v1431_v61 = vadd.f32 %v1430_v4, %v7585_v46  ;;  %vm1458_vm14 = vcmp.ge.f32.partialorder %v1428_v41, 0.0 }
 0x707   :  { %vm1461_vm15 = vcmp.ge.f32.partialorder %v1439_v60, 0.0  ;;  %v1469_v13 = vmul.f32 0.01, %v1439_v60  ;;  %v1476_v2 = vsel %vm1460_vm13, %v1436_v14, %v1468_v28  ;;  %v1560_v14 = vrot.slane %v1559_v26, 1 }
 0x708   :  { %vm1459_vm2 = vcmp.ge.f32.partialorder %v1431_v61, 0.0  ;;  %v1467_v33 = vmul.f32 0.01, %v1431_v61  ;;  %v1474_v29 = vsel %vm1458_vm14, %v1428_v41, %v1466_v31  ;;  %v7592_v31 = vld [vmem:[#allocation8_spill] sm:$0xff] }
 0x709   :  { %v1477_v58 = vsel %vm1461_vm15, %v1439_v60, %v1469_v13  ;;  %v1561_v41 = vadd.f32 %v1560_v14, %v1559_v26  ;;  %v7591_v60 = vld [vmem:[#allocation17_spill] sm:$0xff]  ;;  %v7600_v26 = vld [vmem:[#allocation26_spill] sm:$0xff] }
 0x70a   :  { %v1486_v22 = vpack.c.bf16 %v1477_v58, %v1476_v2  ;;  %v1475_v32 = vsel %vm1459_vm2, %v1431_v61, %v1467_v33  ;;  %v5649_v53 = vpop.f32.mrb[28].mxu1  ;;  %v6034_v13 = vld [vmem:[%s7546_s4] sm:$0xff]   ;;  %v6037_v33 = vld [vmem:[%s7548_s6 + $0x50] sm:$0xff]   ;;  %v6038_v2 = vld [vmem:[%s7548_s6 + $0x58] sm:$0xff]  }
 0x70b   :  { %v1485_v24 = vpack.c.bf16 %v1475_v32, %v1474_v29  ;;  %v1452_v39 = vadd.f32 %v5649_v53, %v7586_v30  ;;  %v1443_v49 = vpop.f32.mrb[29].mxu1  ;;  %v7593_v29 = vld [vmem:[#allocation20_spill] sm:$0xff] }
 0x70c   :  { %v1444_v55 = vadd.f32 %v1443_v49, %v7587_v43  ;;  %v5650_v27 = vpop.f32.mrb[30].mxu1 }
 0x70d   :  { %v1472_v35 = vmul.f32 0.01, %v1452_v39  ;;  %v1455_v34 = vadd.f32 %v5650_v27, %v7588_v52  ;;  %v1446_v5 = vpop.f32.mrb[31].mxu1  ;;  %5652 = vmatpush3.bf16.msra.mxu0 %v1485_v24  ;;  %vm1464_vm5 = vcmp.ge.f32.partialorder %v1452_v39, 0.0  ;;  %v7594_v24 = vld [vmem:[#allocation19_spill] sm:$0xff] }
 0x70e   :  { %v1470_v56 = vmul.f32 0.01, %v1444_v55  ;;  %v1447_v25 = vadd.f32 %v1446_v5, %v7589_v38  ;;  %5653 = vmatprep.subr.bf16.mxu0 %v6178_v7  ;;  %vm1462_vm6 = vcmp.ge.f32.partialorder %v1444_v55, 0.0  ;;  %v6041_v52 = vld [vmem:[%s7547_s5 + $0x50] sm:$0xff]   ;;  %v6043_v5 = vld [vmem:[%s7550_s8 + $0x80] sm:$0xff]  }
 0x70f   :  { %vm1465_vm7 = vcmp.ge.f32.partialorder %v1455_v34, 0.0  ;;  %v1473_v8 = vmul.f32 0.01, %v1455_v34  ;;  %v1480_v15 = vsel %vm1464_vm5, %v1452_v39, %v1472_v35  ;;  %v6040_v35 = vld [vmem:[%s7547_s5 + $0x48] sm:$0xff]   ;;  %v7595_v38 = vld [vmem:[#allocation24_spill] sm:$0xff] }
 0x710   :  { %vm1463_vm8 = vcmp.ge.f32.partialorder %v1447_v25, 0.0  ;;  %v1471_v0 = vmul.f32 0.01, %v1447_v25  ;;  %v1478_v10 = vsel %vm1462_vm6, %v1444_v55, %v1470_v56 }
 0x711   :  { %v1481_v47 = vsel %vm1465_vm7, %v1455_v34, %v1473_v8  ;;  %5654 = vmatpush3.bf16.msra.mxu0 %v1486_v22  ;;  %v6042_v34 = vld [vmem:[%s7547_s5 + $0x58] sm:$0xff]  }
 0x712   :  { %v1488_v23 = vpack.c.bf16 %v1481_v47, %v1480_v15  ;;  %v1479_v3 = vsel %vm1463_vm8, %v1447_v25, %v1471_v0  ;;  %5655 = vmatprep.subr.bf16.mxu0 %v6178_v7  ;;  %v7596_v0 = vld [vmem:[#allocation22_spill] sm:$0xff] }
 0x713   :  { %v1487_v42 = vpack.c.bf16 %v1479_v3, %v1478_v10 }
 0x715   :  { %5656 = vmatpush3.bf16.msra.mxu0 %v1487_v42 }
 0x716   :  { %5657 = vmatprep.subr.bf16.mxu0 %v6178_v7 }
 0x719   :  { %5658 = vmatpush3.bf16.msra.mxu0 %v1488_v23  ;;  %v7597_v23 = vld [vmem:[#allocation23_spill] sm:$0xff] }
 0x71a   :  { %5669 = vmatprep.subr.bf16.mxu0 %v6299_v16 }
 0x71c   :  { %5660 = vmatmul.mubr.msk.bf16.vlgmr.msra.gmra.mrb[20].mxu0 %vm462_vm4, %v6033_v36 }
 0x71d   :  { %5670 = vmatpush3.bf16.msra.mxu0 %v6299_v16  ;;  %5671 = vmatprep.mubr.msk.bf16.mxu0 %vm122_vm0, %v6035_v11  ;;  %v7598_v11 = vld [vmem:[#allocation21_spill] sm:$0xff] }
 0x724   :  { %5672 = vmatmul.mubr.msk.bf16.vlgmr.msra.gmra.mrb[24].mxu0 %vm122_vm0, %v6036_v12 }
 0x725   :  { %5675 = vmatprep.mubr.msk.bf16.mxu0 %vm122_vm0, %v6037_v33 }
 0x72c   :  { %5676 = vmatmul.mubr.msk.bf16.gmra.mrb[28].mxu0 %vm122_vm0, %v6038_v2 }
 0x7ef   :  { %v1544_v63 = vpop.f32.mrb[20].mxu0 }
 0x7f0   :  { %v1545_v6 = vadd.f32 %v1544_v63, %v7590_v21  ;;  %v5661_v54 = vpop.f32.mrb[21].mxu0 }
 0x7f1   :  { %v1547_v18 = vpop.f32.mrb[22].mxu0 }
 0x7f2   :  { %6109 = vtanh.f32 %v1545_v6  ;;  %v5662_v51 = vpop.f32.mrb[23].mxu0  ;;  %v1548_v4 = vadd.f32 %v1547_v18, %v7591_v60 }
 0x7fc   :  { %v6110_v48 = vpop.eup %6109 }
 0x7fd   :  { %v1552_v37 = vmul.f32 1.442695, %v6110_v48  ;;  %v1563_v45 = vrot.slane %v6110_v48, 4 }
 0x7ff   :  { %6111 = vpow2.f32 %v1552_v37  ;;  %v1564_v20 = vadd.f32 %v6110_v48, %v1563_v45 }
 0x801   :  { %v1565_v50 = vrot.slane %v1564_v20, 2 }
 0x803   :  { %v1566_v19 = vadd.f32 %v1565_v50, %v1564_v20 }
 0x805   :  { %v1567_v62 = vrot.slane %v1566_v19, 1 }
 0x807   :  { %v1568_v57 = vadd.f32 %v1567_v62, %v1566_v19  ;;  %v7601_v19 = vld [vmem:[#allocation27_spill] sm:$0xff] }
 0x809   :  { %v6112_v28 = vpop.eup %6111  ;;  %v7143_v44 = vadd.f32 %v1568_v57, %v1561_v41 }
 0x80a   :  { %v1554_v1 = vmul.f32 %v6112_v28, %v7592_v31  ;;  %v7602_v28 = vld [vmem:[#allocation25_spill] sm:$0xff] }
 0x80c   :  { %v1555_v46 = vadd.f32 %v1554_v1, %v1548_v4 }
 0x80e   :  { %v1570_v61 = vpack.c.bf16 %v1555_v46, %v7043_v9  ;;  %v6039_v9 = vld [vmem:[%s7547_s5 + $0x40] sm:$0xff]  }
 0x80f   :  { %5681 = vmatprep.mubr.msk.bf16.mxu0 %vm220_vm1, %v6039_v9  ;;  %v6044_v9 = vld [vmem:[%s7550_s8 + $0x88] sm:$0xff]  }
 0x810   :  { %5664 = vmatpush3.bf16.msra.mxu1 %v1570_v61 }
 0x813   :  { %5666 = vmatmul.mubr.msk.bf16.vlgmr.msra.gmra.mrb[32].mxu1 %vm122_vm0, %v6034_v13 }
 0x814   :  { %5697 = vmatprep.mubr.msk.bf16.mxu1 %vm462_vm4, %v6043_v5 }
 0x8e6   :  { %v1631_v58 = vpop.f32.mrb[32].mxu1 }
 0x8e7   :  { %v1632_v22 = vadd.f32 %v1631_v58, %v7593_v29  ;;  %v5667_v32 = vpop.f32.mrb[33].mxu1  ;;  %v6045_v58 = vld [vmem:[%s7550_s8 + $0x90] sm:$0xff]   ;;  %v6046_v29 = vld [vmem:[%s7550_s8 + $0x98] sm:$0xff]  }
 0x8e8   :  { %v7165_v53 = vpop.f32.mrb[34].mxu1 }
 0x8e9   :  { %v1648_v30 = vmul.f32 %v7594_v24, %v1632_v22  ;;  %v5668_v39 = vpop.f32.mrb[35].mxu1  ;;  %v6047_v22 = vld [vmem:[%s7550_s8 + $0xa0] sm:$0xff]   ;;  %v7603_v24 = vld [vmem:[#allocation32_spill] sm:$0xff] }
 0x8eb   :  { %vm1650_vm10 = vcmp.ge.f32.partialorder %v1648_v30, 0.0  ;;  %v1652_v49 = vmul.f32 0.9, %v1648_v30 }
 0x8ed   :  { %v7168_v43 = vsel %vm1650_vm10, %v1648_v30, %v1652_v49  ;;  %v1998_v49 = vpop.permute.xlu0 %1997 }
 0x8ee   :  { %v1665_v55 = vpack.c.bf16 %v7168_v43, %v7168_v43 }
 0x8f0   :  { %5987 = vmatprep.subr.msk.bf16.mxu0 %vm233_vm3, %v1665_v55  ;;  %v1805_v27 = vsel %vm233_vm3, %v1665_v55, 0  ;;  %v7604_v55 = vld [vmem:[#allocation30_spill] sm:$0xff] }
 0x8f1   :  { %5680 = vmatpush3.bf16.msra.mxu0 %v1805_v27 }
 0x8f2   :  { %5721 = vmatprep.subr.bf16.mxu0 %v6178_v7 }
 0x8f4   :  { %5682 = vmatmul.mubr.msk.bf16.vlgmr.msra.gmra.mrb[24].mxu0 %vm220_vm1, %v6040_v35 }
 0x8f5   :  { %5685 = vmatprep.mubr.msk.bf16.mxu0 %vm220_vm1, %v6041_v52 }
 0x8fc   :  { %5686 = vmatmul.mubr.msk.bf16.gmra.mrb[28].mxu0 %vm220_vm1, %v6042_v34  ;;  %v7605_v34 = vld [vmem:[#allocation31_spill] sm:$0xff] }
 0x8fd   :  { %5729 = vmatprep.mubr.msk.bf16.mxu0 %vm6179_vm9, %v6178_v7 }
 0x9c7   :  { %v5683_v56 = vpop.f32.mrb[24].mxu0 }
 0x9c8   :  { %v1923_v25 = vadd.f32 %v5683_v56, %v7595_v38  ;;  %v1841_v8 = vpop.f32.mrb[25].mxu0  ;;  %v2003_v38 = vpop.permute.xlu1 %2002 }
 0x9c9   :  { %v1921_v15 = vadd.f32 %v7596_v0, %v1841_v8  ;;  %v5684_v47 = vpop.f32.mrb[26].mxu0  ;;  %v7606_v8 = vld [vmem:[#allocation29_spill] sm:$0xff] }
 0x9ca   :  { %v1939_v10 = vmul.f32 0.01, %v1923_v25  ;;  %v1924_v3 = vadd.f32 %v5684_v47, %v7597_v23  ;;  %v1844_v42 = vpop.f32.mrb[27].mxu0  ;;  %vm1931_vm11 = vcmp.ge.f32.partialorder %v1923_v25, 0.0 }
 0x9cb   :  { %v1937_v36 = vmul.f32 0.01, %v1921_v15  ;;  %v1922_v12 = vadd.f32 %v7598_v11, %v1844_v42  ;;  %vm1929_vm12 = vcmp.ge.f32.partialorder %v1921_v15, 0.0 }
 0x9cc   :  { %vm1932_vm13 = vcmp.ge.f32.partialorder %v1924_v3, 0.0  ;;  %v1940_v63 = vmul.f32 0.01, %v1924_v3  ;;  %v1947_v6 = vsel %vm1931_vm11, %v1923_v25, %v1939_v10 }
 0x9cd   :  { %vm1930_vm14 = vcmp.ge.f32.partialorder %v1922_v12, 0.0  ;;  %v1938_v21 = vmul.f32 0.01, %v1922_v12  ;;  %v1945_v51 = vsel %vm1929_vm12, %v1921_v15, %v1937_v36 }
 0x9ce   :  { %v1948_v54 = vsel %vm1932_vm13, %v1924_v3, %v1940_v63  ;;  %v2008_v3 = vpop.permute.xlu0 %2007 }
 0x9cf   :  { %v5687_v18 = vpop.f32.mrb[28].mxu0  ;;  %v1946_v40 = vsel %vm1930_vm14, %v1922_v12, %v1938_v21  ;;  %v1963_v17 = vpack.c.bf16 %v1948_v54, %v1947_v6  ;;  %v2013_v54 = vpop.permute.xlu1 %2012 }
 0x9d0   :  { %v1927_v48 = vadd.f32 %v5687_v18, %v7599_v59  ;;  %v1857_v37 = vpop.f32.mrb[29].mxu0  ;;  %v1962_v45 = vpack.c.bf16 %v1946_v40, %v1945_v51 }
 0x9d1   :  { %v1925_v20 = vadd.f32 %v7600_v26, %v1857_v37  ;;  %v5688_v50 = vpop.f32.mrb[30].mxu0 }
 0x9d2   :  { %v1943_v14 = vmul.f32 0.01, %v1927_v48  ;;  %v1928_v62 = vadd.f32 %v5688_v50, %v7601_v19  ;;  %v1860_v41 = vpop.f32.mrb[31].mxu0  ;;  %5689 = vmatprep.subr.bf16.mxu1 %v1962_v45  ;;  %vm1935_vm15 = vcmp.ge.f32.partialorder %v1927_v48, 0.0 }
 0x9d3   :  { %v1941_v57 = vmul.f32 0.01, %v1925_v20  ;;  %v1926_v60 = vadd.f32 %v7602_v28, %v1860_v41  ;;  %5690 = vmatpush3.bf16.msra.mxu1 %v1962_v45  ;;  %vm1933_vm2 = vcmp.ge.f32.partialorder %v1925_v20, 0.0  ;;  %v6049_v28 = vld [vmem:[%s7550_s8 + $0xb0] sm:$0xff]  }
 0x9d4   :  { %vm1936_vm5 = vcmp.ge.f32.partialorder %v1928_v62, 0.0  ;;  %v1944_v4 = vmul.f32 0.01, %v1928_v62  ;;  %5691 = vmatprep.subr.bf16.mxu1 %v1963_v17  ;;  %v1951_v1 = vsel %vm1935_vm15, %v1927_v48, %v1943_v14 }
 0x9d5   :  { %vm1934_vm6 = vcmp.ge.f32.partialorder %v1926_v60, 0.0  ;;  %v1942_v31 = vmul.f32 0.01, %v1926_v60  ;;  %v1949_v61 = vsel %vm1933_vm2, %v1925_v20, %v1941_v57  ;;  %v6048_v57 = vld [vmem:[%s7550_s8 + $0xa8] sm:$0xff]  }
 0x9d6   :  { %v1952_v46 = vsel %vm1936_vm5, %v1928_v62, %v1944_v4  ;;  %v2161_v4 = vpop.permute.xlu0 %2160 }
 0x9d7   :  { %5692 = vmatpush3.bf16.msra.mxu1 %v1963_v17  ;;  %v1950_v13 = vsel %vm1934_vm6, %v1926_v60, %v1942_v31  ;;  %v1965_v33 = vpack.c.bf16 %v1952_v46, %v1951_v1  ;;  %v6050_v60 = vld [vmem:[%s7550_s8 + $0xb8] sm:$0xff]   ;;  %v2166_v31 = vpop.permute.xlu1 %2165 }
 0x9d8   :  { %v1964_v2 = vpack.c.bf16 %v1950_v13, %v1949_v61 }
 0x9da   :  { %5693 = vmatprep.subr.bf16.mxu1 %v1964_v2  ;;  %v2171_v1 = vpop.permute.xlu0 %2170 }
 0x9db   :  { %5694 = vmatpush3.bf16.msra.mxu1 %v1964_v2  ;;  %v2176_v46 = vpop.permute.xlu1 %2175 }
 0x9dc   :  { %5695 = vmatprep.subr.bf16.mxu1 %v1965_v33 }
 0x9de   :  { %v2181_v2 = vpop.permute.xlu0 %2180 }
 0x9df   :  { %5696 = vmatpush3.bf16.msra.mxu1 %v1965_v33 }
 0x9e2   :  { %5698 = vmatmul.mubr.msk.bf16.vlgmr.msra.gmra.mrb[36].mxu1 %vm462_vm4, %v6044_v9 }
 0x9e3   :  { %5701 = vmatprep.mubr.msk.bf16.mxu1 %vm462_vm4, %v6045_v58 }
 0x9ea   :  { %5702 = vmatmul.mubr.msk.bf16.gmra.mrb[40].mxu1 %vm462_vm4, %v6046_v29 }
 0x9eb   :  { %5713 = vmatprep.mubr.msk.bf16.mxu1 %vm462_vm4, %v6047_v22 }
 0xab5   :  { %v5699_v32 = vpop.f32.mrb[36].mxu1 }
 0xab6   :  { %v2090_v30 = vadd.f32 %v5699_v32, %v7603_v24  ;;  %v2081_v39 = vpop.f32.mrb[37].mxu1  ;;  %v2186_v24 = vpop.permute.xlu1 %2185 }
 0xab7   :  { %v2082_v27 = vadd.f32 %v2081_v39, %v7604_v55  ;;  %v5700_v35 = vpop.f32.mrb[38].mxu1 }
 0xab8   :  { %v2122_v52 = vmul.f32 0.01, %v2090_v30  ;;  %v2093_v5 = vadd.f32 %v5700_v35, %v7605_v34  ;;  %v2084_v56 = vpop.f32.mrb[39].mxu1  ;;  %vm2114_vm7 = vcmp.ge.f32.partialorder %v2090_v30, 0.0 }
 0xab9   :  { %v2120_v25 = vmul.f32 0.01, %v2082_v27  ;;  %v2085_v0 = vadd.f32 %v2084_v56, %v7606_v8  ;;  %vm2112_vm8 = vcmp.ge.f32.partialorder %v2082_v27, 0.0 }
 0xaba   :  { %vm2115_vm10 = vcmp.ge.f32.partialorder %v2093_v5, 0.0  ;;  %v2123_v15 = vmul.f32 0.01, %v2093_v5  ;;  %v2130_v10 = vsel %vm2114_vm7, %v2090_v30, %v2122_v52  ;;  %v2191_v52 = vpop.permute.xlu0 %2190 }
 0xabb   :  { %vm2113_vm11 = vcmp.ge.f32.partialorder %v2085_v0, 0.0  ;;  %v2121_v47 = vmul.f32 0.01, %v2085_v0  ;;  %v2128_v36 = vsel %vm2112_vm8, %v2082_v27, %v2120_v25 }
 0xabc   :  { %v2131_v23 = vsel %vm2115_vm10, %v2093_v5, %v2123_v15  ;;  %v2196_v15 = vpop.permute.xlu1 %2195 }
 0xabd   :  { %v5703_v42 = vpop.f32.mrb[40].mxu1  ;;  %v2129_v11 = vsel %vm2113_vm11, %v2085_v0, %v2121_v47  ;;  %v2146_v12 = vpack.c.bf16 %v2131_v23, %v2130_v10 }
 0xabe   :  { %v2106_v63 = vadd.f32 %v5703_v42, %v2008_v3  ;;  %v2097_v21 = vpop.f32.mrb[41].mxu1  ;;  %v2145_v6 = vpack.c.bf16 %v2129_v11, %v2128_v36 }
 0xabf   :  { %v2098_v18 = vadd.f32 %v2097_v21, %v1998_v49  ;;  %v5704_v51 = vpop.f32.mrb[42].mxu1 }
 0xac0   :  { %v2126_v40 = vmul.f32 0.01, %v2106_v63  ;;  %v2109_v17 = vadd.f32 %v5704_v51, %v2013_v54  ;;  %v2100_v59 = vpop.f32.mrb[43].mxu1  ;;  %5705 = vmatprep.subr.bf16.mxu1 %v2145_v6  ;;  %vm2118_vm12 = vcmp.ge.f32.partialorder %v2106_v63, 0.0 }
 0xac1   :  { %v2124_v48 = vmul.f32 0.01, %v2098_v18  ;;  %v2101_v37 = vadd.f32 %v2100_v59, %v2003_v38  ;;  %5706 = vmatpush3.bf16.msra.mxu1 %v2145_v6  ;;  %vm2116_vm13 = vcmp.ge.f32.partialorder %v2098_v18, 0.0  ;;  %v6052_v59 = vld [vmem:[%s7548_s6 + $0x60] sm:$0xff]  }
 0xac2   :  { %vm2119_vm14 = vcmp.ge.f32.partialorder %v2109_v17, 0.0  ;;  %v2127_v45 = vmul.f32 0.01, %v2109_v17  ;;  %5707 = vmatprep.subr.bf16.mxu1 %v2146_v12  ;;  %v2134_v20 = vsel %vm2118_vm12, %v2106_v63, %v2126_v40 }
 0xac3   :  { %vm2117_vm15 = vcmp.ge.f32.partialorder %v2101_v37, 0.0  ;;  %v2125_v26 = vmul.f32 0.01, %v2101_v37  ;;  %v2132_v14 = vsel %vm2116_vm13, %v2098_v18, %v2124_v48  ;;  %v6053_v48 = vld [vmem:[%s7548_s6 + $0x68] sm:$0xff]  }
 0xac4   :  { %v2135_v50 = vsel %vm2119_vm14, %v2109_v17, %v2127_v45  ;;  %v6051_v17 = vld [vmem:[%s7552_s10 + $0x10] sm:$0xff]   ;;  %v6055_v45 = vld [vmem:[%s7548_s6 + $0x78] sm:$0xff]  }
 0xac5   :  { %5708 = vmatpush3.bf16.msra.mxu1 %v2146_v12  ;;  %v2133_v19 = vsel %vm2117_vm15, %v2101_v37, %v2125_v26  ;;  %v2148_v62 = vpack.c.bf16 %v2135_v50, %v2134_v20  ;;  %v6054_v37 = vld [vmem:[%s7548_s6 + $0x70] sm:$0xff]   ;;  %v6056_v26 = vld [vmem:[%s7547_s5 + $0x60] sm:$0xff]   ;;  %v2332_v20 = vpop.permute.xlu0 %2331 }
 0xac6   :  { %v2147_v41 = vpack.c.bf16 %v2133_v19, %v2132_v14 }
 0xac8   :  { %5709 = vmatprep.subr.bf16.mxu1 %v2147_v41 }
 0xac9   :  { %5710 = vmatpush3.bf16.msra.mxu1 %v2147_v41 }
 0xaca   :  { %5711 = vmatprep.subr.bf16.mxu1 %v2148_v62 }
 0xacd   :  { %5712 = vmatpush3.bf16.msra.mxu1 %v2148_v62 }
 0xad0   :  { %5714 = vmatmul.mubr.msk.bf16.vlgmr.msra.gmra.mrb[44].mxu1 %vm462_vm4, %v6048_v57 }
 0xad1   :  { %5717 = vmatprep.mubr.msk.bf16.mxu1 %vm462_vm4, %v6049_v28  ;;  %v1587_v28 = vpop.permute.xlu1 %1586 }
 0xad8   :  { %5718 = vmatmul.mubr.msk.bf16.gmra.mrb[48].mxu1 %vm462_vm4, %v6050_v60  ;;  %v1635_v60 = vadd.f32 %v7165_v53, %v1587_v28 }
 0xba3   :  { %v5715_v61 = vpop.f32.mrb[44].mxu1 }
 0xba4   :  { %v2273_v13 = vadd.f32 %v5715_v61, %v2171_v1  ;;  %v2264_v33 = vpop.f32.mrb[45].mxu1 }
 0xba5   :  { %v2265_v9 = vadd.f32 %v2264_v33, %v2161_v4  ;;  %v5716_v58 = vpop.f32.mrb[46].mxu1 }
 0xba6   :  { %v2305_v29 = vmul.f32 0.01, %v2273_v13  ;;  %v2276_v22 = vadd.f32 %v5716_v58, %v2176_v46  ;;  %v2267_v32 = vpop.f32.mrb[47].mxu1  ;;  %vm2297_vm2 = vcmp.ge.f32.partialorder %v2273_v13, 0.0  ;;  %v1646_v46 = vpop.permute.xlu0 %1645 }
 0xba7   :  { %v2303_v30 = vmul.f32 0.01, %v2265_v9  ;;  %v2268_v39 = vadd.f32 %v2267_v32, %v2166_v31  ;;  %vm2295_vm5 = vcmp.ge.f32.partialorder %v2265_v9, 0.0  ;;  %v1649_v61 = vmul.f32 %v1646_v46, %v1635_v60 }
 0xba8   :  { %vm2298_vm6 = vcmp.ge.f32.partialorder %v2276_v22, 0.0  ;;  %v2306_v49 = vmul.f32 0.01, %v2276_v22  ;;  %v2313_v27 = vsel %vm2297_vm2, %v2273_v13, %v2305_v29 }
 0xba9   :  { %vm2296_vm7 = vcmp.ge.f32.partialorder %v2268_v39, 0.0  ;;  %v2304_v55 = vmul.f32 0.01, %v2268_v39  ;;  %v2311_v34 = vsel %vm2295_vm5, %v2265_v9, %v2303_v30  ;;  %vm1651_vm13 = vcmp.ge.f32.partialorder %v1649_v61, 0.0 }
 0xbaa   :  { %v2314_v35 = vsel %vm2298_vm6, %v2276_v22, %v2306_v49  ;;  %v2337_v22 = vpop.permute.xlu1 %2336 }
 0xbab   :  { %v2323_v5 = vpack.c.bf16 %v2314_v35, %v2313_v27  ;;  %v2312_v56 = vsel %vm2296_vm7, %v2268_v39, %v2304_v55  ;;  %v5719_v38 = vpop.f32.mrb[48].mxu1  ;;  %v6057_v27 = vld [vmem:[%s7547_s5 + $0x68] sm:$0xff]   ;;  %v6059_v35 = vld [vmem:[%s7547_s5 + $0x78] sm:$0xff]  }
 0xbac   :  { %v2322_v25 = vpack.c.bf16 %v2312_v56, %v2311_v34  ;;  %v2289_v8 = vadd.f32 %v5719_v38, %v2191_v52  ;;  %v2280_v0 = vpop.f32.mrb[49].mxu1  ;;  %v6060_v52 = vld [vmem:[%s7550_s8 + $0xc0] sm:$0xff]   ;;  %v2621_v34 = vpop.permute.xlu0 %2620 }
 0xbad   :  { %v2281_v47 = vadd.f32 %v2280_v0, %v2181_v2  ;;  %v5720_v10 = vpop.f32.mrb[50].mxu1  ;;  %v1653_v2 = vmul.f32 0.9, %v1649_v61  ;;  %5761 = vmatprep.mubr.msk.bf16.mxu1 %vm462_vm4, %v6060_v52 }
 0xbae   :  { %v2309_v23 = vmul.f32 0.01, %v2289_v8  ;;  %v2292_v3 = vadd.f32 %v5720_v10, %v2196_v15  ;;  %v2283_v42 = vpop.f32.mrb[51].mxu1  ;;  %5722 = vmatpush3.bf16.msra.mxu0 %v2322_v25  ;;  %vm2301_vm8 = vcmp.ge.f32.partialorder %v2289_v8, 0.0 }
 0xbaf   :  { %v2307_v36 = vmul.f32 0.01, %v2281_v47  ;;  %v2284_v11 = vadd.f32 %v2283_v42, %v2186_v24  ;;  %5723 = vmatprep.subr.bf16.mxu0 %v6178_v7  ;;  %vm2299_vm10 = vcmp.ge.f32.partialorder %v2281_v47, 0.0  ;;  %v1655_v32 = vsel %vm1651_vm13, %v1649_v61, %v1653_v2  ;;  %v6062_v2 = vld [vmem:[%s7550_s8 + $0xd0] sm:$0xff]  }
 0xbb0   :  { %vm2302_vm11 = vcmp.ge.f32.partialorder %v2292_v3, 0.0  ;;  %v2310_v12 = vmul.f32 0.01, %v2292_v3  ;;  %v2317_v21 = vsel %vm2301_vm8, %v2289_v8, %v2309_v23  ;;  %v2631_v56 = vpop.permute.xlu0 %2630 }
 0xbb1   :  { %vm2300_vm12 = vcmp.ge.f32.partialorder %v2284_v11, 0.0  ;;  %v2308_v63 = vmul.f32 0.01, %v2284_v11  ;;  %v2315_v54 = vsel %vm2299_vm10, %v2281_v47, %v2307_v36 }
 0xbb2   :  { %v2318_v6 = vsel %vm2302_vm11, %v2292_v3, %v2310_v12  ;;  %5724 = vmatpush3.bf16.msra.mxu0 %v2323_v5  ;;  %v2626_v5 = vpop.permute.xlu1 %2625 }
 0xbb3   :  { %v2325_v18 = vpack.c.bf16 %v2318_v6, %v2317_v21  ;;  %v2316_v51 = vsel %vm2300_vm12, %v2284_v11, %v2308_v63  ;;  %5725 = vmatprep.subr.bf16.mxu0 %v6178_v7 }
 0xbb4   :  { %v2324_v40 = vpack.c.bf16 %v2316_v51, %v2315_v54  ;;  %v2641_v15 = vpop.permute.xlu0 %2640 }
 0xbb6   :  { %5726 = vmatpush3.bf16.msra.mxu0 %v2324_v40  ;;  %v2636_v38 = vpop.permute.xlu1 %2635 }
 0xbb7   :  { %5727 = vmatprep.subr.bf16.mxu0 %v6178_v7 }
 0xbba   :  { %5728 = vmatpush3.bf16.msra.mxu0 %v2325_v18  ;;  %v2646_v36 = vpop.permute.xlu1 %2645  ;;  %v2651_v18 = vpop.permute.xlu0 %2650 }
 0xbbb   :  { %5733 = vmatprep.subr.bf16.mxu0 %v6299_v16 }
 0xbbd   :  { %5730 = vmatmul.mubr.msk.bf16.vlgmr.msra.gmra.mrb[32].mxu0 %vm462_vm4, %v6051_v17 }
 0xbbe   :  { %5734 = vmatpush3.bf16.msra.mxu0 %v6299_v16  ;;  %5735 = vmatprep.mubr.msk.bf16.mxu0 %vm122_vm0, %v6052_v59 }
 0xbc5   :  { %5736 = vmatmul.mubr.msk.bf16.vlgmr.msra.gmra.mrb[36].mxu0 %vm122_vm0, %v6053_v48 }
 0xbc6   :  { %5739 = vmatprep.mubr.msk.bf16.mxu0 %vm122_vm0, %v6054_v37 }
 0xbcd   :  { %5740 = vmatmul.mubr.msk.bf16.gmra.mrb[40].mxu0 %vm122_vm0, %v6055_v45 }
 0xbce   :  { %5745 = vmatprep.mubr.msk.bf16.mxu0 %vm220_vm1, %v6056_v26  ;;  %v2656_v26 = vpop.permute.xlu1 %2655 }
 0xc90   :  { %v2381_v50 = vpop.f32.mrb[32].mxu0 }
 0xc91   :  { %v2382_v14 = vadd.f32 %v2381_v50, %v2332_v20  ;;  %v5731_v19 = vpop.f32.mrb[33].mxu0 }
 0xc92   :  { %v2384_v62 = vpop.f32.mrb[34].mxu0 }
 0xc93   :  { %6113 = vtanh.f32 %v2382_v14  ;;  %v5732_v41 = vpop.f32.mrb[35].mxu0  ;;  %v2385_v30 = vadd.f32 %v2384_v62, %v2337_v22  ;;  %v2720_v22 = vpop.permute.xlu1 %2719 }
 0xc9d   :  { %v6114_v57 = vpop.eup %6113 }
 0xc9e   :  { %v2389_v4 = vmul.f32 1.442695, %v6114_v57  ;;  %v3130_v31 = vrot.slane %v6114_v57, 4 }
 0xca0   :  { %6115 = vpow2.f32 %v2389_v4  ;;  %v3131_v1 = vadd.f32 %v6114_v57, %v3130_v31 }
 0xca2   :  { %v3132_v13 = vrot.slane %v3131_v1, 2 }
 0xca4   :  { %v3133_v33 = vadd.f32 %v3132_v13, %v3131_v1 }
 0xca6   :  { %v3134_v9 = vrot.slane %v3133_v33, 1 }
 0xca8   :  { %v3135_v58 = vadd.f32 %v3134_v9, %v3133_v33  ;;  %v6061_v33 = vld [vmem:[%s7550_s8 + $0xc8] sm:$0xff]   ;;  %v6063_v9 = vld [vmem:[%s7550_s8 + $0xd8] sm:$0xff]  }
 0xcaa   :  { %v6116_v29 = vpop.eup %6115  ;;  %v7264_v24 = vadd.f32 %v3135_v58, %v7143_v44  ;;  %v6058_v44 = vld [vmem:[%s7547_s5 + $0x70] sm:$0xff]   ;;  %v6064_v58 = vld [vmem:[%s7550_s8 + $0xe0] sm:$0xff]  }
 0xcab   :  { %v2391_v53 = vmul.f32 %v6116_v29, %v1655_v32  ;;  %v2715_v29 = vpop.permute.xlu0 %2714 }
 0xcad   :  { %v7266_v39 = vadd.f32 %v2391_v53, %v2385_v30  ;;  %v2730_v30 = vpop.permute.xlu1 %2729 }
 0xcaf   :  { %v2402_v49 = vpack.c.bf16 %v7266_v39, %v7266_v39  ;;  %v2725_v32 = vpop.permute.xlu0 %2724 }
 0xcb1   :  { %5988 = vmatprep.subr.msk.bf16.mxu0 %vm233_vm3, %v2402_v49  ;;  %v2542_v55 = vsel %vm233_vm3, %v2402_v49, 0 }
 0xcb2   :  { %5744 = vmatpush3.bf16.msra.mxu0 %v2542_v55 }
 0xcb3   :  { %5785 = vmatprep.subr.bf16.mxu0 %v6178_v7 }
 0xcb5   :  { %5746 = vmatmul.mubr.msk.bf16.vlgmr.msra.gmra.mrb[36].mxu0 %vm220_vm1, %v6057_v27  ;;  %v2735_v27 = vpop.permute.xlu0 %2734 }
 0xcb6   :  { %5749 = vmatprep.mubr.msk.bf16.mxu0 %vm220_vm1, %v6058_v44 }
 0xcbd   :  { %5750 = vmatmul.mubr.msk.bf16.gmra.mrb[40].mxu0 %vm220_vm1, %v6059_v35 }
 0xcbe   :  { %5793 = vmatprep.mubr.msk.bf16.mxu0 %vm6179_vm9, %v6178_v7 }
 0xd88   :  { %v5747_v25 = vpop.f32.mrb[36].mxu0 }
 0xd89   :  { %v2660_v8 = vadd.f32 %v5747_v25, %v2631_v56  ;;  %v2578_v0 = vpop.f32.mrb[37].mxu0  ;;  %v2740_v56 = vpop.permute.xlu1 %2739 }
 0xd8a   :  { %v2658_v47 = vadd.f32 %v2621_v34, %v2578_v0  ;;  %v5748_v10 = vpop.f32.mrb[38].mxu0 }
 0xd8b   :  { %v2676_v23 = vmul.f32 0.01, %v2660_v8  ;;  %v2661_v3 = vadd.f32 %v5748_v10, %v2636_v38  ;;  %v2581_v42 = vpop.f32.mrb[39].mxu0  ;;  %vm2668_vm14 = vcmp.ge.f32.partialorder %v2660_v8, 0.0  ;;  %v2745_v10 = vpop.permute.xlu0 %2744 }
 0xd8c   :  { %v2674_v11 = vmul.f32 0.01, %v2658_v47  ;;  %v2659_v12 = vadd.f32 %v2626_v5, %v2581_v42  ;;  %vm2666_vm15 = vcmp.ge.f32.partialorder %v2658_v47, 0.0 }
 0xd8d   :  { %vm2669_vm2 = vcmp.ge.f32.partialorder %v2661_v3, 0.0  ;;  %v2677_v63 = vmul.f32 0.01, %v2661_v3  ;;  %v2684_v6 = vsel %vm2668_vm14, %v2660_v8, %v2676_v23 }
 0xd8e   :  { %vm2667_vm5 = vcmp.ge.f32.partialorder %v2659_v12, 0.0  ;;  %v2675_v21 = vmul.f32 0.01, %v2659_v12  ;;  %v2682_v40 = vsel %vm2666_vm15, %v2658_v47, %v2674_v11 }
 0xd8f   :  { %v2685_v54 = vsel %vm2669_vm2, %v2661_v3, %v2677_v63 }
 0xd90   :  { %v5751_v51 = vpop.f32.mrb[40].mxu0  ;;  %v2683_v17 = vsel %vm2667_vm5, %v2659_v12, %v2675_v21  ;;  %v2700_v59 = vpack.c.bf16 %v2685_v54, %v2684_v6  ;;  %v2750_v21 = vpop.permute.xlu1 %2749 }
 0xd91   :  { %v2664_v48 = vadd.f32 %v5751_v51, %v2651_v18  ;;  %v2594_v37 = vpop.f32.mrb[41].mxu0  ;;  %v2699_v45 = vpack.c.bf16 %v2683_v17, %v2682_v40 }
 0xd92   :  { %v2662_v20 = vadd.f32 %v2641_v15, %v2594_v37  ;;  %v5752_v50 = vpop.f32.mrb[42].mxu0 }
 0xd93   :  { %v2680_v14 = vmul.f32 0.01, %v2664_v48  ;;  %v2665_v19 = vadd.f32 %v5752_v50, %v2656_v26  ;;  %v2597_v62 = vpop.f32.mrb[43].mxu0  ;;  %5753 = vmatprep.subr.bf16.mxu1 %v2699_v45  ;;  %vm2672_vm6 = vcmp.ge.f32.partialorder %v2664_v48, 0.0 }
 0xd94   :  { %v2678_v41 = vmul.f32 0.01, %v2662_v20  ;;  %v2663_v57 = vadd.f32 %v2646_v36, %v2597_v62  ;;  %5754 = vmatpush3.bf16.msra.mxu1 %v2699_v45  ;;  %vm2670_vm7 = vcmp.ge.f32.partialorder %v2662_v20, 0.0  ;;  %v6065_v62 = vld [vmem:[%s7550_s8 + $0xe8] sm:$0xff]  }
 0xd95   :  { %vm2673_vm8 = vcmp.ge.f32.partialorder %v2665_v19, 0.0  ;;  %v2681_v28 = vmul.f32 0.01, %v2665_v19  ;;  %5755 = vmatprep.subr.bf16.mxu1 %v2700_v59  ;;  %v2688_v4 = vsel %vm2672_vm6, %v2664_v48, %v2680_v14 }
 0xd96   :  { %vm2671_vm10 = vcmp.ge.f32.partialorder %v2663_v57, 0.0  ;;  %v2679_v60 = vmul.f32 0.01, %v2663_v57  ;;  %v2686_v1 = vsel %vm2670_vm7, %v2662_v20, %v2678_v41  ;;  %v6066_v41 = vld [vmem:[%s7550_s8 + $0xf0] sm:$0xff]  }
 0xd97   :  { %v2689_v31 = vsel %vm2673_vm8, %v2665_v19, %v2681_v28  ;;  %v2898_v28 = vpop.permute.xlu0 %2897 }
 0xd98   :  { %5756 = vmatpush3.bf16.msra.mxu1 %v2700_v59  ;;  %v2687_v46 = vsel %vm2671_vm10, %v2663_v57, %v2679_v60  ;;  %v2702_v61 = vpack.c.bf16 %v2689_v31, %v2688_v4  ;;  %v6067_v57 = vld [vmem:[%s7550_s8 + $0xf8] sm:$0xff]   ;;  %v2903_v60 = vpop.permute.xlu1 %2902 }
 0xd99   :  { %v2701_v13 = vpack.c.bf16 %v2687_v46, %v2686_v1 }
 0xd9b   :  { %5757 = vmatprep.subr.bf16.mxu1 %v2701_v13  ;;  %v2908_v4 = vpop.permute.xlu0 %2907 }
 0xd9c   :  { %5758 = vmatpush3.bf16.msra.mxu1 %v2701_v13  ;;  %v2913_v31 = vpop.permute.xlu1 %2912 }
 0xd9d   :  { %5759 = vmatprep.subr.bf16.mxu1 %v2702_v61 }
 0xd9f   :  { %v2918_v13 = vpop.permute.xlu0 %2917 }
 0xda0   :  { %5760 = vmatpush3.bf16.msra.mxu1 %v2702_v61 }
 0xda3   :  { %5762 = vmatmul.mubr.msk.bf16.vlgmr.msra.gmra.mrb[52].mxu1 %vm462_vm4, %v6061_v33 }
 0xda4   :  { %5765 = vmatprep.mubr.msk.bf16.mxu1 %vm462_vm4, %v6062_v2 }
 0xdab   :  { %5766 = vmatmul.mubr.msk.bf16.gmra.mrb[56].mxu1 %vm462_vm4, %v6063_v9 }
 0xdac   :  { %5777 = vmatprep.mubr.msk.bf16.mxu1 %vm462_vm4, %v6064_v58 }
 0xe76   :  { %v5763_v53 = vpop.f32.mrb[52].mxu1 }
 0xe77   :  { %v2827_v49 = vadd.f32 %v5763_v53, %v2725_v32  ;;  %v2818_v55 = vpop.f32.mrb[53].mxu1 }
 0xe78   :  { %v2819_v44 = vadd.f32 %v2818_v55, %v2715_v29  ;;  %v5764_v35 = vpop.f32.mrb[54].mxu1 }
 0xe79   :  { %v2859_v52 = vmul.f32 0.01, %v2827_v49  ;;  %v2830_v34 = vadd.f32 %v5764_v35, %v2730_v30  ;;  %v2821_v5 = vpop.f32.mrb[55].mxu1  ;;  %vm2851_vm11 = vcmp.ge.f32.partialorder %v2827_v49, 0.0 }
 0xe7a   :  { %v2857_v38 = vmul.f32 0.01, %v2819_v44  ;;  %v2822_v25 = vadd.f32 %v2821_v5, %v2720_v22  ;;  %vm2849_vm12 = vcmp.ge.f32.partialorder %v2819_v44, 0.0  ;;  %v2923_v22 = vpop.permute.xlu1 %2922 }
 0xe7b   :  { %vm2852_vm13 = vcmp.ge.f32.partialorder %v2830_v34, 0.0  ;;  %v2860_v8 = vmul.f32 0.01, %v2830_v34  ;;  %v2867_v15 = vsel %vm2851_vm11, %v2827_v49, %v2859_v52 }
 0xe7c   :  { %vm2850_vm14 = vcmp.ge.f32.partialorder %v2822_v25, 0.0  ;;  %v2858_v0 = vmul.f32 0.01, %v2822_v25  ;;  %v2865_v3 = vsel %vm2849_vm12, %v2819_v44, %v2857_v38  ;;  %v2928_v44 = vpop.permute.xlu0 %2927 }
 0xe7d   :  { %v2868_v47 = vsel %vm2852_vm13, %v2830_v34, %v2860_v8 }
 0xe7e   :  { %v5767_v23 = vpop.f32.mrb[56].mxu1  ;;  %v2866_v42 = vsel %vm2850_vm14, %v2822_v25, %v2858_v0  ;;  %v2883_v36 = vpack.c.bf16 %v2868_v47, %v2867_v15  ;;  %v2933_v8 = vpop.permute.xlu1 %2932 }
 0xe7f   :  { %v2843_v11 = vadd.f32 %v5767_v23, %v2745_v10  ;;  %v2834_v12 = vpop.f32.mrb[57].mxu1  ;;  %v2882_v63 = vpack.c.bf16 %v2866_v42, %v2865_v3 }
 0xe80   :  { %v2835_v6 = vadd.f32 %v2834_v12, %v2735_v27  ;;  %v5768_v54 = vpop.f32.mrb[58].mxu1 }
 0xe81   :  { %v2863_v18 = vmul.f32 0.01, %v2843_v11  ;;  %v2846_v51 = vadd.f32 %v5768_v54, %v2750_v21  ;;  %v2837_v40 = vpop.f32.mrb[59].mxu1  ;;  %5769 = vmatprep.subr.bf16.mxu1 %v2882_v63  ;;  %vm2855_vm15 = vcmp.ge.f32.partialorder %v2843_v11, 0.0 }
 0xe82   :  { %v2861_v17 = vmul.f32 0.01, %v2835_v6  ;;  %v2838_v59 = vadd.f32 %v2837_v40, %v2740_v56  ;;  %5770 = vmatpush3.bf16.msra.mxu1 %v2882_v63  ;;  %vm2853_vm2 = vcmp.ge.f32.partialorder %v2835_v6, 0.0  ;;  %v6070_v40 = vld [vmem:[%s7548_s6 + $0x80] sm:$0xff]  }
 0xe83   :  { %vm2856_vm5 = vcmp.ge.f32.partialorder %v2846_v51, 0.0  ;;  %v2864_v48 = vmul.f32 0.01, %v2846_v51  ;;  %5771 = vmatprep.subr.bf16.mxu1 %v2883_v36  ;;  %v2871_v45 = vsel %vm2855_vm15, %v2843_v11, %v2863_v18 }
 0xe84   :  { %vm2854_vm6 = vcmp.ge.f32.partialorder %v2838_v59, 0.0  ;;  %v2862_v37 = vmul.f32 0.01, %v2838_v59  ;;  %v2869_v20 = vsel %vm2853_vm2, %v2835_v6, %v2861_v17  ;;  %v6071_v17 = vld [vmem:[%s7548_s6 + $0x88] sm:$0xff]  }
 0xe85   :  { %v2872_v26 = vsel %vm2856_vm5, %v2846_v51, %v2864_v48  ;;  %v6068_v51 = vld [vmem:[%s7552_s10 + $0x18] sm:$0xff]  }
 0xe86   :  { %5772 = vmatpush3.bf16.msra.mxu1 %v2883_v36  ;;  %v2870_v50 = vsel %vm2854_vm6, %v2838_v59, %v2862_v37  ;;  %v2885_v14 = vpack.c.bf16 %v2872_v26, %v2871_v45  ;;  %v3069_v59 = vpop.permute.xlu0 %3068 }
 0xe87   :  { %v2884_v19 = vpack.c.bf16 %v2870_v50, %v2869_v20 }
 0xe89   :  { %5773 = vmatprep.subr.bf16.mxu1 %v2884_v19 }
 0xe8a   :  { %5774 = vmatpush3.bf16.msra.mxu1 %v2884_v19 }
 0xe8b   :  { %5775 = vmatprep.subr.bf16.mxu1 %v2885_v14 }
 0xe8e   :  { %5776 = vmatpush3.bf16.msra.mxu1 %v2885_v14 }
 0xe8f   :  { %5797 = vmatprep.subr.bf16.mxu1 %v6178_v7 }
 0xe91   :  { %5778 = vmatmul.mubr.msk.bf16.vlgmr.msra.gmra.mrb[60].mxu1 %vm462_vm4, %v6065_v62 }
 0xe92   :  { %5781 = vmatprep.mubr.msk.bf16.mxu1 %vm462_vm4, %v6066_v41 }
 0xe99   :  { %5782 = vmatmul.mubr.msk.bf16.gmra.mrb[64].mxu1 %vm462_vm4, %v6067_v57 }
 0xe9a   :  { %5799 = vmatprep.mubr.msk.bf16.mxu1 %vm6179_vm9, %v6178_v7 }
 0xf64   :  { %v5779_v1 = vpop.f32.mrb[60].mxu1 }
 0xf65   :  { %v3010_v46 = vadd.f32 %v5779_v1, %v2908_v4  ;;  %v3001_v61 = vpop.f32.mrb[61].mxu1 }
 0xf66   :  { %v3002_v33 = vadd.f32 %v3001_v61, %v2898_v28  ;;  %v5780_v2 = vpop.f32.mrb[62].mxu1 }
 0xf67   :  { %v3042_v9 = vmul.f32 0.01, %v3010_v46  ;;  %v3013_v58 = vadd.f32 %v5780_v2, %v2913_v31  ;;  %v3004_v29 = vpop.f32.mrb[63].mxu1  ;;  %vm3034_vm7 = vcmp.ge.f32.partialorder %v3010_v46, 0.0  ;;  %v3074_v31 = vpop.permute.xlu1 %3073  ;;  %v6069_v2 = vld [vmem:[%s7546_s4 + $0x8] sm:$0xff]  }
 0xf68   :  { %v3040_v32 = vmul.f32 0.01, %v3002_v33  ;;  %v3005_v30 = vadd.f32 %v3004_v29, %v2903_v60  ;;  %vm3032_vm8 = vcmp.ge.f32.partialorder %v3002_v33, 0.0 }
 0xf69   :  { %vm3035_vm10 = vcmp.ge.f32.partialorder %v3013_v58, 0.0  ;;  %v3043_v53 = vmul.f32 0.01, %v3013_v58  ;;  %v3050_v55 = vsel %vm3034_vm7, %v3010_v46, %v3042_v9  ;;  %v6072_v9 = vld [vmem:[%s7548_s6 + $0x90] sm:$0xff]  }
 0xf6a   :  { %vm3033_vm11 = vcmp.ge.f32.partialorder %v3005_v30, 0.0  ;;  %v3041_v49 = vmul.f32 0.01, %v3005_v30  ;;  %v3048_v35 = vsel %vm3032_vm8, %v3002_v33, %v3040_v32 }
 0xf6b   :  { %v3051_v27 = vsel %vm3035_vm10, %v3013_v58, %v3043_v53  ;;  %v3216_v32 = vpop.permute.xlu1 %3215 }
 0xf6c   :  { %v3060_v52 = vpack.c.bf16 %v3051_v27, %v3050_v55  ;;  %v3049_v34 = vsel %vm3033_vm11, %v3005_v30, %v3041_v49  ;;  %v5783_v5 = vpop.f32.mrb[64].mxu1 }
 0xf6d   :  { %v3059_v56 = vpack.c.bf16 %v3049_v34, %v3048_v35  ;;  %v3026_v38 = vadd.f32 %v5783_v5, %v2928_v44  ;;  %v3017_v25 = vpop.f32.mrb[65].mxu1  ;;  %v6076_v34 = vld [vmem:[%s7547_s5 + $0x90] sm:$0xff]   ;;  %v6077_v5 = vld [vmem:[%s7547_s5 + $0x98] sm:$0xff]  }
 0xf6e   :  { %v3018_v0 = vadd.f32 %v3017_v25, %v2918_v13  ;;  %v5784_v15 = vpop.f32.mrb[66].mxu1 }
 0xf6f   :  { %v3046_v47 = vmul.f32 0.01, %v3026_v38  ;;  %v3029_v10 = vadd.f32 %v5784_v15, %v2933_v8  ;;  %v3020_v23 = vpop.f32.mrb[67].mxu1  ;;  %5786 = vmatpush3.bf16.msra.mxu0 %v3059_v56  ;;  %vm3038_vm12 = vcmp.ge.f32.partialorder %v3026_v38, 0.0  ;;  %v6078_v56 = vld [vmem:[%s7550_s8 + $0x100] sm:$0xff]   ;;  %v3464_v25 = vpop.permute.xlu1 %3463 }
 0xf70   :  { %v3044_v3 = vmul.f32 0.01, %v3018_v0  ;;  %v3021_v42 = vadd.f32 %v3020_v23, %v2923_v22  ;;  %5787 = vmatprep.subr.bf16.mxu0 %v6178_v7  ;;  %vm3036_vm13 = vcmp.ge.f32.partialorder %v3018_v0, 0.0 }
 0xf71   :  { %vm3039_vm14 = vcmp.ge.f32.partialorder %v3029_v10, 0.0  ;;  %v3047_v36 = vmul.f32 0.01, %v3029_v10  ;;  %v3054_v12 = vsel %vm3038_vm12, %v3026_v38, %v3046_v47 }
 0xf72   :  { %vm3037_vm15 = vcmp.ge.f32.partialorder %v3021_v42, 0.0  ;;  %v3045_v11 = vmul.f32 0.01, %v3021_v42  ;;  %v3052_v21 = vsel %vm3036_vm13, %v3018_v0, %v3044_v3 }
 0xf73   :  { %v3055_v63 = vsel %vm3039_vm14, %v3029_v10, %v3047_v36  ;;  %5788 = vmatpush3.bf16.msra.mxu0 %v3060_v52  ;;  %v6075_v52 = vld [vmem:[%s7547_s5 + $0x88] sm:$0xff]   ;;  %v3474_v0 = vpop.permute.xlu1 %3473 }
 0xf74   :  { %v3062_v6 = vpack.c.bf16 %v3055_v63, %v3054_v12  ;;  %v3053_v54 = vsel %vm3037_vm15, %v3021_v42, %v3045_v11  ;;  %5789 = vmatprep.subr.bf16.mxu0 %v6178_v7 }
 0xf75   :  { %v3061_v18 = vpack.c.bf16 %v3053_v54, %v3052_v21 }
 0xf77   :  { %5790 = vmatpush3.bf16.msra.mxu0 %v3061_v18  ;;  %v3484_v63 = vpop.permute.xlu1 %3483 }
 0xf78   :  { %5791 = vmatprep.subr.bf16.mxu0 %v6178_v7 }
 0xf7b   :  { %5792 = vmatpush3.bf16.msra.mxu0 %v3062_v6 }
 0xf7c   :  { %5803 = vmatprep.subr.bf16.mxu0 %v6299_v16 }
 0xf7e   :  { %5794 = vmatmul.mubr.msk.bf16.vlgmr.msra.gmra.mrb[44].mxu0 %vm462_vm4, %v6068_v51 }
 0xf7f   :  { %5804 = vmatpush3.bf16.msra.mxu0 %v6299_v16  ;;  %5805 = vmatprep.mubr.msk.bf16.mxu0 %vm122_vm0, %v6070_v40 }
 0xf86   :  { %5806 = vmatmul.mubr.msk.bf16.vlgmr.msra.gmra.mrb[48].mxu0 %vm122_vm0, %v6071_v17 }
 0xf87   :  { %5809 = vmatprep.mubr.msk.bf16.mxu0 %vm122_vm0, %v6072_v9 }
0x1051   :  { %v3118_v48 = vpop.f32.mrb[44].mxu0 }
0x1052   :  { %v3119_v37 = vadd.f32 %v3118_v48, %v3069_v59  ;;  %v5795_v45 = vpop.f32.mrb[45].mxu0 }
0x1053   :  { %v3121_v26 = vpop.f32.mrb[46].mxu0 }
0x1054   :  { %6117 = vtanh.f32 %v3119_v37  ;;  %v5796_v20 = vpop.f32.mrb[47].mxu0  ;;  %v3122_v46 = vadd.f32 %v3121_v26, %v3074_v31 }
0x105e   :  { %v6118_v50 = vpop.eup %6117 }
0x105f   :  { %v3126_v14 = vmul.f32 1.442695, %v6118_v50  ;;  %v3137_v19 = vrot.slane %v6118_v50, 4 }
0x1061   :  { %6119 = vpow2.f32 %v3126_v14  ;;  %v3138_v62 = vadd.f32 %v6118_v50, %v3137_v19  ;;  %v3494_v14 = vpop.permute.xlu1 %3493 }
0x1063   :  { %v3139_v41 = vrot.slane %v3138_v62, 2 }
0x1065   :  { %v3140_v57 = vadd.f32 %v3139_v41, %v3138_v62 }
0x1067   :  { %v3141_v28 = vrot.slane %v3140_v57, 1 }
0x1069   :  { %v3142_v60 = vadd.f32 %v3141_v28, %v3140_v57 }
0x106b   :  { %v6120_v4 = vpop.eup %6119  ;;  %v7340_v1 = vadd.f32 %v3142_v60, %v7264_v24  ;;  %v6073_v24 = vld [vmem:[%s7548_s6 + $0x98] sm:$0xff]  }
0x106c   :  { %v3128_v61 = vmul.f32 %v6120_v4, %v7168_v43  ;;  %5810 = vmatmul.mubr.msk.bf16.gmra.mrb[52].mxu0 %vm122_vm0, %v6073_v24  ;;  %v6074_v43 = vld [vmem:[%s7547_s5 + $0x80] sm:$0xff]  }
0x106d   :  { %5815 = vmatprep.mubr.msk.bf16.mxu0 %vm220_vm1, %v6074_v43  ;;  %v6079_v43 = vld [vmem:[%s7550_s8 + $0x108] sm:$0xff]  }
0x106e   :  { %v3129_v13 = vadd.f32 %v3128_v61, %v3122_v46 }
0x1070   :  { %v3144_v33 = vpack.c.bf16 %v3129_v13, %v7266_v39  ;;  %v3157_v39 = vpop.permute.xlu0 %3156 }
0x1072   :  { %5798 = vmatpush3.bf16.msra.mxu1 %v3144_v33 }
0x1074   :  { %v3459_v38 = vpop.permute.xlu0 %3458 }
0x1075   :  { %5800 = vmatmul.mubr.msk.bf16.vlgmr.msra.gmra.mrb[68].mxu1 %vm122_vm0, %v6069_v2 }
0x1076   :  { %5831 = vmatprep.mubr.msk.bf16.mxu1 %vm462_vm4, %v6078_v56 }
0x1078   :  { %v3469_v8 = vpop.permute.xlu0 %3468 }
0x107c   :  { %v3479_v23 = vpop.permute.xlu0 %3478 }
0x1080   :  { %v3489_v17 = vpop.permute.xlu0 %3488 }
0x1148   :  { %v3206_v58 = vpop.f32.mrb[68].mxu1 }
0x1149   :  { %v3207_v29 = vadd.f32 %v3206_v58, %v3157_v39  ;;  %v5801_v22 = vpop.f32.mrb[69].mxu1  ;;  %v6080_v39 = vld [vmem:[%s7550_s8 + $0x110] sm:$0xff]   ;;  %v6081_v58 = vld [vmem:[%s7550_s8 + $0x118] sm:$0xff]  }
0x114a   :  { %v7360_v30 = vpop.f32.mrb[70].mxu1  ;;  %v3553_v22 = vpop.permute.xlu0 %3552 }
0x114b   :  { %v3223_v53 = vmul.f32 %v3216_v32, %v3207_v29  ;;  %v5802_v49 = vpop.f32.mrb[71].mxu1  ;;  %v6082_v29 = vld [vmem:[%s7550_s8 + $0x120] sm:$0xff]   ;;  %v3558_v32 = vpop.permute.xlu1 %3557 }
0x114d   :  { %vm3225_vm2 = vcmp.ge.f32.partialorder %v3223_v53, 0.0  ;;  %v3227_v55 = vmul.f32 0.9, %v3223_v53 }
0x114f   :  { %v7362_v27 = vsel %vm3225_vm2, %v3223_v53, %v3227_v55  ;;  %v3563_v53 = vpop.permute.xlu0 %3562  ;;  %v3568_v49 = vpop.permute.xlu1 %3567 }
0x1150   :  { %v3240_v44 = vpack.c.bf16 %v7362_v27, %v7362_v27 }
0x1152   :  { %5989 = vmatprep.subr.msk.bf16.mxu0 %vm233_vm3, %v3240_v44  ;;  %v3380_v35 = vsel %vm233_vm3, %v3240_v44, 0 }
0x1153   :  { %5814 = vmatpush3.bf16.msra.mxu0 %v3380_v35 }
0x1154   :  { %5855 = vmatprep.subr.bf16.mxu0 %v6178_v7 }
0x1156   :  { %5816 = vmatmul.mubr.msk.bf16.vlgmr.msra.gmra.mrb[48].mxu0 %vm220_vm1, %v6075_v52  ;;  %v3573_v52 = vpop.permute.xlu0 %3572 }
0x1157   :  { %5819 = vmatprep.mubr.msk.bf16.mxu0 %vm220_vm1, %v6076_v34 }
0x115e   :  { %5820 = vmatmul.mubr.msk.bf16.gmra.mrb[52].mxu0 %vm220_vm1, %v6077_v5 }
0x115f   :  { %5863 = vmatprep.mubr.msk.bf16.mxu0 %vm6179_vm9, %v6178_v7 }
0x1229   :  { %v5817_v15 = vpop.f32.mrb[48].mxu0 }
0x122a   :  { %v3498_v47 = vadd.f32 %v5817_v15, %v3469_v8  ;;  %v3416_v10 = vpop.f32.mrb[49].mxu0  ;;  %v3578_v8 = vpop.permute.xlu1 %3577 }
0x122b   :  { %v3496_v3 = vadd.f32 %v3459_v38, %v3416_v10  ;;  %v5818_v42 = vpop.f32.mrb[50].mxu0 }
0x122c   :  { %v3514_v36 = vmul.f32 0.01, %v3498_v47  ;;  %v3499_v11 = vadd.f32 %v5818_v42, %v3474_v0  ;;  %v3419_v12 = vpop.f32.mrb[51].mxu0  ;;  %vm3506_vm5 = vcmp.ge.f32.partialorder %v3498_v47, 0.0  ;;  %v3583_v42 = vpop.permute.xlu0 %3582 }
0x122d   :  { %v3512_v21 = vmul.f32 0.01, %v3496_v3  ;;  %v3497_v6 = vadd.f32 %v3464_v25, %v3419_v12  ;;  %vm3504_vm6 = vcmp.ge.f32.partialorder %v3496_v3, 0.0 }
0x122e   :  { %vm3507_vm7 = vcmp.ge.f32.partialorder %v3499_v11, 0.0  ;;  %v3515_v54 = vmul.f32 0.01, %v3499_v11  ;;  %v3522_v51 = vsel %vm3506_vm5, %v3498_v47, %v3514_v36 }
0x122f   :  { %vm3505_vm8 = vcmp.ge.f32.partialorder %v3497_v6, 0.0  ;;  %v3513_v18 = vmul.f32 0.01, %v3497_v6  ;;  %v3520_v48 = vsel %vm3504_vm6, %v3496_v3, %v3512_v21 }
0x1230   :  { %v3523_v40 = vsel %vm3507_vm7, %v3499_v11, %v3515_v54 }
0x1231   :  { %v5821_v59 = vpop.f32.mrb[52].mxu0  ;;  %v3521_v37 = vsel %vm3505_vm8, %v3497_v6, %v3513_v18  ;;  %v3538_v45 = vpack.c.bf16 %v3523_v40, %v3522_v51  ;;  %v3588_v18 = vpop.permute.xlu1 %3587 }
0x1232   :  { %v3502_v26 = vadd.f32 %v5821_v59, %v3489_v17  ;;  %v3432_v20 = vpop.f32.mrb[53].mxu0  ;;  %v3537_v50 = vpack.c.bf16 %v3521_v37, %v3520_v48 }
0x1233   :  { %v3500_v19 = vadd.f32 %v3479_v23, %v3432_v20  ;;  %v5822_v62 = vpop.f32.mrb[54].mxu0 }
0x1234   :  { %v3518_v41 = vmul.f32 0.01, %v3502_v26  ;;  %v3503_v57 = vadd.f32 %v5822_v62, %v3494_v14  ;;  %v3435_v28 = vpop.f32.mrb[55].mxu0  ;;  %5823 = vmatprep.subr.bf16.mxu1 %v3537_v50  ;;  %vm3510_vm10 = vcmp.ge.f32.partialorder %v3502_v26, 0.0 }
0x1235   :  { %v3516_v60 = vmul.f32 0.01, %v3500_v19  ;;  %v3501_v4 = vadd.f32 %v3484_v63, %v3435_v28  ;;  %5824 = vmatpush3.bf16.msra.mxu1 %v3537_v50  ;;  %vm3508_vm11 = vcmp.ge.f32.partialorder %v3500_v19, 0.0  ;;  %v6083_v28 = vld [vmem:[%s7550_s8 + $0x128] sm:$0xff]  }
0x1236   :  { %vm3511_vm12 = vcmp.ge.f32.partialorder %v3503_v57, 0.0  ;;  %v3519_v31 = vmul.f32 0.01, %v3503_v57  ;;  %5825 = vmatprep.subr.bf16.mxu1 %v3538_v45  ;;  %v3526_v61 = vsel %vm3510_vm10, %v3502_v26, %v3518_v41 }
0x1237   :  { %vm3509_vm13 = vcmp.ge.f32.partialorder %v3501_v4, 0.0  ;;  %v3517_v46 = vmul.f32 0.01, %v3501_v4  ;;  %v3524_v33 = vsel %vm3508_vm11, %v3500_v19, %v3516_v60  ;;  %v6084_v60 = vld [vmem:[%s7550_s8 + $0x130] sm:$0xff]  }
0x1238   :  { %v3527_v13 = vsel %vm3511_vm12, %v3503_v57, %v3519_v31  ;;  %v3736_v31 = vpop.permute.xlu0 %3735 }
0x1239   :  { %5826 = vmatpush3.bf16.msra.mxu1 %v3538_v45  ;;  %v3525_v2 = vsel %vm3509_vm13, %v3501_v4, %v3517_v46  ;;  %v3540_v9 = vpack.c.bf16 %v3527_v13, %v3526_v61  ;;  %v6085_v4 = vld [vmem:[%s7550_s8 + $0x138] sm:$0xff]   ;;  %v3741_v46 = vpop.permute.xlu1 %3740 }
0x123a   :  { %v3539_v24 = vpack.c.bf16 %v3525_v2, %v3524_v33 }
0x123c   :  { %5827 = vmatprep.subr.bf16.mxu1 %v3539_v24  ;;  %v3746_v61 = vpop.permute.xlu0 %3745 }
0x123d   :  { %5828 = vmatpush3.bf16.msra.mxu1 %v3539_v24  ;;  %v3751_v13 = vpop.permute.xlu1 %3750 }
0x123e   :  { %5829 = vmatprep.subr.bf16.mxu1 %v3540_v9 }
0x1240   :  { %v3756_v24 = vpop.permute.xlu0 %3755 }
0x1241   :  { %5830 = vmatpush3.bf16.msra.mxu1 %v3540_v9 }
0x1244   :  { %5832 = vmatmul.mubr.msk.bf16.vlgmr.msra.gmra.mrb[72].mxu1 %vm462_vm4, %v6079_v43 }
0x1245   :  { %5835 = vmatprep.mubr.msk.bf16.mxu1 %vm462_vm4, %v6080_v39 }
0x124c   :  { %5836 = vmatmul.mubr.msk.bf16.gmra.mrb[76].mxu1 %vm462_vm4, %v6081_v58 }
0x124d   :  { %5847 = vmatprep.mubr.msk.bf16.mxu1 %vm462_vm4, %v6082_v29 }
0x1317   :  { %v5833_v55 = vpop.f32.mrb[72].mxu1 }
0x1318   :  { %v3665_v44 = vadd.f32 %v5833_v55, %v3563_v53  ;;  %v3656_v35 = vpop.f32.mrb[73].mxu1 }
0x1319   :  { %v3657_v34 = vadd.f32 %v3656_v35, %v3553_v22  ;;  %v5834_v5 = vpop.f32.mrb[74].mxu1 }
0x131a   :  { %v3697_v56 = vmul.f32 0.01, %v3665_v44  ;;  %v3668_v38 = vadd.f32 %v5834_v5, %v3568_v49  ;;  %v3659_v25 = vpop.f32.mrb[75].mxu1  ;;  %vm3689_vm14 = vcmp.ge.f32.partialorder %v3665_v44, 0.0 }
0x131b   :  { %v3695_v0 = vmul.f32 0.01, %v3657_v34  ;;  %v3660_v15 = vadd.f32 %v3659_v25, %v3558_v32  ;;  %vm3687_vm15 = vcmp.ge.f32.partialorder %v3657_v34, 0.0  ;;  %v3761_v32 = vpop.permute.xlu1 %3760 }
0x131c   :  { %vm3690_vm2 = vcmp.ge.f32.partialorder %v3668_v38, 0.0  ;;  %v3698_v47 = vmul.f32 0.01, %v3668_v38  ;;  %v3705_v23 = vsel %vm3689_vm14, %v3665_v44, %v3697_v56 }
0x131d   :  { %vm3688_vm5 = vcmp.ge.f32.partialorder %v3660_v15, 0.0  ;;  %v3696_v10 = vmul.f32 0.01, %v3660_v15  ;;  %v3703_v11 = vsel %vm3687_vm15, %v3657_v34, %v3695_v0  ;;  %v3766_v34 = vpop.permute.xlu0 %3765 }
0x131e   :  { %v3706_v3 = vsel %vm3690_vm2, %v3668_v38, %v3698_v47 }
0x131f   :  { %v5837_v36 = vpop.f32.mrb[76].mxu1  ;;  %v3704_v12 = vsel %vm3688_vm5, %v3660_v15, %v3696_v10  ;;  %v3721_v63 = vpack.c.bf16 %v3706_v3, %v3705_v23  ;;  %v3771_v47 = vpop.permute.xlu1 %3770 }
0x1320   :  { %v3681_v21 = vadd.f32 %v5837_v36, %v3583_v42  ;;  %v3672_v6 = vpop.f32.mrb[77].mxu1  ;;  %v3720_v54 = vpack.c.bf16 %v3704_v12, %v3703_v11 }
0x1321   :  { %v3673_v51 = vadd.f32 %v3672_v6, %v3573_v52  ;;  %v5838_v40 = vpop.f32.mrb[78].mxu1 }
0x1322   :  { %v3701_v17 = vmul.f32 0.01, %v3681_v21  ;;  %v3684_v59 = vadd.f32 %v5838_v40, %v3588_v18  ;;  %v3675_v48 = vpop.f32.mrb[79].mxu1  ;;  %5839 = vmatprep.subr.bf16.mxu1 %v3720_v54  ;;  %vm3693_vm6 = vcmp.ge.f32.partialorder %v3681_v21, 0.0 }
0x1323   :  { %v3699_v37 = vmul.f32 0.01, %v3673_v51  ;;  %v3676_v45 = vadd.f32 %v3675_v48, %v3578_v8  ;;  %5840 = vmatpush3.bf16.msra.mxu1 %v3720_v54  ;;  %vm3691_vm7 = vcmp.ge.f32.partialorder %v3673_v51, 0.0  ;;  %v6087_v48 = vld [vmem:[%s7548_s6 + $0xa0] sm:$0xff]  }
0x1324   :  { %vm3694_vm8 = vcmp.ge.f32.partialorder %v3684_v59, 0.0  ;;  %v3702_v26 = vmul.f32 0.01, %v3684_v59  ;;  %5841 = vmatprep.subr.bf16.mxu1 %v3721_v63  ;;  %v3709_v50 = vsel %vm3693_vm6, %v3681_v21, %v3701_v17 }
0x1325   :  { %vm3692_vm10 = vcmp.ge.f32.partialorder %v3676_v45, 0.0  ;;  %v3700_v20 = vmul.f32 0.01, %v3676_v45  ;;  %v3707_v19 = vsel %vm3691_vm7, %v3673_v51, %v3699_v37  ;;  %v6088_v37 = vld [vmem:[%s7548_s6 + $0xa8] sm:$0xff]  }
0x1326   :  { %v3710_v14 = vsel %vm3694_vm8, %v3684_v59, %v3702_v26  ;;  %v6086_v59 = vld [vmem:[%s7552_s10 + $0x20] sm:$0xff]  }
0x1327   :  { %5842 = vmatpush3.bf16.msra.mxu1 %v3721_v63  ;;  %v3708_v62 = vsel %vm3692_vm10, %v3676_v45, %v3700_v20  ;;  %v3723_v41 = vpack.c.bf16 %v3710_v14, %v3709_v50  ;;  %v6089_v45 = vld [vmem:[%s7548_s6 + $0xb0] sm:$0xff]   ;;  %v6091_v26 = vld [vmem:[%s7547_s5 + $0xa0] sm:$0xff]   ;;  %v3907_v20 = vpop.permute.xlu0 %3906 }
0x1328   :  { %v3722_v57 = vpack.c.bf16 %v3708_v62, %v3707_v19 }
0x132a   :  { %5843 = vmatprep.subr.bf16.mxu1 %v3722_v57 }
0x132b   :  { %5844 = vmatpush3.bf16.msra.mxu1 %v3722_v57 }
0x132c   :  { %5845 = vmatprep.subr.bf16.mxu1 %v3723_v41 }
0x132f   :  { %5846 = vmatpush3.bf16.msra.mxu1 %v3723_v41 }
0x1332   :  { %5848 = vmatmul.mubr.msk.bf16.vlgmr.msra.gmra.mrb[80].mxu1 %vm462_vm4, %v6083_v28  ;;  %v3162_v28 = vpop.permute.xlu1 %3161 }
0x1333   :  { %5851 = vmatprep.mubr.msk.bf16.mxu1 %vm462_vm4, %v6084_v60  ;;  %v3210_v60 = vadd.f32 %v7360_v30, %v3162_v28 }
0x133a   :  { %5852 = vmatmul.mubr.msk.bf16.gmra.mrb[84].mxu1 %vm462_vm4, %v6085_v4 }
0x1405   :  { %v5849_v33 = vpop.f32.mrb[80].mxu1 }
0x1406   :  { %v3848_v2 = vadd.f32 %v5849_v33, %v3746_v61  ;;  %v3839_v9 = vpop.f32.mrb[81].mxu1  ;;  %v3221_v61 = vpop.permute.xlu0 %3220 }
0x1407   :  { %v3840_v43 = vadd.f32 %v3839_v9, %v3736_v31  ;;  %v5850_v39 = vpop.f32.mrb[82].mxu1 }
0x1408   :  { %v3880_v58 = vmul.f32 0.01, %v3848_v2  ;;  %v3851_v29 = vadd.f32 %v5850_v39, %v3751_v13  ;;  %v3842_v22 = vpop.f32.mrb[83].mxu1  ;;  %vm3872_vm11 = vcmp.ge.f32.partialorder %v3848_v2, 0.0  ;;  %v3224_v13 = vmul.f32 %v3221_v61, %v3210_v60 }
0x1409   :  { %v3878_v53 = vmul.f32 0.01, %v3840_v43  ;;  %v3843_v49 = vadd.f32 %v3842_v22, %v3741_v46  ;;  %vm3870_vm12 = vcmp.ge.f32.partialorder %v3840_v43, 0.0 }
0x140a   :  { %vm3873_vm13 = vcmp.ge.f32.partialorder %v3851_v29, 0.0  ;;  %v3881_v55 = vmul.f32 0.01, %v3851_v29  ;;  %v3888_v35 = vsel %vm3872_vm11, %v3848_v2, %v3880_v58  ;;  %v3228_v9 = vmul.f32 0.9, %v3224_v13  ;;  %v3912_v58 = vpop.permute.xlu1 %3911 }
0x140b   :  { %vm3871_vm14 = vcmp.ge.f32.partialorder %v3843_v49, 0.0  ;;  %v3879_v44 = vmul.f32 0.01, %v3843_v49  ;;  %v3886_v5 = vsel %vm3870_vm12, %v3840_v43, %v3878_v53  ;;  %vm3226_vm7 = vcmp.ge.f32.partialorder %v3224_v13, 0.0 }
0x140c   :  { %v3889_v52 = vsel %vm3873_vm13, %v3851_v29, %v3881_v55  ;;  %v3230_v29 = vsel %vm3226_vm7, %v3224_v13, %v3228_v9  ;;  %v6098_v9 = vld [vmem:[%s7550_s8 + $0x158] sm:$0xff]  }
0x140d   :  { %v3898_v56 = vpack.c.bf16 %v3889_v52, %v3888_v35  ;;  %v3887_v38 = vsel %vm3871_vm14, %v3843_v49, %v3879_v44  ;;  %v5853_v25 = vpop.f32.mrb[84].mxu1  ;;  %v6092_v44 = vld [vmem:[%s7547_s5 + $0xa8] sm:$0xff]   ;;  %v6094_v35 = vld [vmem:[%s7547_s5 + $0xb8] sm:$0xff]   ;;  %v6095_v52 = vld [vmem:[%s7550_s8 + $0x140] sm:$0xff]  }
0x140e   :  { %v3897_v8 = vpack.c.bf16 %v3887_v38, %v3886_v5  ;;  %v3864_v0 = vadd.f32 %v5853_v25, %v3766_v34  ;;  %v3855_v15 = vpop.f32.mrb[85].mxu1  ;;  %5895 = vmatprep.mubr.msk.bf16.mxu1 %vm462_vm4, %v6095_v52  ;;  %v4196_v34 = vpop.permute.xlu0 %4195 }
0x140f   :  { %v3856_v10 = vadd.f32 %v3855_v15, %v3756_v24  ;;  %v5854_v23 = vpop.f32.mrb[86].mxu1  ;;  %v4201_v5 = vpop.permute.xlu1 %4200 }
0x1410   :  { %v3884_v3 = vmul.f32 0.01, %v3864_v0  ;;  %v3867_v42 = vadd.f32 %v5854_v23, %v3771_v47  ;;  %v3858_v36 = vpop.f32.mrb[87].mxu1  ;;  %5856 = vmatpush3.bf16.msra.mxu0 %v3897_v8  ;;  %vm3876_vm15 = vcmp.ge.f32.partialorder %v3864_v0, 0.0 }
0x1411   :  { %v3882_v11 = vmul.f32 0.01, %v3856_v10  ;;  %v3859_v12 = vadd.f32 %v3858_v36, %v3761_v32  ;;  %5857 = vmatprep.subr.bf16.mxu0 %v6178_v7  ;;  %vm3874_vm2 = vcmp.ge.f32.partialorder %v3856_v10, 0.0 }
0x1412   :  { %vm3877_vm5 = vcmp.ge.f32.partialorder %v3867_v42, 0.0  ;;  %v3885_v63 = vmul.f32 0.01, %v3867_v42  ;;  %v3892_v6 = vsel %vm3876_vm15, %v3864_v0, %v3884_v3 }
0x1413   :  { %vm3875_vm6 = vcmp.ge.f32.partialorder %v3859_v12, 0.0  ;;  %v3883_v21 = vmul.f32 0.01, %v3859_v12  ;;  %v3890_v18 = vsel %vm3874_vm2, %v3856_v10, %v3882_v11  ;;  %v4211_v38 = vpop.permute.xlu1 %4210 }
0x1414   :  { %v3893_v54 = vsel %vm3877_vm5, %v3867_v42, %v3885_v63  ;;  %5858 = vmatpush3.bf16.msra.mxu0 %v3898_v56  ;;  %v4206_v56 = vpop.permute.xlu0 %4205 }
0x1415   :  { %v3900_v51 = vpack.c.bf16 %v3893_v54, %v3892_v6  ;;  %v3891_v40 = vsel %vm3875_vm6, %v3859_v12, %v3883_v21  ;;  %5859 = vmatprep.subr.bf16.mxu0 %v6178_v7 }
0x1416   :  { %v3899_v17 = vpack.c.bf16 %v3891_v40, %v3890_v18 }
0x1417   :  { %v4221_v36 = vpop.permute.xlu1 %4220 }
0x1418   :  { %5860 = vmatpush3.bf16.msra.mxu0 %v3899_v17  ;;  %v4216_v15 = vpop.permute.xlu0 %4215 }
0x1419   :  { %5861 = vmatprep.subr.bf16.mxu0 %v6178_v7 }
0x141c   :  { %5862 = vmatpush3.bf16.msra.mxu0 %v3900_v51  ;;  %v4226_v18 = vpop.permute.xlu0 %4225 }
0x141d   :  { %5867 = vmatprep.subr.bf16.mxu0 %v6299_v16 }
0x141f   :  { %5864 = vmatmul.mubr.msk.bf16.vlgmr.msra.gmra.mrb[56].mxu0 %vm462_vm4, %v6086_v59 }
0x1420   :  { %5868 = vmatpush3.bf16.msra.mxu0 %v6299_v16  ;;  %5869 = vmatprep.mubr.msk.bf16.mxu0 %vm122_vm0, %v6087_v48  ;;  %v6090_v16 = vld [vmem:[%s7548_s6 + $0xb8] sm:$0xff]   ;;  %s6129_s6 = scalar_lea.vmem %s4794_s9, 16 }
0x1421   :  { %p6130_p0 = scmp.ne.s32.totalorder %s4794_s9, %s6129_s6  ;;  %p6135_p2 = scmp.lt.s32.totalorder %s6133_s11, %s6129_s6 }
0x1423   :  { %p6136_p3 = por %p6135_p2, %p6134_p1 }
0x1425   :  { %p6137_p4 = pnand %p6136_p3, %p6130_p0 }
0x1427   :  { %5870 = vmatmul.mubr.msk.bf16.vlgmr.msra.gmra.mrb[60].mxu0 %vm122_vm0, %v6088_v37 }
0x1428   :  { %5873 = vmatprep.mubr.msk.bf16.mxu0 %vm122_vm0, %v6089_v45 }
0x142f   :  { %5874 = vmatmul.mubr.msk.bf16.gmra.mrb[64].mxu0 %vm122_vm0, %v6090_v16  ;;  %v4231_v16 = vpop.permute.xlu1 %4230 }
0x1430   :  { %5879 = vmatprep.mubr.msk.bf16.mxu0 %vm220_vm1, %v6091_v26 }
0x14f2   :  { %v3956_v50 = vpop.f32.mrb[56].mxu0 }
0x14f3   :  { %v3957_v14 = vadd.f32 %v3956_v50, %v3907_v20  ;;  %v5865_v19 = vpop.f32.mrb[57].mxu0 }
0x14f4   :  { %v3959_v62 = vpop.f32.mrb[58].mxu0 }
0x14f5   :  { %6121 = vtanh.f32 %v3957_v14  ;;  %v5866_v41 = vpop.f32.mrb[59].mxu0  ;;  %v3960_v32 = vadd.f32 %v3959_v62, %v3912_v58 }
0x14ff   :  { %v6122_v57 = vpop.eup %6121 }
0x1500   :  { %v3964_v4 = vmul.f32 1.442695, %v6122_v57  ;;  %v4705_v31 = vrot.slane %v6122_v57, 4 }
0x1502   :  { %6123 = vpow2.f32 %v3964_v4  ;;  %v4706_v46 = vadd.f32 %v6122_v57, %v4705_v31 }
0x1504   :  { %v4707_v33 = vrot.slane %v4706_v46, 2 }
0x1506   :  { %v4708_v2 = vadd.f32 %v4707_v33, %v4706_v46  ;;  %v6096_v33 = vld [vmem:[%s7550_s8 + $0x148] sm:$0xff]  }
0x1508   :  { %v4709_v24 = vrot.slane %v4708_v2, 1 }
0x150a   :  { %v4710_v43 = vadd.f32 %v4709_v24, %v4708_v2  ;;  %v6097_v2 = vld [vmem:[%s7550_s8 + $0x150] sm:$0xff]   ;;  %v6099_v24 = vld [vmem:[%s7550_s8 + $0x160] sm:$0xff]  }
0x150c   :  { %v6124_v39 = vpop.eup %6123  ;;  %v7446_v22 = vadd.f32 %v4710_v43, %v7340_v1  ;;  %v6093_v1 = vld [vmem:[%s7547_s5 + $0xb0] sm:$0xff]   ;;  %v4290_v43 = vpop.permute.xlu0 %4289 }
0x150d   :  { %v3966_v30 = vmul.f32 %v6124_v39, %v3230_v29  ;;  %v4295_v39 = vpop.permute.xlu1 %4294 }
0x150f   :  { %v7448_v53 = vadd.f32 %v3966_v30, %v3960_v32 }
0x1510   :  { %v4300_v58 = vpop.permute.xlu0 %4299 }
0x1511   :  { %v3977_v49 = vpack.c.bf16 %v7448_v53, %v7448_v53  ;;  %v4305_v29 = vpop.permute.xlu1 %4304 }
0x1513   :  { %5990 = vmatprep.subr.msk.bf16.mxu0 %vm233_vm3, %v3977_v49  ;;  %v4117_v55 = vsel %vm233_vm3, %v3977_v49, 0 }
0x1514   :  { %5878 = vmatpush3.bf16.msra.mxu0 %v4117_v55  ;;  %v4310_v55 = vpop.permute.xlu0 %4309 }
0x1515   :  { %5919 = vmatprep.subr.bf16.mxu0 %v6178_v7 }
0x1517   :  { %5880 = vmatmul.mubr.msk.bf16.vlgmr.msra.gmra.mrb[60].mxu0 %vm220_vm1, %v6092_v44 }
0x1518   :  { %5883 = vmatprep.mubr.msk.bf16.mxu0 %vm220_vm1, %v6093_v1 }
0x151f   :  { %5884 = vmatmul.mubr.msk.bf16.gmra.mrb[64].mxu0 %vm220_vm1, %v6094_v35 }
0x1520   :  { %5927 = vmatprep.mubr.msk.bf16.mxu0 %vm6179_vm9, %v6178_v7 }
0x15ea   :  { %v5881_v25 = vpop.f32.mrb[60].mxu0 }
0x15eb   :  { %v4235_v8 = vadd.f32 %v5881_v25, %v4206_v56  ;;  %v4153_v0 = vpop.f32.mrb[61].mxu0 }
0x15ec   :  { %v4233_v47 = vadd.f32 %v4196_v34, %v4153_v0  ;;  %v5882_v10 = vpop.f32.mrb[62].mxu0 }
0x15ed   :  { %v4251_v23 = vmul.f32 0.01, %v4235_v8  ;;  %v4236_v3 = vadd.f32 %v5882_v10, %v4211_v38  ;;  %v4156_v42 = vpop.f32.mrb[63].mxu0  ;;  %vm4243_vm1 = vcmp.ge.f32.partialorder %v4235_v8, 0.0 }
0x15ee   :  { %v4249_v11 = vmul.f32 0.01, %v4233_v47  ;;  %v4234_v12 = vadd.f32 %v4201_v5, %v4156_v42  ;;  %vm4241_vm3 = vcmp.ge.f32.partialorder %v4233_v47, 0.0  ;;  %v4315_v5 = vpop.permute.xlu1 %4314 }
0x15ef   :  { %vm4244_vm8 = vcmp.ge.f32.partialorder %v4236_v3, 0.0  ;;  %v4252_v63 = vmul.f32 0.01, %v4236_v3  ;;  %v4259_v6 = vsel %vm4243_vm1, %v4235_v8, %v4251_v23 }
0x15f0   :  { %vm4242_vm10 = vcmp.ge.f32.partialorder %v4234_v12, 0.0  ;;  %v4250_v21 = vmul.f32 0.01, %v4234_v12  ;;  %v4257_v40 = vsel %vm4241_vm3, %v4233_v47, %v4249_v11  ;;  %v4320_v47 = vpop.permute.xlu0 %4319 }
0x15f1   :  { %v4260_v54 = vsel %vm4244_vm8, %v4236_v3, %v4252_v63 }
0x15f2   :  { %v5885_v51 = vpop.f32.mrb[64].mxu0  ;;  %v4258_v17 = vsel %vm4242_vm10, %v4234_v12, %v4250_v21  ;;  %v4275_v59 = vpack.c.bf16 %v4260_v54, %v4259_v6  ;;  %v4325_v63 = vpop.permute.xlu1 %4324 }
0x15f3   :  { %v4239_v48 = vadd.f32 %v5885_v51, %v4226_v18  ;;  %v4169_v37 = vpop.f32.mrb[65].mxu0  ;;  %v4274_v45 = vpack.c.bf16 %v4258_v17, %v4257_v40 }
0x15f4   :  { %v4237_v26 = vadd.f32 %v4216_v15, %v4169_v37  ;;  %v5886_v20 = vpop.f32.mrb[66].mxu0 }
0x15f5   :  { %v4255_v50 = vmul.f32 0.01, %v4239_v48  ;;  %v4240_v14 = vadd.f32 %v5886_v20, %v4231_v16  ;;  %v4172_v19 = vpop.f32.mrb[67].mxu0  ;;  %5887 = vmatprep.subr.bf16.mxu1 %v4274_v45  ;;  %vm4247_vm11 = vcmp.ge.f32.partialorder %v4239_v48, 0.0 }
0x15f6   :  { %v4253_v62 = vmul.f32 0.01, %v4237_v26  ;;  %v4238_v41 = vadd.f32 %v4221_v36, %v4172_v19  ;;  %5888 = vmatpush3.bf16.msra.mxu1 %v4274_v45  ;;  %vm4245_vm12 = vcmp.ge.f32.partialorder %v4237_v26, 0.0  ;;  %v6101_v19 = vld [vmem:[%s7550_s8 + $0x170] sm:$0xff]  }
0x15f7   :  { %vm4248_vm13 = vcmp.ge.f32.partialorder %v4240_v14, 0.0  ;;  %v4256_v57 = vmul.f32 0.01, %v4240_v14  ;;  %5889 = vmatprep.subr.bf16.mxu1 %v4275_v59  ;;  %v4263_v60 = vsel %vm4247_vm11, %v4239_v48, %v4255_v50 }
0x15f8   :  { %vm4246_vm14 = vcmp.ge.f32.partialorder %v4238_v41, 0.0  ;;  %v4254_v28 = vmul.f32 0.01, %v4238_v41  ;;  %v4261_v31 = vsel %vm4245_vm12, %v4237_v26, %v4253_v62  ;;  %v6102_v62 = vld [vmem:[%s7550_s8 + $0x178] sm:$0xff]  }
0x15f9   :  { %v4264_v4 = vsel %vm4248_vm13, %v4240_v14, %v4256_v57  ;;  %v6100_v14 = vld [vmem:[%s7550_s8 + $0x168] sm:$0xff]   ;;  %v4478_v57 = vpop.permute.xlu1 %4477 }
0x15fa   :  { %5890 = vmatpush3.bf16.msra.mxu1 %v4275_v59  ;;  %v4262_v46 = vsel %vm4246_vm14, %v4238_v41, %v4254_v28  ;;  %v4277_v61 = vpack.c.bf16 %v4264_v4, %v4263_v60  ;;  %v4473_v41 = vpop.permute.xlu0 %4472 }
0x15fb   :  { %v4276_v13 = vpack.c.bf16 %v4262_v46, %v4261_v31 }
0x15fd   :  { %5891 = vmatprep.subr.bf16.mxu1 %v4276_v13  ;;  %v4488_v60 = vpop.permute.xlu1 %4487 }
0x15fe   :  { %5892 = vmatpush3.bf16.msra.mxu1 %v4276_v13  ;;  %v4483_v28 = vpop.permute.xlu0 %4482 }
0x15ff   :  { %5893 = vmatprep.subr.bf16.mxu1 %v4277_v61 }
0x1602   :  { %5894 = vmatpush3.bf16.msra.mxu1 %v4277_v61  ;;  %v4493_v61 = vpop.permute.xlu0 %4492 }
0x1605   :  { %5896 = vmatmul.mubr.msk.bf16.vlgmr.msra.gmra.mrb[88].mxu1 %vm462_vm4, %v6096_v33 }
0x1606   :  { %5899 = vmatprep.mubr.msk.bf16.mxu1 %vm462_vm4, %v6097_v2 }
0x160d   :  { %5900 = vmatmul.mubr.msk.bf16.gmra.mrb[92].mxu1 %vm462_vm4, %v6098_v9 }
0x160e   :  { %5911 = vmatprep.mubr.msk.bf16.mxu1 %vm462_vm4, %v6099_v24 }
0x16d8   :  { %v5897_v32 = vpop.f32.mrb[88].mxu1 }
0x16d9   :  { %v4402_v30 = vadd.f32 %v5897_v32, %v4300_v58  ;;  %v4393_v49 = vpop.f32.mrb[89].mxu1 }
0x16da   :  { %v4394_v44 = vadd.f32 %v4393_v49, %v4290_v43  ;;  %v5898_v1 = vpop.f32.mrb[90].mxu1  ;;  %v4498_v43 = vpop.permute.xlu1 %4497 }
0x16db   :  { %v4434_v35 = vmul.f32 0.01, %v4402_v30  ;;  %v4405_v52 = vadd.f32 %v5898_v1, %v4305_v29  ;;  %v4396_v34 = vpop.f32.mrb[91].mxu1  ;;  %vm4426_vm15 = vcmp.ge.f32.partialorder %v4402_v30, 0.0 }
0x16dc   :  { %v4432_v56 = vmul.f32 0.01, %v4394_v44  ;;  %v4397_v38 = vadd.f32 %v4396_v34, %v4295_v39  ;;  %vm4424_vm2 = vcmp.ge.f32.partialorder %v4394_v44, 0.0 }
0x16dd   :  { %vm4427_vm5 = vcmp.ge.f32.partialorder %v4405_v52, 0.0  ;;  %v4435_v25 = vmul.f32 0.01, %v4405_v52  ;;  %v4442_v0 = vsel %vm4426_vm15, %v4402_v30, %v4434_v35 }
0x16de   :  { %vm4425_vm6 = vcmp.ge.f32.partialorder %v4397_v38, 0.0  ;;  %v4433_v8 = vmul.f32 0.01, %v4397_v38  ;;  %v4440_v23 = vsel %vm4424_vm2, %v4394_v44, %v4432_v56 }
0x16df   :  { %v4443_v15 = vsel %vm4427_vm5, %v4405_v52, %v4435_v25 }
0x16e0   :  { %v5901_v10 = vpop.f32.mrb[92].mxu1  ;;  %v4441_v3 = vsel %vm4425_vm6, %v4397_v38, %v4433_v8  ;;  %v4458_v42 = vpack.c.bf16 %v4443_v15, %v4442_v0  ;;  %v4508_v38 = vpop.permute.xlu1 %4507 }
0x16e1   :  { %v4418_v36 = vadd.f32 %v5901_v10, %v4320_v47  ;;  %v4409_v11 = vpop.f32.mrb[93].mxu1  ;;  %v4457_v12 = vpack.c.bf16 %v4441_v3, %v4440_v23 }
0x16e2   :  { %v4410_v21 = vadd.f32 %v4409_v11, %v4310_v55  ;;  %v5902_v6 = vpop.f32.mrb[94].mxu1  ;;  %v4503_v55 = vpop.permute.xlu0 %4502 }
0x16e3   :  { %v4438_v54 = vmul.f32 0.01, %v4418_v36  ;;  %v4421_v18 = vadd.f32 %v5902_v6, %v4325_v63  ;;  %v4412_v51 = vpop.f32.mrb[95].mxu1  ;;  %5903 = vmatprep.subr.bf16.mxu1 %v4457_v12  ;;  %vm4430_vm7 = vcmp.ge.f32.partialorder %v4418_v36, 0.0 }
0x16e4   :  { %v4436_v40 = vmul.f32 0.01, %v4410_v21  ;;  %v4413_v17 = vadd.f32 %v4412_v51, %v4315_v5  ;;  %5904 = vmatpush3.bf16.msra.mxu1 %v4457_v12  ;;  %vm4428_vm1 = vcmp.ge.f32.partialorder %v4410_v21, 0.0 }
0x16e5   :  { %vm4431_vm3 = vcmp.ge.f32.partialorder %v4421_v18, 0.0  ;;  %v4439_v59 = vmul.f32 0.01, %v4421_v18  ;;  %5905 = vmatprep.subr.bf16.mxu1 %v4458_v42  ;;  %v4446_v37 = vsel %vm4430_vm7, %v4418_v36, %v4438_v54  ;;  %v6103_v54 = vld [vmem:[%s7552_s10 + $0x28] sm:$0xff]  }
0x16e6   :  { %vm4429_vm8 = vcmp.ge.f32.partialorder %v4413_v17, 0.0  ;;  %v4437_v48 = vmul.f32 0.01, %v4413_v17  ;;  %v4444_v16 = vsel %vm4428_vm1, %v4410_v21, %v4436_v40 }
0x16e7   :  { %v4447_v45 = vsel %vm4431_vm3, %v4421_v18, %v4439_v59  ;;  %v4644_v18 = vpop.permute.xlu0 %4643 }
0x16e8   :  { %5906 = vmatpush3.bf16.msra.mxu1 %v4458_v42  ;;  %v4445_v26 = vsel %vm4429_vm8, %v4413_v17, %v4437_v48  ;;  %v4460_v20 = vpack.c.bf16 %v4447_v45, %v4446_v37 }
0x16e9   :  { %v4459_v50 = vpack.c.bf16 %v4445_v26, %v4444_v16 }
0x16eb   :  { %5907 = vmatprep.subr.bf16.mxu1 %v4459_v50 }
0x16ec   :  { %5908 = vmatpush3.bf16.msra.mxu1 %v4459_v50 }
0x16ed   :  { %5909 = vmatprep.subr.bf16.mxu1 %v4460_v20 }
0x16f0   :  { %5910 = vmatpush3.bf16.msra.mxu1 %v4460_v20 }
0x16f1   :  { %5931 = vmatprep.subr.bf16.mxu1 %v6178_v7 }
0x16f3   :  { %5912 = vmatmul.mubr.msk.bf16.vlgmr.msra.gmra.mrb[96].mxu1 %vm462_vm4, %v6100_v14 }
0x16f4   :  { %5915 = vmatprep.mubr.msk.bf16.mxu1 %vm462_vm4, %v6101_v19 }
0x16fb   :  { %5916 = vmatmul.mubr.msk.bf16.gmra.mrb[100].mxu1 %vm462_vm4, %v6102_v62  ;;  %v4649_v62 = vpop.permute.xlu1 %4648 }
0x16fc   :  { %5933 = vmatprep.mubr.msk.bf16.mxu1 %vm6179_vm9, %v6178_v7 }
0x17c6   :  { %v5913_v4 = vpop.f32.mrb[96].mxu1 }
0x17c7   :  { %v4585_v31 = vadd.f32 %v5913_v4, %v4483_v28  ;;  %v4576_v46 = vpop.f32.mrb[97].mxu1 }
0x17c8   :  { %v4577_v13 = vadd.f32 %v4576_v46, %v4473_v41  ;;  %v5914_v33 = vpop.f32.mrb[98].mxu1 }
0x17c9   :  { %v4617_v2 = vmul.f32 0.01, %v4585_v31  ;;  %v4588_v9 = vadd.f32 %v5914_v33, %v4488_v60  ;;  %v4579_v24 = vpop.f32.mrb[99].mxu1  ;;  %vm4609_vm10 = vcmp.ge.f32.partialorder %v4585_v31, 0.0 }
0x17ca   :  { %v4615_v39 = vmul.f32 0.01, %v4577_v13  ;;  %v4580_v58 = vadd.f32 %v4579_v24, %v4478_v57  ;;  %vm4607_vm11 = vcmp.ge.f32.partialorder %v4577_v13, 0.0 }
0x17cb   :  { %vm4610_vm12 = vcmp.ge.f32.partialorder %v4588_v9, 0.0  ;;  %v4618_v29 = vmul.f32 0.01, %v4588_v9  ;;  %v4625_v30 = vsel %vm4609_vm10, %v4585_v31, %v4617_v2  ;;  %v6104_v31 = vld [vmem:[%s7546_s4 + $0x10] sm:$0xff]  }
0x17cc   :  { %vm4608_vm9 = vcmp.ge.f32.partialorder %v4580_v58, 0.0  ;;  %v4616_v32 = vmul.f32 0.01, %v4580_v58  ;;  %v4623_v44 = vsel %vm4607_vm11, %v4577_v13, %v4615_v39 }
0x17cd   :  { %v4626_v49 = vsel %vm4610_vm12, %v4588_v9, %v4618_v29 }
0x17ce   :  { %v4635_v1 = vpack.c.bf16 %v4626_v49, %v4625_v30  ;;  %v4624_v35 = vsel %vm4608_vm9, %v4580_v58, %v4616_v32  ;;  %v5917_v52 = vpop.f32.mrb[100].mxu1 }
0x17cf   :  { %v4634_v34 = vpack.c.bf16 %v4624_v35, %v4623_v44  ;;  %v4601_v5 = vadd.f32 %v5917_v52, %v4503_v55  ;;  %v4592_v56 = vpop.f32.mrb[101].mxu1 }
0x17d0   :  { %v4593_v25 = vadd.f32 %v4592_v56, %v4493_v61  ;;  %v5918_v8 = vpop.f32.mrb[102].mxu1 }
0x17d1   :  { %v4621_v0 = vmul.f32 0.01, %v4601_v5  ;;  %v4604_v15 = vadd.f32 %v5918_v8, %v4508_v38  ;;  %v4595_v47 = vpop.f32.mrb[103].mxu1  ;;  %5920 = vmatpush3.bf16.msra.mxu0 %v4634_v34  ;;  %vm4613_vm13 = vcmp.ge.f32.partialorder %v4601_v5, 0.0 }
0x17d2   :  { %v4619_v10 = vmul.f32 0.01, %v4593_v25  ;;  %v4596_v23 = vadd.f32 %v4595_v47, %v4498_v43  ;;  %5921 = vmatprep.subr.bf16.mxu0 %v6178_v7  ;;  %vm4611_vm14 = vcmp.ge.f32.partialorder %v4593_v25, 0.0 }
0x17d3   :  { %vm4614_vm15 = vcmp.ge.f32.partialorder %v4604_v15, 0.0  ;;  %v4622_v3 = vmul.f32 0.01, %v4604_v15  ;;  %v4629_v36 = vsel %vm4613_vm13, %v4601_v5, %v4621_v0 }
0x17d4   :  { %vm4612_vm2 = vcmp.ge.f32.partialorder %v4596_v23, 0.0  ;;  %v4620_v42 = vmul.f32 0.01, %v4596_v23  ;;  %v4627_v12 = vsel %vm4611_vm14, %v4593_v25, %v4619_v10 }
0x17d5   :  { %v4630_v11 = vsel %vm4614_vm15, %v4604_v15, %v4622_v3  ;;  %5922 = vmatpush3.bf16.msra.mxu0 %v4635_v1 }
0x17d6   :  { %v4637_v63 = vpack.c.bf16 %v4630_v11, %v4629_v36  ;;  %v4628_v21 = vsel %vm4612_vm2, %v4596_v23, %v4620_v42  ;;  %5923 = vmatprep.subr.bf16.mxu0 %v6178_v7 }
0x17d7   :  { %v4636_v6 = vpack.c.bf16 %v4628_v21, %v4627_v12 }
0x17d9   :  { %5924 = vmatpush3.bf16.msra.mxu0 %v4636_v6 }
0x17da   :  { %5925 = vmatprep.subr.bf16.mxu0 %v6178_v7 }
0x17dd   :  { %5926 = vmatpush3.bf16.msra.mxu0 %v4637_v63 }
0x17e0   :  { %5928 = vmatmul.mubr.msk.bf16.vlgmr.msra.gmra.mrb[68].mxu0 %vm462_vm4, %v6103_v54 }
0x18b3   :  { %v4693_v51 = vpop.f32.mrb[68].mxu0 }
0x18b4   :  { %v4694_v40 = vadd.f32 %v4693_v51, %v4644_v18  ;;  %v5929_v17 = vpop.f32.mrb[69].mxu0 }
0x18b5   :  { %v4696_v59 = vpop.f32.mrb[70].mxu0 }
0x18b6   :  { %6125 = vtanh.f32 %v4694_v40  ;;  %v5930_v48 = vpop.f32.mrb[71].mxu0  ;;  %v4697_v57 = vadd.f32 %v4696_v59, %v4649_v62 }
0x18c0   :  { %v6126_v37 = vpop.eup %6125 }
0x18c1   :  { %v4701_v45 = vmul.f32 1.442695, %v6126_v37  ;;  %v4712_v16 = vrot.slane %v6126_v37, 4 }
0x18c3   :  { %6127 = vpow2.f32 %v4701_v45  ;;  %v4713_v26 = vadd.f32 %v6126_v37, %v4712_v16 }
0x18c5   :  { %v4714_v7 = vrot.slane %v4713_v26, 2 }
0x18c7   :  { %v4715_v20 = vadd.f32 %v4714_v7, %v4713_v26 }
0x18c9   :  { %v4716_v50 = vrot.slane %v4715_v20, 1 }
0x18cb   :  { %v4717_v14 = vadd.f32 %v4716_v50, %v4715_v20 }
0x18cd   :  { %v6128_v19 = vpop.eup %6127  ;;  %v4718_v41 = vadd.f32 %v4717_v14, %v7446_v22 }
0x18ce   :  { %v4703_v28 = vmul.f32 %v6128_v19, %v7362_v27 }
0x18cf   :  { %4774 = vst [vmem:[#allocation4] sm:$0x1] %v4718_v41 }
0x18d0   :  { %v4704_v60 = vadd.f32 %v4703_v28, %v4697_v57 }
0x18d2   :  { %v4719_v4 = vpack.c.bf16 %v4704_v60, %v7448_v53 }
0x18d4   :  { %5932 = vmatpush3.bf16.msra.mxu1 %v4719_v4 }
0x18d7   :  { %5934 = vmatmul.mubr.msk.bf16.vlgmr.msra.gmra.mrb[104].mxu1 %vm122_vm0, %v6104_v31 }
0x18d8   :  { %6140 = shalt.err (!%p6137_p4)
}
0x18d9   :  { %s6141_s21 = scalar_lea.hbm %s7555_s13, 16 }
0x18da   :  { %p6142_p5 = scmp.ne.s32.totalorder %s7555_s13, %s6141_s21  ;;  %p6145_p6 = scmp.lt.u32.totalorder %s6141_s21, %s7555_s13 }
0x18dc   :  { %p6147_p7 = pnand %p6145_p6, %p6142_p5 }
0x18de   :  { %6150 = shalt.err (!%p6147_p7)
}
0x18df   :  { %4796 = dma.vmem_to_hbm [thread:$0]  %s4794_s9, 16, %s7555_s13, [#allocation5]  }
0x18e0   :  { %s6181_s25 = smov [#allocation2]  }
0x18e1   :  { %s4780_s26 = sshll.u32 %s6181_s25, 4  ;;  %s4781_s26 = int_to_ptr.vmem [resolvable:$true] %s4780_s26 }
0x18e2   :  { %s6151_s1 = scalar_lea.vmem %s4781_s26, 256  ;;  %p6156_p9 = scmp.lt.s32.totalorder %s4781_s26, %s4781_s26 }
0x18e3   :  { %p6152_p8 = scmp.ne.s32.totalorder %s4781_s26, %s6151_s1  ;;  %p6157_p10 = scmp.lt.s32.totalorder %s6151_s1, %s6151_s1 }
0x18e5   :  { %p6158_p11 = por %p6157_p10, %p6156_p9 }
0x18e7   :  { %p6159_p12 = pnand %p6158_p11, %p6152_p8 }
0x19aa   :  { %v4765_v27 = vpop.f32.mrb[104].mxu1 }
0x19ab   :  { %4772 = vst [vmem:[#allocation2] sm:$0xff] %v4765_v27  ;;  %v5935_v22 = vpop.f32.mrb[105].mxu1 }
0x19ac   :  { %v4768_v53 = vpop.f32.mrb[106].mxu1 }
0x19ad   :  { %4773 = vst [vmem:[#allocation2 + $0x8] sm:$0xff] %v4768_v53  ;;  %v5936_v46 = vpop.f32.mrb[107].mxu1 }
0x19ae   :  { %6162 = shalt.err (!%p6159_p12)
}
0x19af   :  { %s6163_s13 = scalar_lea.hbm %s7554_s12, 256 }
0x19b0   :  { %p6164_p13 = scmp.ne.s32.totalorder %s7554_s12, %s6163_s13  ;;  %p6167_p0 = scmp.lt.u32.totalorder %s6163_s13, %s7554_s12 }
0x19b2   :  { %p6169_p1 = pnand %p6167_p0, %p6164_p13 }
0x19b4   :  { %6172 = shalt.err (!%p6169_p1)
}
0x19b5   :  { %s6182_s14 = smov 128   ;;  %s6183_s3 = smov 8  }
0x19b6   :  { %4786 = dma.vmem_to_hbm [thread:$0]  %s4781_s26, 256, %s7554_s12, [#allocation3], %s6182_s14, %s6182_s14, %s6183_s3  }
0x19b7   :  { %6173 = dma.done.wait [#allocation3], 256  }
0x19b8   :  { %6174 = vsyncadd [#allocation3], 4294967040 }
0x19b9   :  { %6175 = dma.done.wait [#allocation5], 16  }
0x19ba   :  { %6176 = vsyncadd [#allocation5], 4294967280 }
0x19bb   :  { %4803 = vsyncpa [#allocation3], 1 }
0x19bc   :  { %4804 = vsyncpa [#allocation5], 1 }

</bundles_post_ra>
